<compile_context>
chip_gen: v6e
topology: v6e:2x2x1
jax: 0.10.0
libtpu: 0.0.40
codegen_flags: <defaults>
</compile_context>

<pallas_src>
import functools
import math

import jax
import jax.numpy as jnp
import numpy as np
from jax.experimental import pallas as pl
from jax.experimental.pallas import tpu as pltpu

LANE = 128    # lanes per batch element (keeps every activation store lane-dense)
MARGIN = 128  # zero halo on each slab side: keeps shifted conv-tap reads in bounds and
              # keeps every layer store lane-aligned
OFF = 4       # data offset inside each 128-lane segment; >= max left 'same' pad (3 for K=8)


# ----------------------------------------------------------------------------
# Fused Pallas kernel (one grid step == one segment of SEG_B batch elements)
# ----------------------------------------------------------------------------
def _resnet1d_fused_kernel(*refs, cfg):
    """Whole ResNet1D forward for one batch segment, everything resident in VMEM.

    Activation layout: 3 rotating (c_max, MARGIN + SEG_B*128 + MARGIN) slabs in the
    compute dtype.  Batch element b, time step t lives at lane MARGIN + b*128 + OFF + t;
    all other lanes are kept at zero and double as Conv1d(padding='same') zero padding.
    """
    seg_b, L, T = cfg["seg_b"], cfg["L"], cfg["T"]
    blocks = cfg["blocks"]

    it = iter(refs)
    x_ref = next(it)
    blk_refs = []
    for blk in blocks:
        convs = [(next(it), next(it)) for _ in blk["convs"]]
        res = (next(it), next(it)) if blk["has_res"] else None
        blk_refs.append((convs, res))
    wlin_ref, blin_ref = next(it), next(it)
    o_ref = next(it)
    bufs = [next(it), next(it), next(it)]

    cdtype = bufs[0].dtype

    # Re-zero the halos every grid step (cheap; megacore-safe because each core owns its
    # own scratch and may start at any program_id).  In-window padding lanes are kept at
    # zero by the mask applied to every layer store.
    zeros_margin = jnp.zeros((bufs[0].shape[0], MARGIN), cdtype)
    for buf in bufs:
        buf[:, 0:MARGIN] = zeros_margin
        buf[:, MARGIN + T:MARGIN + T + MARGIN] = zeros_margin

    # Input already laid out as a (C0, T) lane slab by the wrapper -> one dense store.
    C0 = x_ref.shape[1]
    bufs[0][0:C0, MARGIN:MARGIN + T] = x_ref[0]

    # Valid-data lane mask (1.0 on real time steps), generated in-kernel.
    pos = jax.lax.broadcasted_iota(jnp.int32, (1, T), 1) % LANE
    mask = jnp.logical_and(pos >= OFF, pos < OFF + L).astype(jnp.float32)

    cur = 0  # index of the slab holding the current block input
    for blk, (convs, res) in zip(blocks, blk_refs):
        src = bufs[cur]
        mid1 = bufs[(cur + 1) % 3]
        mid2 = bufs[(cur + 2) % 3]
        # conv1, conv2, conv3 buffer routing: block input (src) stays alive for the shortcut.
        io = [(src, mid1), (mid1, mid2), (mid2, mid1)]

        for j, (lyr, (w_ref, b_ref)) in enumerate(zip(blk["convs"], convs)):
            K, cin, cout, left = lyr["K"], lyr["cin"], lyr["cout"], lyr["left"]
            rsrc, dst = io[j]
            # Conv1d('same') as K per-tap MXU matmuls accumulated in f32; shifted
            # full-width reads land in the zero halo / zero padding lanes as needed.
            acc = jnp.dot(w_ref[0], rsrc[0:cin, MARGIN - left:MARGIN - left + T],
                          preferred_element_type=jnp.float32)
            for k in range(1, K):
                d = k - left
                acc = acc + jnp.dot(w_ref[k], rsrc[0:cin, MARGIN + d:MARGIN + d + T],
                                    preferred_element_type=jnp.float32)
            acc = jnp.maximum(acc + b_ref[...], 0.0)          # folded BN bias + ReLU
            if j == 2 and res is not None:
                # 1x1 Conv + folded BN shortcut fused as one extra tap on the block input
                # (added after the ReLU chain, no ReLU on the sum — as in PyTorch).
                rw_ref, rb_ref = res
                cin0 = blk["convs"][0]["cin"]
                acc = acc + (jnp.dot(rw_ref[...], src[0:cin0, MARGIN:MARGIN + T],
                                     preferred_element_type=jnp.float32) + rb_ref[...])
            # Lane-aligned, width-T (multiple of 128) dense store; the mask keeps padding
            # lanes at zero so they serve as the next layer's 'same' zero padding.
            dst[0:cout, MARGIN:MARGIN + T] = (acc * mask).astype(cdtype)
        cur = (cur + 1) % 3   # conv3 wrote the block output into bufs[cur]

    # Head: AdaptiveAvgPool1d(1) as a lane reduction (padding lanes are already zero),
    # then Linear + LogSoftmax over classes.
    c_last = blocks[-1]["convs"][-1]["cout"]
    win = bufs[cur][0:c_last, MARGIN:MARGIN + T].astype(jnp.float32)
    pooled = jnp.sum(win.reshape(c_last, seg_b, LANE), axis=-1) * (1.0 / L)   # (C, SEG_B)
    logits = jnp.dot(wlin_ref[...], pooled,
                     preferred_element_type=jnp.float32) + blin_ref[...]      # (NC, SEG_B)
    m = jnp.max(logits, axis=0, keepdims=True)
    lse = jnp.log(jnp.sum(jnp.exp(logits - m), axis=0, keepdims=True)) + m
    o_ref[0] = logits - lse


# ----------------------------------------------------------------------------
# One-time parameter preparation (hoisted out of the forward path)
# ----------------------------------------------------------------------------
def prepare_params(params, compute_dtype=jnp.bfloat16):
    """Split conv weights per tap as (K, Cout, Cin), cast MXU inputs to `compute_dtype`,
    keep biases / head in f32."""
    blocks_cfg, tensors = [], []
    c_max = 0
    for blk in params["blocks"]:
        convs_cfg = []
        for (w_f, b_f) in (blk["conv1"], blk["conv2"], blk["conv3"]):
            cout, cin, K = w_f.shape
            tensors += [jnp.transpose(w_f, (2, 0, 1)).astype(compute_dtype),
                        b_f.reshape(cout, 1).astype(jnp.float32)]
            convs_cfg.append(dict(K=int(K), cin=int(cin), cout=int(cout),
                                  left=(int(K) - 1) // 2))
            c_max = max(c_max, int(cin), int(cout))
        has_res = blk["residual"] is not None
        if has_res:
            w_f, b_f = blk["residual"]
            cout, cin, _ = w_f.shape   # K == 1
            tensors += [w_f.reshape(cout, cin).astype(compute_dtype),
                        b_f.reshape(cout, 1).astype(jnp.float32)]
        blocks_cfg.append(dict(convs=convs_cfg, has_res=has_res))
    w_lin = params["w_lin"].astype(jnp.float32)
    b_lin = params["b_lin"].reshape(-1, 1).astype(jnp.float32)
    c_max = ((c_max + 15) // 16) * 16   # sublane-packing friendly for bf16 slabs
    return dict(blocks_cfg=blocks_cfg, tensors=tensors, w_lin=w_lin, b_lin=b_lin,
                num_classes=int(w_lin.shape[0]), c_max=c_max,
                compute_dtype=compute_dtype)


# ----------------------------------------------------------------------------
# Forward wrapper: one pallas_call gridded over batch segments
# ----------------------------------------------------------------------------
def resnet1d_forward(x, prep, seg_b=8):
    """x: (B, 1, S, F) -> log-probs (B, num_classes)."""
    B, _, S, F = x.shape
    L, C0 = S, F
    assert OFF >= 3 and OFF + L + 4 <= LANE, (
        "TODO(synk): tile the length axis with a K-1 halo for sequences longer than "
        f"{LANE - OFF - 4}")
    cdtype = prep["compute_dtype"]
    NC = prep["num_classes"]
    c_max = prep["c_max"]

    seg_b = int(max(1, min(seg_b, B)))
    num_seg = -(-B // seg_b)              # cdiv
    B_pad = num_seg * seg_b
    T = seg_b * LANE
    TW = T + 2 * MARGIN

    # Host-side layout: (B,1,S,F) -> (B,C0,L) -> zero-padded 128-lane segment per batch
    # element -> (num_seg, C0, SEG_B*128) slab, so every in-kernel store is lane-dense.
    h = x.reshape(B, S, F).transpose(0, 2, 1)                        # (B, C0, L)
    h = jnp.pad(h, ((0, B_pad - B), (0, 0), (OFF, LANE - OFF - L)))  # (B_pad, C0, 128)
    slab = (h.reshape(num_seg, seg_b, C0, LANE)
             .transpose(0, 2, 1, 3)
             .reshape(num_seg, C0, T)
             .astype(cdtype))

    args = [slab, *prep["tensors"], prep["w_lin"], prep["b_lin"]]

    cfg = dict(seg_b=seg_b, L=L, T=T, blocks=prep["blocks_cfg"])
    kernel = functools.partial(_resnet1d_fused_kernel, cfg=cfg)

    # Per-grid-step VMEM budget: 3 activation slabs + resident weights + double-buffered
    # input/output blocks (independent of total batch size thanks to the segment grid).
    dsz = np.dtype(cdtype).itemsize
    weight_bytes = sum(int(np.prod(t.shape)) * t.dtype.itemsize for t in args[1:])
    need = 3 * c_max * TW * dsz + weight_bytes + 2 * C0 * T * dsz + 2 * NC * seg_b * 4
    vmem_limit = int(min(max(2 * need + (2 << 20), 8 << 20), 64 << 20))

    # Advisory cost estimate for the XLA scheduler.
    macs = 0
    for blk in prep["blocks_cfg"]:
        for lyr in blk["convs"]:
            macs += lyr["cout"] * lyr["K"] * lyr["cin"]
        if blk["has_res"]:
            macs += blk["convs"][-1]["cout"] * blk["convs"][0]["cin"]
    c_last = prep["blocks_cfg"][-1]["convs"][-1]["cout"]
    flops = 2 * macs * (num_seg * T) + 2 * NC * c_last * B_pad
    bytes_accessed = (int(np.prod(slab.shape)) * dsz + weight_bytes
                      + num_seg * NC * seg_b * 4)
    cost = pl.CostEstimate(flops=int(flops), transcendentals=int(B_pad * NC),
                           bytes_accessed=int(bytes_accessed))

    out = pl.pallas_call(
        kernel,
        out_shape=jax.ShapeDtypeStruct((num_seg, NC, seg_b), jnp.float32),
        grid=(num_seg,),
        in_specs=([pl.BlockSpec((1, C0, T), lambda s: (s, 0, 0))]
                  + [pl.BlockSpec(memory_space=pltpu.MemorySpace.VMEM)]
                  * (len(args) - 1)),
        out_specs=pl.BlockSpec((1, NC, seg_b), lambda s: (s, 0, 0)),
        scratch_shapes=[pltpu.VMEM((c_max, TW), cdtype) for _ in range(3)],
        compiler_params=pltpu.CompilerParams(
            dimension_semantics=("parallel",),
            vmem_limit_bytes=vmem_limit),
        cost_estimate=cost,
    )(*args)

    return out.transpose(0, 2, 1).reshape(B_pad, NC)[:B]   # (B, num_classes)


# ----------------------------------------------------------------------------
# Deterministic parameter construction (BN folded into conv)
# ----------------------------------------------------------------------------
def init_conv_bn(key, cin, cout, k):
    kw, kb, kg, kbe, km, kv = jax.random.split(key, 6)
    bound = 1.0 / math.sqrt(cin * k)
    w = jax.random.uniform(kw, (cout, cin, k), jnp.float32, -bound, bound)
    b = jax.random.uniform(kb, (cout,), jnp.float32, -bound, bound)
    gamma = jax.random.uniform(kg, (cout,), jnp.float32, 0.5, 1.5)
    beta = jax.random.uniform(kbe, (cout,), jnp.float32, -0.1, 0.1)
    mean = 0.1 * jax.random.normal(km, (cout,), jnp.float32)
    var = jax.random.uniform(kv, (cout,), jnp.float32, 0.5, 1.5)
    scale = gamma / jnp.sqrt(var + 1e-5)
    w_f = w * scale[:, None, None]
    b_f = (b - mean) * scale + beta
    return w_f, b_f


def init_params(key, in_channels, mid_channels, num_classes):
    keys = jax.random.split(key, 13)

    def make_block(ks, cin, cout, with_res):
        return {
            "conv1": init_conv_bn(ks[0], cin, cout, 8),
            "conv2": init_conv_bn(ks[1], cout, cout, 5),
            "conv3": init_conv_bn(ks[2], cout, cout, 3),
            "residual": init_conv_bn(ks[3], cin, cout, 1) if with_res else None,
        }

    blocks = [
        make_block(keys[0:4], in_channels, mid_channels, True),
        make_block(keys[4:8], mid_channels, 2 * mid_channels, True),
        # in_channels == out_channels -> no shortcut (matches the PyTorch module exactly)
        make_block(keys[8:12], 2 * mid_channels, 2 * mid_channels, False),
    ]
    klw, klb = jax.random.split(keys[12])
    fan_in = 2 * mid_channels
    bound = 1.0 / math.sqrt(fan_in)
    w_lin = jax.random.uniform(klw, (num_classes, fan_in), jnp.float32, -bound, bound)
    b_lin = jax.random.uniform(klb, (num_classes,), jnp.float32, -bound, bound)
    return {"blocks": blocks, "w_lin": w_lin, "b_lin": b_lin}


# ----------------------------------------------------------------------------
# Pure-JAX reference (for correctness check)
# ----------------------------------------------------------------------------
def ref_forward(x, params):
    B, _, S, F = x.shape
    h = x.reshape(B, S, F).transpose(0, 2, 1).astype(jnp.float32)

    def conv(h, w, b, relu):
        K = w.shape[2]
        tot = K - 1
        left = tot // 2
        out = jax.lax.conv_general_dilated(
            h, w, window_strides=(1,), padding=[(left, tot - left)],
            dimension_numbers=("NCH", "OIH", "NCH"),
        )
        out = out + b[None, :, None]
        return jnp.maximum(out, 0.0) if relu else out

    for blk in params["blocks"]:
        inp = h
        y = conv(inp, *blk["conv1"], True)
        y = conv(y, *blk["conv2"], True)
        y = conv(y, *blk["conv3"], True)
        if blk["residual"] is not None:
            y = y + conv(inp, *blk["residual"], False)
        h = y

    pooled = jnp.mean(h, axis=2)
    logits = pooled @ params["w_lin"].T + params["b_lin"]
    return jax.nn.log_softmax(logits, axis=1)


# ----------------------------------------------------------------------------
if __name__ == "__main__":
    # Small shapes consistent with ResNet1D.forward:
    #   x: (batch, 1, sequence_length, num_features), in_channels == num_features
    B, S, F = 2, 16, 32          # in_channels = 32
    MID = 16                     # mid_channels
    NUM_CLASSES = 4

    key = jax.random.PRNGKey(0)
    kx, kp = jax.random.split(key)
    x = jax.random.normal(kx, (B, 1, S, F), jnp.float32)
    params = init_params(kp, in_channels=F, mid_channels=MID, num_classes=NUM_CLASSES)

    ref = jax.block_until_ready(ref_forward(x, params))

    # Strict check: f32 everywhere, 1 batch element per grid step -> grid=(2,) exercises
    # the parallel segment grid.  (Tolerance covers the per-tap f32 accumulation order
    # vs XLA's fused conv reduction.)
    out_f32 = jax.block_until_ready(
        resnet1d_forward(x, prepare_params(params, compute_dtype=jnp.float32), seg_b=1))
    assert out_f32.shape == (B, NUM_CLASSES), out_f32.shape
    assert bool(jnp.all(jnp.isfinite(out_f32)))
    assert jnp.allclose(out_f32, ref, rtol=1e-2, atol=1e-2), (out_f32, ref)

    # Production path: bf16 activation slabs / weights, f32 accumulation & head,
    # 2 batch elements per segment -> grid=(1,).
    out_bf16 = jax.block_until_ready(
        resnet1d_forward(x, prepare_params(params, compute_dtype=jnp.bfloat16), seg_b=2))
    assert out_bf16.shape == (B, NUM_CLASSES), out_bf16.shape
    assert bool(jnp.all(jnp.isfinite(out_bf16)))
    assert jnp.allclose(out_bf16, ref, rtol=1e-1, atol=1e-1), (out_bf16, ref)

    print("KERNEL_OK")
</pallas_src>

<mosaic_0001>
module attributes {stable_mosaic.version = 11 : i64} {
  func.func @_resnet1d_fused_kernel(%arg0: i32, %arg1: memref<1x32x128xf32, #tpu.memory_space<vmem>>, %arg2: memref<8x16x32xf32, #tpu.memory_space<vmem>>, %arg3: memref<16x1xf32, #tpu.memory_space<vmem>>, %arg4: memref<5x16x16xf32, #tpu.memory_space<vmem>>, %arg5: memref<16x1xf32, #tpu.memory_space<vmem>>, %arg6: memref<3x16x16xf32, #tpu.memory_space<vmem>>, %arg7: memref<16x1xf32, #tpu.memory_space<vmem>>, %arg8: memref<16x32xf32, #tpu.memory_space<vmem>>, %arg9: memref<16x1xf32, #tpu.memory_space<vmem>>, %arg10: memref<8x32x16xf32, #tpu.memory_space<vmem>>, %arg11: memref<32x1xf32, #tpu.memory_space<vmem>>, %arg12: memref<5x32x32xf32, #tpu.memory_space<vmem>>, %arg13: memref<32x1xf32, #tpu.memory_space<vmem>>, %arg14: memref<3x32x32xf32, #tpu.memory_space<vmem>>, %arg15: memref<32x1xf32, #tpu.memory_space<vmem>>, %arg16: memref<32x16xf32, #tpu.memory_space<vmem>>, %arg17: memref<32x1xf32, #tpu.memory_space<vmem>>, %arg18: memref<8x32x32xf32, #tpu.memory_space<vmem>>, %arg19: memref<32x1xf32, #tpu.memory_space<vmem>>, %arg20: memref<5x32x32xf32, #tpu.memory_space<vmem>>, %arg21: memref<32x1xf32, #tpu.memory_space<vmem>>, %arg22: memref<3x32x32xf32, #tpu.memory_space<vmem>>, %arg23: memref<32x1xf32, #tpu.memory_space<vmem>>, %arg24: memref<4x32xf32, #tpu.memory_space<vmem>>, %arg25: memref<4x1xf32, #tpu.memory_space<vmem>>, %arg26: memref<1x4x1xf32, #tpu.memory_space<vmem>>, %arg27: memref<32x384xf32, #tpu.memory_space<vmem>>, %arg28: memref<32x384xf32, #tpu.memory_space<vmem>>, %arg29: memref<32x384xf32, #tpu.memory_space<vmem>>) attributes {dimension_semantics = [#tpu.dimension_semantics<parallel>], iteration_bounds = array<i64: 2>, scalar_prefetch = 0 : i64, scratch_operands = 3 : i64, tpu.core_type = #tpu.core_type<tc>, window_params = [{transform_indices = @transform_0, window_bounds = array<i64: 1, 32, 128>}, {pipeline_mode = #tpu.pipeline_mode<synchronous>, transform_indices = @transform_1, window_bounds = array<i64: 8, 16, 32>}, {pipeline_mode = #tpu.pipeline_mode<synchronous>, transform_indices = @transform_2, window_bounds = array<i64: 16, 1>}, {pipeline_mode = #tpu.pipeline_mode<synchronous>, transform_indices = @transform_3, window_bounds = array<i64: 5, 16, 16>}, {pipeline_mode = #tpu.pipeline_mode<synchronous>, transform_indices = @transform_4, window_bounds = array<i64: 16, 1>}, {pipeline_mode = #tpu.pipeline_mode<synchronous>, transform_indices = @transform_5, window_bounds = array<i64: 3, 16, 16>}, {pipeline_mode = #tpu.pipeline_mode<synchronous>, transform_indices = @transform_6, window_bounds = array<i64: 16, 1>}, {pipeline_mode = #tpu.pipeline_mode<synchronous>, transform_indices = @transform_7, window_bounds = array<i64: 16, 32>}, {pipeline_mode = #tpu.pipeline_mode<synchronous>, transform_indices = @transform_8, window_bounds = array<i64: 16, 1>}, {pipeline_mode = #tpu.pipeline_mode<synchronous>, transform_indices = @transform_9, window_bounds = array<i64: 8, 32, 16>}, {pipeline_mode = #tpu.pipeline_mode<synchronous>, transform_indices = @transform_10, window_bounds = array<i64: 32, 1>}, {pipeline_mode = #tpu.pipeline_mode<synchronous>, transform_indices = @transform_11, window_bounds = array<i64: 5, 32, 32>}, {pipeline_mode = #tpu.pipeline_mode<synchronous>, transform_indices = @transform_12, window_bounds = array<i64: 32, 1>}, {pipeline_mode = #tpu.pipeline_mode<synchronous>, transform_indices = @transform_13, window_bounds = array<i64: 3, 32, 32>}, {pipeline_mode = #tpu.pipeline_mode<synchronous>, transform_indices = @transform_14, window_bounds = array<i64: 32, 1>}, {pipeline_mode = #tpu.pipeline_mode<synchronous>, transform_indices = @transform_15, window_bounds = array<i64: 32, 16>}, {pipeline_mode = #tpu.pipeline_mode<synchronous>, transform_indices = @transform_16, window_bounds = array<i64: 32, 1>}, {pipeline_mode = #tpu.pipeline_mode<synchronous>, transform_indices = @transform_17, window_bounds = array<i64: 8, 32, 32>}, {pipeline_mode = #tpu.pipeline_mode<synchronous>, transform_indices = @transform_18, window_bounds = array<i64: 32, 1>}, {pipeline_mode = #tpu.pipeline_mode<synchronous>, transform_indices = @transform_19, window_bounds = array<i64: 5, 32, 32>}, {pipeline_mode = #tpu.pipeline_mode<synchronous>, transform_indices = @transform_20, window_bounds = array<i64: 32, 1>}, {pipeline_mode = #tpu.pipeline_mode<synchronous>, transform_indices = @transform_21, window_bounds = array<i64: 3, 32, 32>}, {pipeline_mode = #tpu.pipeline_mode<synchronous>, transform_indices = @transform_22, window_bounds = array<i64: 32, 1>}, {pipeline_mode = #tpu.pipeline_mode<synchronous>, transform_indices = @transform_23, window_bounds = array<i64: 4, 32>}, {pipeline_mode = #tpu.pipeline_mode<synchronous>, transform_indices = @transform_24, window_bounds = array<i64: 4, 1>}, {transform_indices = @transform_25, window_bounds = array<i64: 1, 4, 1>}]} {
    %cst = arith.constant 0.000000e+00 : f32
    %0 = vector.broadcast %cst : f32 to vector<32x128xf32>
    %c0 = arith.constant 0 : index
    %c0_0 = arith.constant 0 : index
    %1 = vector.load %arg27[%c0, %c0_0] : memref<32x384xf32, #tpu.memory_space<vmem>>, vector<32x128xf32>
    tpu.vector_store %arg27[%c0, %c0_0], %0 {strides = array<i32>} : memref<32x384xf32, #tpu.memory_space<vmem>>, vector<32x128xf32>,
    %c0_1 = arith.constant 0 : index
    %c256 = arith.constant 256 : index
    %2 = vector.load %arg27[%c0_1, %c256] : memref<32x384xf32, #tpu.memory_space<vmem>>, vector<32x128xf32>
    tpu.vector_store %arg27[%c0_1, %c256], %0 {strides = array<i32>} : memref<32x384xf32, #tpu.memory_space<vmem>>, vector<32x128xf32>,
    %c0_2 = arith.constant 0 : index
    %c0_3 = arith.constant 0 : index
    %3 = vector.load %arg28[%c0_2, %c0_3] : memref<32x384xf32, #tpu.memory_space<vmem>>, vector<32x128xf32>
    tpu.vector_store %arg28[%c0_2, %c0_3], %0 {strides = array<i32>} : memref<32x384xf32, #tpu.memory_space<vmem>>, vector<32x128xf32>,
    %c0_4 = arith.constant 0 : index
    %c256_5 = arith.constant 256 : index
    %4 = vector.load %arg28[%c0_4, %c256_5] : memref<32x384xf32, #tpu.memory_space<vmem>>, vector<32x128xf32>
    tpu.vector_store %arg28[%c0_4, %c256_5], %0 {strides = array<i32>} : memref<32x384xf32, #tpu.memory_space<vmem>>, vector<32x128xf32>,
    %c0_6 = arith.constant 0 : index
    %c0_7 = arith.constant 0 : index
    %5 = vector.load %arg29[%c0_6, %c0_7] : memref<32x384xf32, #tpu.memory_space<vmem>>, vector<32x128xf32>
    tpu.vector_store %arg29[%c0_6, %c0_7], %0 {strides = array<i32>} : memref<32x384xf32, #tpu.memory_space<vmem>>, vector<32x128xf32>,
    %c0_8 = arith.constant 0 : index
    %c256_9 = arith.constant 256 : index
    %6 = vector.load %arg29[%c0_8, %c256_9] : memref<32x384xf32, #tpu.memory_space<vmem>>, vector<32x128xf32>
    tpu.vector_store %arg29[%c0_8, %c256_9], %0 {strides = array<i32>} : memref<32x384xf32, #tpu.memory_space<vmem>>, vector<32x128xf32>,
    %c0_10 = arith.constant 0 : index
    %c0_11 = arith.constant 0 : index
    %c0_12 = arith.constant 0 : index
    %7 = vector.load %arg1[%c0_10, %c0_11, %c0_12] : memref<1x32x128xf32, #tpu.memory_space<vmem>>, vector<1x32x128xf32>
    %8 = vector.shape_cast %7 : vector<1x32x128xf32> to vector<32x128xf32>
    %c0_13 = arith.constant 0 : index
    %c128 = arith.constant 128 : index
    %9 = vector.load %arg27[%c0_13, %c128] : memref<32x384xf32, #tpu.memory_space<vmem>>, vector<32x128xf32>
    tpu.vector_store %arg27[%c0_13, %c128], %8 {strides = array<i32>} : memref<32x384xf32, #tpu.memory_space<vmem>>, vector<32x128xf32>,
    %10 = tpu.iota {dimensions = array<i32: 1>} : vector<1x128xi32>
    %c128_i32 = arith.constant 128 : i32
    %c0_i32 = arith.constant 0 : i32
    %11 = arith.cmpi eq, %c128_i32, %c0_i32 : i32
    %c1_i32 = arith.constant 1 : i32
    %12 = arith.select %11, %c1_i32, %c128_i32 : i32
    %13 = vector.broadcast %12 : i32 to vector<1x128xi32>
    %14 = arith.remsi %10, %13 : vector<1x128xi32>
    %c0_i32_14 = arith.constant 0 : i32
    %15 = vector.broadcast %c0_i32_14 : i32 to vector<1x128xi32>
    %16 = arith.cmpi ne, %14, %15 : vector<1x128xi32>
    %c0_i32_15 = arith.constant 0 : i32
    %17 = vector.broadcast %c0_i32_15 : i32 to vector<1x128xi32>
    %18 = arith.cmpi slt, %14, %17 : vector<1x128xi32>
    %c0_i32_16 = arith.constant 0 : i32
    %19 = arith.cmpi slt, %12, %c0_i32_16 : i32
    %20 = vector.broadcast %19 : i1 to vector<1x128xi1>
    %21 = vector.broadcast %20 : vector<1x128xi1> to vector<1x128xi1>
    %22 = arith.xori %18, %21 : vector<1x128xi1>
    %23 = arith.andi %22, %16 : vector<1x128xi1>
    %24 = vector.broadcast %12 : i32 to vector<1x128xi32>
    %25 = arith.addi %14, %24 : vector<1x128xi32>
    %26 = arith.select %23, %25, %14 : vector<1x128xi1>, vector<1x128xi32>
    %c4_i32 = arith.constant 4 : i32
    %27 = vector.broadcast %c4_i32 : i32 to vector<1x128xi32>
    %28 = arith.cmpi sge, %26, %27 : vector<1x128xi32>
    %c20_i32 = arith.constant 20 : i32
    %29 = vector.broadcast %c20_i32 : i32 to vector<1x128xi32>
    %30 = arith.cmpi slt, %26, %29 : vector<1x128xi32>
    %31 = arith.andi %28, %30 : vector<1x128xi1>
    %32 = arith.extui %31 : vector<1x128xi1> to vector<1x128xi32>
    %33 = arith.sitofp %32 : vector<1x128xi32> to vector<1x128xf32>
    %c0_17 = arith.constant 0 : index
    %c0_18 = arith.constant 0 : index
    %c0_19 = arith.constant 0 : index
    %34 = vector.load %arg2[%c0_17, %c0_18, %c0_19] : memref<8x16x32xf32, #tpu.memory_space<vmem>>, vector<1x16x32xf32>
    %35 = vector.shape_cast %34 : vector<1x16x32xf32> to vector<16x32xf32>
    %c0_20 = arith.constant 0 : index
    %c125 = arith.constant 125 : index
    %36 = vector.load %arg27[%c0_20, %c125] : memref<32x384xf32, #tpu.memory_space<vmem>>, vector<32x128xf32>
    %cst_21 = arith.constant dense<0.000000e+00> : vector<16x128xf32>
    %37 = tpu.matmul %35, %36, %cst_21 {dimension_numbers = #tpu.dot_dimension_numbers<[1], [0], [0], [1], [0, 0, 1, 1], [], []>} : vector<16x32xf32>, vector<32x128xf32>, vector<16x128xf32> -> vector<16x128xf32>
    %c1 = arith.constant 1 : index
    %c0_22 = arith.constant 0 : index
    %c0_23 = arith.constant 0 : index
    %38 = vector.load %arg2[%c1, %c0_22, %c0_23] : memref<8x16x32xf32, #tpu.memory_space<vmem>>, vector<1x16x32xf32>
    %39 = vector.shape_cast %38 : vector<1x16x32xf32> to vector<16x32xf32>
    %c0_24 = arith.constant 0 : index
    %c126 = arith.constant 126 : index
    %40 = vector.load %arg27[%c0_24, %c126] : memref<32x384xf32, #tpu.memory_space<vmem>>, vector<32x128xf32>
    %cst_25 = arith.constant dense<0.000000e+00> : vector<16x128xf32>
    %41 = tpu.matmul %39, %40, %cst_25 {dimension_numbers = #tpu.dot_dimension_numbers<[1], [0], [0], [1], [0, 0, 1, 1], [], []>} : vector<16x32xf32>, vector<32x128xf32>, vector<16x128xf32> -> vector<16x128xf32>
    %42 = arith.addf %37, %41 : vector<16x128xf32>
    %c2 = arith.constant 2 : index
    %c0_26 = arith.constant 0 : index
    %c0_27 = arith.constant 0 : index
    %43 = vector.load %arg2[%c2, %c0_26, %c0_27] : memref<8x16x32xf32, #tpu.memory_space<vmem>>, vector<1x16x32xf32>
    %44 = vector.shape_cast %43 : vector<1x16x32xf32> to vector<16x32xf32>
    %c0_28 = arith.constant 0 : index
    %c127 = arith.constant 127 : index
    %45 = vector.load %arg27[%c0_28, %c127] : memref<32x384xf32, #tpu.memory_space<vmem>>, vector<32x128xf32>
    %cst_29 = arith.constant dense<0.000000e+00> : vector<16x128xf32>
    %46 = tpu.matmul %44, %45, %cst_29 {dimension_numbers = #tpu.dot_dimension_numbers<[1], [0], [0], [1], [0, 0, 1, 1], [], []>} : vector<16x32xf32>, vector<32x128xf32>, vector<16x128xf32> -> vector<16x128xf32>
    %47 = arith.addf %42, %46 : vector<16x128xf32>
    %c3 = arith.constant 3 : index
    %c0_30 = arith.constant 0 : index
    %c0_31 = arith.constant 0 : index
    %48 = vector.load %arg2[%c3, %c0_30, %c0_31] : memref<8x16x32xf32, #tpu.memory_space<vmem>>, vector<1x16x32xf32>
    %49 = vector.shape_cast %48 : vector<1x16x32xf32> to vector<16x32xf32>
    %c0_32 = arith.constant 0 : index
    %c128_33 = arith.constant 128 : index
    %50 = vector.load %arg27[%c0_32, %c128_33] : memref<32x384xf32, #tpu.memory_space<vmem>>, vector<32x128xf32>
    %cst_34 = arith.constant dense<0.000000e+00> : vector<16x128xf32>
    %51 = tpu.matmul %49, %50, %cst_34 {dimension_numbers = #tpu.dot_dimension_numbers<[1], [0], [0], [1], [0, 0, 1, 1], [], []>} : vector<16x32xf32>, vector<32x128xf32>, vector<16x128xf32> -> vector<16x128xf32>
    %52 = arith.addf %47, %51 : vector<16x128xf32>
    %c4 = arith.constant 4 : index
    %c0_35 = arith.constant 0 : index
    %c0_36 = arith.constant 0 : index
    %53 = vector.load %arg2[%c4, %c0_35, %c0_36] : memref<8x16x32xf32, #tpu.memory_space<vmem>>, vector<1x16x32xf32>
    %54 = vector.shape_cast %53 : vector<1x16x32xf32> to vector<16x32xf32>
    %c0_37 = arith.constant 0 : index
    %c129 = arith.constant 129 : index
    %55 = vector.load %arg27[%c0_37, %c129] : memref<32x384xf32, #tpu.memory_space<vmem>>, vector<32x128xf32>
    %cst_38 = arith.constant dense<0.000000e+00> : vector<16x128xf32>
    %56 = tpu.matmul %54, %55, %cst_38 {dimension_numbers = #tpu.dot_dimension_numbers<[1], [0], [0], [1], [0, 0, 1, 1], [], []>} : vector<16x32xf32>, vector<32x128xf32>, vector<16x128xf32> -> vector<16x128xf32>
    %57 = arith.addf %52, %56 : vector<16x128xf32>
    %c5 = arith.constant 5 : index
    %c0_39 = arith.constant 0 : index
    %c0_40 = arith.constant 0 : index
    %58 = vector.load %arg2[%c5, %c0_39, %c0_40] : memref<8x16x32xf32, #tpu.memory_space<vmem>>, vector<1x16x32xf32>
    %59 = vector.shape_cast %58 : vector<1x16x32xf32> to vector<16x32xf32>
    %c0_41 = arith.constant 0 : index
    %c130 = arith.constant 130 : index
    %60 = vector.load %arg27[%c0_41, %c130] : memref<32x384xf32, #tpu.memory_space<vmem>>, vector<32x128xf32>
    %cst_42 = arith.constant dense<0.000000e+00> : vector<16x128xf32>
    %61 = tpu.matmul %59, %60, %cst_42 {dimension_numbers = #tpu.dot_dimension_numbers<[1], [0], [0], [1], [0, 0, 1, 1], [], []>} : vector<16x32xf32>, vector<32x128xf32>, vector<16x128xf32> -> vector<16x128xf32>
    %62 = arith.addf %57, %61 : vector<16x128xf32>
    %c6 = arith.constant 6 : index
    %c0_43 = arith.constant 0 : index
    %c0_44 = arith.constant 0 : index
    %63 = vector.load %arg2[%c6, %c0_43, %c0_44] : memref<8x16x32xf32, #tpu.memory_space<vmem>>, vector<1x16x32xf32>
    %64 = vector.shape_cast %63 : vector<1x16x32xf32> to vector<16x32xf32>
    %c0_45 = arith.constant 0 : index
    %c131 = arith.constant 131 : index
    %65 = vector.load %arg27[%c0_45, %c131] : memref<32x384xf32, #tpu.memory_space<vmem>>, vector<32x128xf32>
    %cst_46 = arith.constant dense<0.000000e+00> : vector<16x128xf32>
    %66 = tpu.matmul %64, %65, %cst_46 {dimension_numbers = #tpu.dot_dimension_numbers<[1], [0], [0], [1], [0, 0, 1, 1], [], []>} : vector<16x32xf32>, vector<32x128xf32>, vector<16x128xf32> -> vector<16x128xf32>
    %67 = arith.addf %62, %66 : vector<16x128xf32>
    %c7 = arith.constant 7 : index
    %c0_47 = arith.constant 0 : index
    %c0_48 = arith.constant 0 : index
    %68 = vector.load %arg2[%c7, %c0_47, %c0_48] : memref<8x16x32xf32, #tpu.memory_space<vmem>>, vector<1x16x32xf32>
    %69 = vector.shape_cast %68 : vector<1x16x32xf32> to vector<16x32xf32>
    %c0_49 = arith.constant 0 : index
    %c132 = arith.constant 132 : index
    %70 = vector.load %arg27[%c0_49, %c132] : memref<32x384xf32, #tpu.memory_space<vmem>>, vector<32x128xf32>
    %cst_50 = arith.constant dense<0.000000e+00> : vector<16x128xf32>
    %71 = tpu.matmul %69, %70, %cst_50 {dimension_numbers = #tpu.dot_dimension_numbers<[1], [0], [0], [1], [0, 0, 1, 1], [], []>} : vector<16x32xf32>, vector<32x128xf32>, vector<16x128xf32> -> vector<16x128xf32>
    %72 = arith.addf %67, %71 : vector<16x128xf32>
    %c0_51 = arith.constant 0 : index
    %c0_52 = arith.constant 0 : index
    %73 = vector.load %arg3[%c0_51, %c0_52] : memref<16x1xf32, #tpu.memory_space<vmem>>, vector<16x1xf32>
    %74 = vector.broadcast %73 : vector<16x1xf32> to vector<16x128xf32>
    %75 = arith.addf %72, %74 : vector<16x128xf32>
    %cst_53 = arith.constant 0.000000e+00 : f32
    %76 = vector.broadcast %cst_53 : f32 to vector<16x128xf32>
    %77 = arith.maximumf %75, %76 : vector<16x128xf32>
    %78 = vector.broadcast %33 : vector<1x128xf32> to vector<16x128xf32>
    %79 = arith.mulf %77, %78 : vector<16x128xf32>
    %c0_54 = arith.constant 0 : index
    %c128_55 = arith.constant 128 : index
    %80 = vector.load %arg28[%c0_54, %c128_55] : memref<32x384xf32, #tpu.memory_space<vmem>>, vector<16x128xf32>
    tpu.vector_store %arg28[%c0_54, %c128_55], %79 {strides = array<i32>} : memref<32x384xf32, #tpu.memory_space<vmem>>, vector<16x128xf32>,
    %c0_56 = arith.constant 0 : index
    %c0_57 = arith.constant 0 : index
    %c0_58 = arith.constant 0 : index
    %81 = vector.load %arg4[%c0_56, %c0_57, %c0_58] : memref<5x16x16xf32, #tpu.memory_space<vmem>>, vector<1x16x16xf32>
    %82 = vector.shape_cast %81 : vector<1x16x16xf32> to vector<16x16xf32>
    %c0_59 = arith.constant 0 : index
    %c126_60 = arith.constant 126 : index
    %83 = vector.load %arg28[%c0_59, %c126_60] : memref<32x384xf32, #tpu.memory_space<vmem>>, vector<16x128xf32>
    %cst_61 = arith.constant dense<0.000000e+00> : vector<16x128xf32>
    %84 = tpu.matmul %82, %83, %cst_61 {dimension_numbers = #tpu.dot_dimension_numbers<[1], [0], [0], [1], [0, 0, 1, 1], [], []>} : vector<16x16xf32>, vector<16x128xf32>, vector<16x128xf32> -> vector<16x128xf32>
    %c1_62 = arith.constant 1 : index
    %c0_63 = arith.constant 0 : index
    %c0_64 = arith.constant 0 : index
    %85 = vector.load %arg4[%c1_62, %c0_63, %c0_64] : memref<5x16x16xf32, #tpu.memory_space<vmem>>, vector<1x16x16xf32>
    %86 = vector.shape_cast %85 : vector<1x16x16xf32> to vector<16x16xf32>
    %c0_65 = arith.constant 0 : index
    %c127_66 = arith.constant 127 : index
    %87 = vector.load %arg28[%c0_65, %c127_66] : memref<32x384xf32, #tpu.memory_space<vmem>>, vector<16x128xf32>
    %cst_67 = arith.constant dense<0.000000e+00> : vector<16x128xf32>
    %88 = tpu.matmul %86, %87, %cst_67 {dimension_numbers = #tpu.dot_dimension_numbers<[1], [0], [0], [1], [0, 0, 1, 1], [], []>} : vector<16x16xf32>, vector<16x128xf32>, vector<16x128xf32> -> vector<16x128xf32>
    %89 = arith.addf %84, %88 : vector<16x128xf32>
    %c2_68 = arith.constant 2 : index
    %c0_69 = arith.constant 0 : index
    %c0_70 = arith.constant 0 : index
    %90 = vector.load %arg4[%c2_68, %c0_69, %c0_70] : memref<5x16x16xf32, #tpu.memory_space<vmem>>, vector<1x16x16xf32>
    %91 = vector.shape_cast %90 : vector<1x16x16xf32> to vector<16x16xf32>
    %c0_71 = arith.constant 0 : index
    %c128_72 = arith.constant 128 : index
    %92 = vector.load %arg28[%c0_71, %c128_72] : memref<32x384xf32, #tpu.memory_space<vmem>>, vector<16x128xf32>
    %cst_73 = arith.constant dense<0.000000e+00> : vector<16x128xf32>
    %93 = tpu.matmul %91, %92, %cst_73 {dimension_numbers = #tpu.dot_dimension_numbers<[1], [0], [0], [1], [0, 0, 1, 1], [], []>} : vector<16x16xf32>, vector<16x128xf32>, vector<16x128xf32> -> vector<16x128xf32>
    %94 = arith.addf %89, %93 : vector<16x128xf32>
    %c3_74 = arith.constant 3 : index
    %c0_75 = arith.constant 0 : index
    %c0_76 = arith.constant 0 : index
    %95 = vector.load %arg4[%c3_74, %c0_75, %c0_76] : memref<5x16x16xf32, #tpu.memory_space<vmem>>, vector<1x16x16xf32>
    %96 = vector.shape_cast %95 : vector<1x16x16xf32> to vector<16x16xf32>
    %c0_77 = arith.constant 0 : index
    %c129_78 = arith.constant 129 : index
    %97 = vector.load %arg28[%c0_77, %c129_78] : memref<32x384xf32, #tpu.memory_space<vmem>>, vector<16x128xf32>
    %cst_79 = arith.constant dense<0.000000e+00> : vector<16x128xf32>
    %98 = tpu.matmul %96, %97, %cst_79 {dimension_numbers = #tpu.dot_dimension_numbers<[1], [0], [0], [1], [0, 0, 1, 1], [], []>} : vector<16x16xf32>, vector<16x128xf32>, vector<16x128xf32> -> vector<16x128xf32>
    %99 = arith.addf %94, %98 : vector<16x128xf32>
    %c4_80 = arith.constant 4 : index
    %c0_81 = arith.constant 0 : index
    %c0_82 = arith.constant 0 : index
    %100 = vector.load %arg4[%c4_80, %c0_81, %c0_82] : memref<5x16x16xf32, #tpu.memory_space<vmem>>, vector<1x16x16xf32>
    %101 = vector.shape_cast %100 : vector<1x16x16xf32> to vector<16x16xf32>
    %c0_83 = arith.constant 0 : index
    %c130_84 = arith.constant 130 : index
    %102 = vector.load %arg28[%c0_83, %c130_84] : memref<32x384xf32, #tpu.memory_space<vmem>>, vector<16x128xf32>
    %cst_85 = arith.constant dense<0.000000e+00> : vector<16x128xf32>
    %103 = tpu.matmul %101, %102, %cst_85 {dimension_numbers = #tpu.dot_dimension_numbers<[1], [0], [0], [1], [0, 0, 1, 1], [], []>} : vector<16x16xf32>, vector<16x128xf32>, vector<16x128xf32> -> vector<16x128xf32>
    %104 = arith.addf %99, %103 : vector<16x128xf32>
    %c0_86 = arith.constant 0 : index
    %c0_87 = arith.constant 0 : index
    %105 = vector.load %arg5[%c0_86, %c0_87] : memref<16x1xf32, #tpu.memory_space<vmem>>, vector<16x1xf32>
    %106 = vector.broadcast %105 : vector<16x1xf32> to vector<16x128xf32>
    %107 = arith.addf %104, %106 : vector<16x128xf32>
    %cst_88 = arith.constant 0.000000e+00 : f32
    %108 = vector.broadcast %cst_88 : f32 to vector<16x128xf32>
    %109 = arith.maximumf %107, %108 : vector<16x128xf32>
    %110 = vector.broadcast %33 : vector<1x128xf32> to vector<16x128xf32>
    %111 = arith.mulf %109, %110 : vector<16x128xf32>
    %c0_89 = arith.constant 0 : index
    %c128_90 = arith.constant 128 : index
    %112 = vector.load %arg29[%c0_89, %c128_90] : memref<32x384xf32, #tpu.memory_space<vmem>>, vector<16x128xf32>
    tpu.vector_store %arg29[%c0_89, %c128_90], %111 {strides = array<i32>} : memref<32x384xf32, #tpu.memory_space<vmem>>, vector<16x128xf32>,
    %c0_91 = arith.constant 0 : index
    %c0_92 = arith.constant 0 : index
    %c0_93 = arith.constant 0 : index
    %113 = vector.load %arg6[%c0_91, %c0_92, %c0_93] : memref<3x16x16xf32, #tpu.memory_space<vmem>>, vector<1x16x16xf32>
    %114 = vector.shape_cast %113 : vector<1x16x16xf32> to vector<16x16xf32>
    %c0_94 = arith.constant 0 : index
    %c127_95 = arith.constant 127 : index
    %115 = vector.load %arg29[%c0_94, %c127_95] : memref<32x384xf32, #tpu.memory_space<vmem>>, vector<16x128xf32>
    %cst_96 = arith.constant dense<0.000000e+00> : vector<16x128xf32>
    %116 = tpu.matmul %114, %115, %cst_96 {dimension_numbers = #tpu.dot_dimension_numbers<[1], [0], [0], [1], [0, 0, 1, 1], [], []>} : vector<16x16xf32>, vector<16x128xf32>, vector<16x128xf32> -> vector<16x128xf32>
    %c1_97 = arith.constant 1 : index
    %c0_98 = arith.constant 0 : index
    %c0_99 = arith.constant 0 : index
    %117 = vector.load %arg6[%c1_97, %c0_98, %c0_99] : memref<3x16x16xf32, #tpu.memory_space<vmem>>, vector<1x16x16xf32>
    %118 = vector.shape_cast %117 : vector<1x16x16xf32> to vector<16x16xf32>
    %c0_100 = arith.constant 0 : index
    %c128_101 = arith.constant 128 : index
    %119 = vector.load %arg29[%c0_100, %c128_101] : memref<32x384xf32, #tpu.memory_space<vmem>>, vector<16x128xf32>
    %cst_102 = arith.constant dense<0.000000e+00> : vector<16x128xf32>
    %120 = tpu.matmul %118, %119, %cst_102 {dimension_numbers = #tpu.dot_dimension_numbers<[1], [0], [0], [1], [0, 0, 1, 1], [], []>} : vector<16x16xf32>, vector<16x128xf32>, vector<16x128xf32> -> vector<16x128xf32>
    %121 = arith.addf %116, %120 : vector<16x128xf32>
    %c2_103 = arith.constant 2 : index
    %c0_104 = arith.constant 0 : index
    %c0_105 = arith.constant 0 : index
    %122 = vector.load %arg6[%c2_103, %c0_104, %c0_105] : memref<3x16x16xf32, #tpu.memory_space<vmem>>, vector<1x16x16xf32>
    %123 = vector.shape_cast %122 : vector<1x16x16xf32> to vector<16x16xf32>
    %c0_106 = arith.constant 0 : index
    %c129_107 = arith.constant 129 : index
    %124 = vector.load %arg29[%c0_106, %c129_107] : memref<32x384xf32, #tpu.memory_space<vmem>>, vector<16x128xf32>
    %cst_108 = arith.constant dense<0.000000e+00> : vector<16x128xf32>
    %125 = tpu.matmul %123, %124, %cst_108 {dimension_numbers = #tpu.dot_dimension_numbers<[1], [0], [0], [1], [0, 0, 1, 1], [], []>} : vector<16x16xf32>, vector<16x128xf32>, vector<16x128xf32> -> vector<16x128xf32>
    %126 = arith.addf %121, %125 : vector<16x128xf32>
    %c0_109 = arith.constant 0 : index
    %c0_110 = arith.constant 0 : index
    %127 = vector.load %arg7[%c0_109, %c0_110] : memref<16x1xf32, #tpu.memory_space<vmem>>, vector<16x1xf32>
    %128 = vector.broadcast %127 : vector<16x1xf32> to vector<16x128xf32>
    %129 = arith.addf %126, %128 : vector<16x128xf32>
    %cst_111 = arith.constant 0.000000e+00 : f32
    %130 = vector.broadcast %cst_111 : f32 to vector<16x128xf32>
    %131 = arith.maximumf %129, %130 : vector<16x128xf32>
    %c0_112 = arith.constant 0 : index
    %c0_113 = arith.constant 0 : index
    %132 = vector.load %arg8[%c0_112, %c0_113] : memref<16x32xf32, #tpu.memory_space<vmem>>, vector<16x32xf32>
    %c0_114 = arith.constant 0 : index
    %c128_115 = arith.constant 128 : index
    %133 = vector.load %arg27[%c0_114, %c128_115] : memref<32x384xf32, #tpu.memory_space<vmem>>, vector<32x128xf32>
    %cst_116 = arith.constant dense<0.000000e+00> : vector<16x128xf32>
    %134 = tpu.matmul %132, %133, %cst_116 {dimension_numbers = #tpu.dot_dimension_numbers<[1], [0], [0], [1], [0, 0, 1, 1], [], []>} : vector<16x32xf32>, vector<32x128xf32>, vector<16x128xf32> -> vector<16x128xf32>
    %c0_117 = arith.constant 0 : index
    %c0_118 = arith.constant 0 : index
    %135 = vector.load %arg9[%c0_117, %c0_118] : memref<16x1xf32, #tpu.memory_space<vmem>>, vector<16x1xf32>
    %136 = vector.broadcast %135 : vector<16x1xf32> to vector<16x128xf32>
    %137 = arith.addf %134, %136 : vector<16x128xf32>
    %138 = arith.addf %131, %137 : vector<16x128xf32>
    %139 = vector.broadcast %33 : vector<1x128xf32> to vector<16x128xf32>
    %140 = arith.mulf %138, %139 : vector<16x128xf32>
    %c0_119 = arith.constant 0 : index
    %c128_120 = arith.constant 128 : index
    %141 = vector.load %arg28[%c0_119, %c128_120] : memref<32x384xf32, #tpu.memory_space<vmem>>, vector<16x128xf32>
    tpu.vector_store %arg28[%c0_119, %c128_120], %140 {strides = array<i32>} : memref<32x384xf32, #tpu.memory_space<vmem>>, vector<16x128xf32>,
    %c0_121 = arith.constant 0 : index
    %c0_122 = arith.constant 0 : index
    %c0_123 = arith.constant 0 : index
    %142 = vector.load %arg10[%c0_121, %c0_122, %c0_123] : memref<8x32x16xf32, #tpu.memory_space<vmem>>, vector<1x32x16xf32>
    %143 = vector.shape_cast %142 : vector<1x32x16xf32> to vector<32x16xf32>
    %c0_124 = arith.constant 0 : index
    %c125_125 = arith.constant 125 : index
    %144 = vector.load %arg28[%c0_124, %c125_125] : memref<32x384xf32, #tpu.memory_space<vmem>>, vector<16x128xf32>
    %cst_126 = arith.constant dense<0.000000e+00> : vector<32x128xf32>
    %145 = tpu.matmul %143, %144, %cst_126 {dimension_numbers = #tpu.dot_dimension_numbers<[1], [0], [0], [1], [0, 0, 1, 1], [], []>} : vector<32x16xf32>, vector<16x128xf32>, vector<32x128xf32> -> vector<32x128xf32>
    %c1_127 = arith.constant 1 : index
    %c0_128 = arith.constant 0 : index
    %c0_129 = arith.constant 0 : index
    %146 = vector.load %arg10[%c1_127, %c0_128, %c0_129] : memref<8x32x16xf32, #tpu.memory_space<vmem>>, vector<1x32x16xf32>
    %147 = vector.shape_cast %146 : vector<1x32x16xf32> to vector<32x16xf32>
    %c0_130 = arith.constant 0 : index
    %c126_131 = arith.constant 126 : index
    %148 = vector.load %arg28[%c0_130, %c126_131] : memref<32x384xf32, #tpu.memory_space<vmem>>, vector<16x128xf32>
    %cst_132 = arith.constant dense<0.000000e+00> : vector<32x128xf32>
    %149 = tpu.matmul %147, %148, %cst_132 {dimension_numbers = #tpu.dot_dimension_numbers<[1], [0], [0], [1], [0, 0, 1, 1], [], []>} : vector<32x16xf32>, vector<16x128xf32>, vector<32x128xf32> -> vector<32x128xf32>
    %150 = arith.addf %145, %149 : vector<32x128xf32>
    %c2_133 = arith.constant 2 : index
    %c0_134 = arith.constant 0 : index
    %c0_135 = arith.constant 0 : index
    %151 = vector.load %arg10[%c2_133, %c0_134, %c0_135] : memref<8x32x16xf32, #tpu.memory_space<vmem>>, vector<1x32x16xf32>
    %152 = vector.shape_cast %151 : vector<1x32x16xf32> to vector<32x16xf32>
    %c0_136 = arith.constant 0 : index
    %c127_137 = arith.constant 127 : index
    %153 = vector.load %arg28[%c0_136, %c127_137] : memref<32x384xf32, #tpu.memory_space<vmem>>, vector<16x128xf32>
    %cst_138 = arith.constant dense<0.000000e+00> : vector<32x128xf32>
    %154 = tpu.matmul %152, %153, %cst_138 {dimension_numbers = #tpu.dot_dimension_numbers<[1], [0], [0], [1], [0, 0, 1, 1], [], []>} : vector<32x16xf32>, vector<16x128xf32>, vector<32x128xf32> -> vector<32x128xf32>
    %155 = arith.addf %150, %154 : vector<32x128xf32>
    %c3_139 = arith.constant 3 : index
    %c0_140 = arith.constant 0 : index
    %c0_141 = arith.constant 0 : index
    %156 = vector.load %arg10[%c3_139, %c0_140, %c0_141] : memref<8x32x16xf32, #tpu.memory_space<vmem>>, vector<1x32x16xf32>
    %157 = vector.shape_cast %156 : vector<1x32x16xf32> to vector<32x16xf32>
    %c0_142 = arith.constant 0 : index
    %c128_143 = arith.constant 128 : index
    %158 = vector.load %arg28[%c0_142, %c128_143] : memref<32x384xf32, #tpu.memory_space<vmem>>, vector<16x128xf32>
    %cst_144 = arith.constant dense<0.000000e+00> : vector<32x128xf32>
    %159 = tpu.matmul %157, %158, %cst_144 {dimension_numbers = #tpu.dot_dimension_numbers<[1], [0], [0], [1], [0, 0, 1, 1], [], []>} : vector<32x16xf32>, vector<16x128xf32>, vector<32x128xf32> -> vector<32x128xf32>
    %160 = arith.addf %155, %159 : vector<32x128xf32>
    %c4_145 = arith.constant 4 : index
    %c0_146 = arith.constant 0 : index
    %c0_147 = arith.constant 0 : index
    %161 = vector.load %arg10[%c4_145, %c0_146, %c0_147] : memref<8x32x16xf32, #tpu.memory_space<vmem>>, vector<1x32x16xf32>
    %162 = vector.shape_cast %161 : vector<1x32x16xf32> to vector<32x16xf32>
    %c0_148 = arith.constant 0 : index
    %c129_149 = arith.constant 129 : index
    %163 = vector.load %arg28[%c0_148, %c129_149] : memref<32x384xf32, #tpu.memory_space<vmem>>, vector<16x128xf32>
    %cst_150 = arith.constant dense<0.000000e+00> : vector<32x128xf32>
    %164 = tpu.matmul %162, %163, %cst_150 {dimension_numbers = #tpu.dot_dimension_numbers<[1], [0], [0], [1], [0, 0, 1, 1], [], []>} : vector<32x16xf32>, vector<16x128xf32>, vector<32x128xf32> -> vector<32x128xf32>
    %165 = arith.addf %160, %164 : vector<32x128xf32>
    %c5_151 = arith.constant 5 : index
    %c0_152 = arith.constant 0 : index
    %c0_153 = arith.constant 0 : index
    %166 = vector.load %arg10[%c5_151, %c0_152, %c0_153] : memref<8x32x16xf32, #tpu.memory_space<vmem>>, vector<1x32x16xf32>
    %167 = vector.shape_cast %166 : vector<1x32x16xf32> to vector<32x16xf32>
    %c0_154 = arith.constant 0 : index
    %c130_155 = arith.constant 130 : index
    %168 = vector.load %arg28[%c0_154, %c130_155] : memref<32x384xf32, #tpu.memory_space<vmem>>, vector<16x128xf32>
    %cst_156 = arith.constant dense<0.000000e+00> : vector<32x128xf32>
    %169 = tpu.matmul %167, %168, %cst_156 {dimension_numbers = #tpu.dot_dimension_numbers<[1], [0], [0], [1], [0, 0, 1, 1], [], []>} : vector<32x16xf32>, vector<16x128xf32>, vector<32x128xf32> -> vector<32x128xf32>
    %170 = arith.addf %165, %169 : vector<32x128xf32>
    %c6_157 = arith.constant 6 : index
    %c0_158 = arith.constant 0 : index
    %c0_159 = arith.constant 0 : index
    %171 = vector.load %arg10[%c6_157, %c0_158, %c0_159] : memref<8x32x16xf32, #tpu.memory_space<vmem>>, vector<1x32x16xf32>
    %172 = vector.shape_cast %171 : vector<1x32x16xf32> to vector<32x16xf32>
    %c0_160 = arith.constant 0 : index
    %c131_161 = arith.constant 131 : index
    %173 = vector.load %arg28[%c0_160, %c131_161] : memref<32x384xf32, #tpu.memory_space<vmem>>, vector<16x128xf32>
    %cst_162 = arith.constant dense<0.000000e+00> : vector<32x128xf32>
    %174 = tpu.matmul %172, %173, %cst_162 {dimension_numbers = #tpu.dot_dimension_numbers<[1], [0], [0], [1], [0, 0, 1, 1], [], []>} : vector<32x16xf32>, vector<16x128xf32>, vector<32x128xf32> -> vector<32x128xf32>
    %175 = arith.addf %170, %174 : vector<32x128xf32>
    %c7_163 = arith.constant 7 : index
    %c0_164 = arith.constant 0 : index
    %c0_165 = arith.constant 0 : index
    %176 = vector.load %arg10[%c7_163, %c0_164, %c0_165] : memref<8x32x16xf32, #tpu.memory_space<vmem>>, vector<1x32x16xf32>
    %177 = vector.shape_cast %176 : vector<1x32x16xf32> to vector<32x16xf32>
    %c0_166 = arith.constant 0 : index
    %c132_167 = arith.constant 132 : index
    %178 = vector.load %arg28[%c0_166, %c132_167] : memref<32x384xf32, #tpu.memory_space<vmem>>, vector<16x128xf32>
    %cst_168 = arith.constant dense<0.000000e+00> : vector<32x128xf32>
    %179 = tpu.matmul %177, %178, %cst_168 {dimension_numbers = #tpu.dot_dimension_numbers<[1], [0], [0], [1], [0, 0, 1, 1], [], []>} : vector<32x16xf32>, vector<16x128xf32>, vector<32x128xf32> -> vector<32x128xf32>
    %180 = arith.addf %175, %179 : vector<32x128xf32>
    %c0_169 = arith.constant 0 : index
    %c0_170 = arith.constant 0 : index
    %181 = vector.load %arg11[%c0_169, %c0_170] : memref<32x1xf32, #tpu.memory_space<vmem>>, vector<32x1xf32>
    %182 = vector.broadcast %181 : vector<32x1xf32> to vector<32x128xf32>
    %183 = arith.addf %180, %182 : vector<32x128xf32>
    %cst_171 = arith.constant 0.000000e+00 : f32
    %184 = vector.broadcast %cst_171 : f32 to vector<32x128xf32>
    %185 = arith.maximumf %183, %184 : vector<32x128xf32>
    %186 = vector.broadcast %33 : vector<1x128xf32> to vector<32x128xf32>
    %187 = arith.mulf %185, %186 : vector<32x128xf32>
    %c0_172 = arith.constant 0 : index
    %c128_173 = arith.constant 128 : index
    %188 = vector.load %arg29[%c0_172, %c128_173] : memref<32x384xf32, #tpu.memory_space<vmem>>, vector<32x128xf32>
    tpu.vector_store %arg29[%c0_172, %c128_173], %187 {strides = array<i32>} : memref<32x384xf32, #tpu.memory_space<vmem>>, vector<32x128xf32>,
    %c0_174 = arith.constant 0 : index
    %c0_175 = arith.constant 0 : index
    %c0_176 = arith.constant 0 : index
    %189 = vector.load %arg12[%c0_174, %c0_175, %c0_176] : memref<5x32x32xf32, #tpu.memory_space<vmem>>, vector<1x32x32xf32>
    %190 = vector.shape_cast %189 : vector<1x32x32xf32> to vector<32x32xf32>
    %c0_177 = arith.constant 0 : index
    %c126_178 = arith.constant 126 : index
    %191 = vector.load %arg29[%c0_177, %c126_178] : memref<32x384xf32, #tpu.memory_space<vmem>>, vector<32x128xf32>
    %cst_179 = arith.constant dense<0.000000e+00> : vector<32x128xf32>
    %192 = tpu.matmul %190, %191, %cst_179 {dimension_numbers = #tpu.dot_dimension_numbers<[1], [0], [0], [1], [0, 0, 1, 1], [], []>} : vector<32x32xf32>, vector<32x128xf32>, vector<32x128xf32> -> vector<32x128xf32>
    %c1_180 = arith.constant 1 : index
    %c0_181 = arith.constant 0 : index
    %c0_182 = arith.constant 0 : index
    %193 = vector.load %arg12[%c1_180, %c0_181, %c0_182] : memref<5x32x32xf32, #tpu.memory_space<vmem>>, vector<1x32x32xf32>
    %194 = vector.shape_cast %193 : vector<1x32x32xf32> to vector<32x32xf32>
    %c0_183 = arith.constant 0 : index
    %c127_184 = arith.constant 127 : index
    %195 = vector.load %arg29[%c0_183, %c127_184] : memref<32x384xf32, #tpu.memory_space<vmem>>, vector<32x128xf32>
    %cst_185 = arith.constant dense<0.000000e+00> : vector<32x128xf32>
    %196 = tpu.matmul %194, %195, %cst_185 {dimension_numbers = #tpu.dot_dimension_numbers<[1], [0], [0], [1], [0, 0, 1, 1], [], []>} : vector<32x32xf32>, vector<32x128xf32>, vector<32x128xf32> -> vector<32x128xf32>
    %197 = arith.addf %192, %196 : vector<32x128xf32>
    %c2_186 = arith.constant 2 : index
    %c0_187 = arith.constant 0 : index
    %c0_188 = arith.constant 0 : index
    %198 = vector.load %arg12[%c2_186, %c0_187, %c0_188] : memref<5x32x32xf32, #tpu.memory_space<vmem>>, vector<1x32x32xf32>
    %199 = vector.shape_cast %198 : vector<1x32x32xf32> to vector<32x32xf32>
    %c0_189 = arith.constant 0 : index
    %c128_190 = arith.constant 128 : index
    %200 = vector.load %arg29[%c0_189, %c128_190] : memref<32x384xf32, #tpu.memory_space<vmem>>, vector<32x128xf32>
    %cst_191 = arith.constant dense<0.000000e+00> : vector<32x128xf32>
    %201 = tpu.matmul %199, %200, %cst_191 {dimension_numbers = #tpu.dot_dimension_numbers<[1], [0], [0], [1], [0, 0, 1, 1], [], []>} : vector<32x32xf32>, vector<32x128xf32>, vector<32x128xf32> -> vector<32x128xf32>
    %202 = arith.addf %197, %201 : vector<32x128xf32>
    %c3_192 = arith.constant 3 : index
    %c0_193 = arith.constant 0 : index
    %c0_194 = arith.constant 0 : index
    %203 = vector.load %arg12[%c3_192, %c0_193, %c0_194] : memref<5x32x32xf32, #tpu.memory_space<vmem>>, vector<1x32x32xf32>
    %204 = vector.shape_cast %203 : vector<1x32x32xf32> to vector<32x32xf32>
    %c0_195 = arith.constant 0 : index
    %c129_196 = arith.constant 129 : index
    %205 = vector.load %arg29[%c0_195, %c129_196] : memref<32x384xf32, #tpu.memory_space<vmem>>, vector<32x128xf32>
    %cst_197 = arith.constant dense<0.000000e+00> : vector<32x128xf32>
    %206 = tpu.matmul %204, %205, %cst_197 {dimension_numbers = #tpu.dot_dimension_numbers<[1], [0], [0], [1], [0, 0, 1, 1], [], []>} : vector<32x32xf32>, vector<32x128xf32>, vector<32x128xf32> -> vector<32x128xf32>
    %207 = arith.addf %202, %206 : vector<32x128xf32>
    %c4_198 = arith.constant 4 : index
    %c0_199 = arith.constant 0 : index
    %c0_200 = arith.constant 0 : index
    %208 = vector.load %arg12[%c4_198, %c0_199, %c0_200] : memref<5x32x32xf32, #tpu.memory_space<vmem>>, vector<1x32x32xf32>
    %209 = vector.shape_cast %208 : vector<1x32x32xf32> to vector<32x32xf32>
    %c0_201 = arith.constant 0 : index
    %c130_202 = arith.constant 130 : index
    %210 = vector.load %arg29[%c0_201, %c130_202] : memref<32x384xf32, #tpu.memory_space<vmem>>, vector<32x128xf32>
    %cst_203 = arith.constant dense<0.000000e+00> : vector<32x128xf32>
    %211 = tpu.matmul %209, %210, %cst_203 {dimension_numbers = #tpu.dot_dimension_numbers<[1], [0], [0], [1], [0, 0, 1, 1], [], []>} : vector<32x32xf32>, vector<32x128xf32>, vector<32x128xf32> -> vector<32x128xf32>
    %212 = arith.addf %207, %211 : vector<32x128xf32>
    %c0_204 = arith.constant 0 : index
    %c0_205 = arith.constant 0 : index
    %213 = vector.load %arg13[%c0_204, %c0_205] : memref<32x1xf32, #tpu.memory_space<vmem>>, vector<32x1xf32>
    %214 = vector.broadcast %213 : vector<32x1xf32> to vector<32x128xf32>
    %215 = arith.addf %212, %214 : vector<32x128xf32>
    %cst_206 = arith.constant 0.000000e+00 : f32
    %216 = vector.broadcast %cst_206 : f32 to vector<32x128xf32>
    %217 = arith.maximumf %215, %216 : vector<32x128xf32>
    %218 = vector.broadcast %33 : vector<1x128xf32> to vector<32x128xf32>
    %219 = arith.mulf %217, %218 : vector<32x128xf32>
    %c0_207 = arith.constant 0 : index
    %c128_208 = arith.constant 128 : index
    %220 = vector.load %arg27[%c0_207, %c128_208] : memref<32x384xf32, #tpu.memory_space<vmem>>, vector<32x128xf32>
    tpu.vector_store %arg27[%c0_207, %c128_208], %219 {strides = array<i32>} : memref<32x384xf32, #tpu.memory_space<vmem>>, vector<32x128xf32>,
    %c0_209 = arith.constant 0 : index
    %c0_210 = arith.constant 0 : index
    %c0_211 = arith.constant 0 : index
    %221 = vector.load %arg14[%c0_209, %c0_210, %c0_211] : memref<3x32x32xf32, #tpu.memory_space<vmem>>, vector<1x32x32xf32>
    %222 = vector.shape_cast %221 : vector<1x32x32xf32> to vector<32x32xf32>
    %c0_212 = arith.constant 0 : index
    %c127_213 = arith.constant 127 : index
    %223 = vector.load %arg27[%c0_212, %c127_213] : memref<32x384xf32, #tpu.memory_space<vmem>>, vector<32x128xf32>
    %cst_214 = arith.constant dense<0.000000e+00> : vector<32x128xf32>
    %224 = tpu.matmul %222, %223, %cst_214 {dimension_numbers = #tpu.dot_dimension_numbers<[1], [0], [0], [1], [0, 0, 1, 1], [], []>} : vector<32x32xf32>, vector<32x128xf32>, vector<32x128xf32> -> vector<32x128xf32>
    %c1_215 = arith.constant 1 : index
    %c0_216 = arith.constant 0 : index
    %c0_217 = arith.constant 0 : index
    %225 = vector.load %arg14[%c1_215, %c0_216, %c0_217] : memref<3x32x32xf32, #tpu.memory_space<vmem>>, vector<1x32x32xf32>
    %226 = vector.shape_cast %225 : vector<1x32x32xf32> to vector<32x32xf32>
    %c0_218 = arith.constant 0 : index
    %c128_219 = arith.constant 128 : index
    %227 = vector.load %arg27[%c0_218, %c128_219] : memref<32x384xf32, #tpu.memory_space<vmem>>, vector<32x128xf32>
    %cst_220 = arith.constant dense<0.000000e+00> : vector<32x128xf32>
    %228 = tpu.matmul %226, %227, %cst_220 {dimension_numbers = #tpu.dot_dimension_numbers<[1], [0], [0], [1], [0, 0, 1, 1], [], []>} : vector<32x32xf32>, vector<32x128xf32>, vector<32x128xf32> -> vector<32x128xf32>
    %229 = arith.addf %224, %228 : vector<32x128xf32>
    %c2_221 = arith.constant 2 : index
    %c0_222 = arith.constant 0 : index
    %c0_223 = arith.constant 0 : index
    %230 = vector.load %arg14[%c2_221, %c0_222, %c0_223] : memref<3x32x32xf32, #tpu.memory_space<vmem>>, vector<1x32x32xf32>
    %231 = vector.shape_cast %230 : vector<1x32x32xf32> to vector<32x32xf32>
    %c0_224 = arith.constant 0 : index
    %c129_225 = arith.constant 129 : index
    %232 = vector.load %arg27[%c0_224, %c129_225] : memref<32x384xf32, #tpu.memory_space<vmem>>, vector<32x128xf32>
    %cst_226 = arith.constant dense<0.000000e+00> : vector<32x128xf32>
    %233 = tpu.matmul %231, %232, %cst_226 {dimension_numbers = #tpu.dot_dimension_numbers<[1], [0], [0], [1], [0, 0, 1, 1], [], []>} : vector<32x32xf32>, vector<32x128xf32>, vector<32x128xf32> -> vector<32x128xf32>
    %234 = arith.addf %229, %233 : vector<32x128xf32>
    %c0_227 = arith.constant 0 : index
    %c0_228 = arith.constant 0 : index
    %235 = vector.load %arg15[%c0_227, %c0_228] : memref<32x1xf32, #tpu.memory_space<vmem>>, vector<32x1xf32>
    %236 = vector.broadcast %235 : vector<32x1xf32> to vector<32x128xf32>
    %237 = arith.addf %234, %236 : vector<32x128xf32>
    %cst_229 = arith.constant 0.000000e+00 : f32
    %238 = vector.broadcast %cst_229 : f32 to vector<32x128xf32>
    %239 = arith.maximumf %237, %238 : vector<32x128xf32>
    %c0_230 = arith.constant 0 : index
    %c0_231 = arith.constant 0 : index
    %240 = vector.load %arg16[%c0_230, %c0_231] : memref<32x16xf32, #tpu.memory_space<vmem>>, vector<32x16xf32>
    %c0_232 = arith.constant 0 : index
    %c128_233 = arith.constant 128 : index
    %241 = vector.load %arg28[%c0_232, %c128_233] : memref<32x384xf32, #tpu.memory_space<vmem>>, vector<16x128xf32>
    %cst_234 = arith.constant dense<0.000000e+00> : vector<32x128xf32>
    %242 = tpu.matmul %240, %241, %cst_234 {dimension_numbers = #tpu.dot_dimension_numbers<[1], [0], [0], [1], [0, 0, 1, 1], [], []>} : vector<32x16xf32>, vector<16x128xf32>, vector<32x128xf32> -> vector<32x128xf32>
    %c0_235 = arith.constant 0 : index
    %c0_236 = arith.constant 0 : index
    %243 = vector.load %arg17[%c0_235, %c0_236] : memref<32x1xf32, #tpu.memory_space<vmem>>, vector<32x1xf32>
    %244 = vector.broadcast %243 : vector<32x1xf32> to vector<32x128xf32>
    %245 = arith.addf %242, %244 : vector<32x128xf32>
    %246 = arith.addf %239, %245 : vector<32x128xf32>
    %247 = vector.broadcast %33 : vector<1x128xf32> to vector<32x128xf32>
    %248 = arith.mulf %246, %247 : vector<32x128xf32>
    %c0_237 = arith.constant 0 : index
    %c128_238 = arith.constant 128 : index
    %249 = vector.load %arg29[%c0_237, %c128_238] : memref<32x384xf32, #tpu.memory_space<vmem>>, vector<32x128xf32>
    tpu.vector_store %arg29[%c0_237, %c128_238], %248 {strides = array<i32>} : memref<32x384xf32, #tpu.memory_space<vmem>>, vector<32x128xf32>,
    %c0_239 = arith.constant 0 : index
    %c0_240 = arith.constant 0 : index
    %c0_241 = arith.constant 0 : index
    %250 = vector.load %arg18[%c0_239, %c0_240, %c0_241] : memref<8x32x32xf32, #tpu.memory_space<vmem>>, vector<1x32x32xf32>
    %251 = vector.shape_cast %250 : vector<1x32x32xf32> to vector<32x32xf32>
    %c0_242 = arith.constant 0 : index
    %c125_243 = arith.constant 125 : index
    %252 = vector.load %arg29[%c0_242, %c125_243] : memref<32x384xf32, #tpu.memory_space<vmem>>, vector<32x128xf32>
    %cst_244 = arith.constant dense<0.000000e+00> : vector<32x128xf32>
    %253 = tpu.matmul %251, %252, %cst_244 {dimension_numbers = #tpu.dot_dimension_numbers<[1], [0], [0], [1], [0, 0, 1, 1], [], []>} : vector<32x32xf32>, vector<32x128xf32>, vector<32x128xf32> -> vector<32x128xf32>
    %c1_245 = arith.constant 1 : index
    %c0_246 = arith.constant 0 : index
    %c0_247 = arith.constant 0 : index
    %254 = vector.load %arg18[%c1_245, %c0_246, %c0_247] : memref<8x32x32xf32, #tpu.memory_space<vmem>>, vector<1x32x32xf32>
    %255 = vector.shape_cast %254 : vector<1x32x32xf32> to vector<32x32xf32>
    %c0_248 = arith.constant 0 : index
    %c126_249 = arith.constant 126 : index
    %256 = vector.load %arg29[%c0_248, %c126_249] : memref<32x384xf32, #tpu.memory_space<vmem>>, vector<32x128xf32>
    %cst_250 = arith.constant dense<0.000000e+00> : vector<32x128xf32>
    %257 = tpu.matmul %255, %256, %cst_250 {dimension_numbers = #tpu.dot_dimension_numbers<[1], [0], [0], [1], [0, 0, 1, 1], [], []>} : vector<32x32xf32>, vector<32x128xf32>, vector<32x128xf32> -> vector<32x128xf32>
    %258 = arith.addf %253, %257 : vector<32x128xf32>
    %c2_251 = arith.constant 2 : index
    %c0_252 = arith.constant 0 : index
    %c0_253 = arith.constant 0 : index
    %259 = vector.load %arg18[%c2_251, %c0_252, %c0_253] : memref<8x32x32xf32, #tpu.memory_space<vmem>>, vector<1x32x32xf32>
    %260 = vector.shape_cast %259 : vector<1x32x32xf32> to vector<32x32xf32>
    %c0_254 = arith.constant 0 : index
    %c127_255 = arith.constant 127 : index
    %261 = vector.load %arg29[%c0_254, %c127_255] : memref<32x384xf32, #tpu.memory_space<vmem>>, vector<32x128xf32>
    %cst_256 = arith.constant dense<0.000000e+00> : vector<32x128xf32>
    %262 = tpu.matmul %260, %261, %cst_256 {dimension_numbers = #tpu.dot_dimension_numbers<[1], [0], [0], [1], [0, 0, 1, 1], [], []>} : vector<32x32xf32>, vector<32x128xf32>, vector<32x128xf32> -> vector<32x128xf32>
    %263 = arith.addf %258, %262 : vector<32x128xf32>
    %c3_257 = arith.constant 3 : index
    %c0_258 = arith.constant 0 : index
    %c0_259 = arith.constant 0 : index
    %264 = vector.load %arg18[%c3_257, %c0_258, %c0_259] : memref<8x32x32xf32, #tpu.memory_space<vmem>>, vector<1x32x32xf32>
    %265 = vector.shape_cast %264 : vector<1x32x32xf32> to vector<32x32xf32>
    %c0_260 = arith.constant 0 : index
    %c128_261 = arith.constant 128 : index
    %266 = vector.load %arg29[%c0_260, %c128_261] : memref<32x384xf32, #tpu.memory_space<vmem>>, vector<32x128xf32>
    %cst_262 = arith.constant dense<0.000000e+00> : vector<32x128xf32>
    %267 = tpu.matmul %265, %266, %cst_262 {dimension_numbers = #tpu.dot_dimension_numbers<[1], [0], [0], [1], [0, 0, 1, 1], [], []>} : vector<32x32xf32>, vector<32x128xf32>, vector<32x128xf32> -> vector<32x128xf32>
    %268 = arith.addf %263, %267 : vector<32x128xf32>
    %c4_263 = arith.constant 4 : index
    %c0_264 = arith.constant 0 : index
    %c0_265 = arith.constant 0 : index
    %269 = vector.load %arg18[%c4_263, %c0_264, %c0_265] : memref<8x32x32xf32, #tpu.memory_space<vmem>>, vector<1x32x32xf32>
    %270 = vector.shape_cast %269 : vector<1x32x32xf32> to vector<32x32xf32>
    %c0_266 = arith.constant 0 : index
    %c129_267 = arith.constant 129 : index
    %271 = vector.load %arg29[%c0_266, %c129_267] : memref<32x384xf32, #tpu.memory_space<vmem>>, vector<32x128xf32>
    %cst_268 = arith.constant dense<0.000000e+00> : vector<32x128xf32>
    %272 = tpu.matmul %270, %271, %cst_268 {dimension_numbers = #tpu.dot_dimension_numbers<[1], [0], [0], [1], [0, 0, 1, 1], [], []>} : vector<32x32xf32>, vector<32x128xf32>, vector<32x128xf32> -> vector<32x128xf32>
    %273 = arith.addf %268, %272 : vector<32x128xf32>
    %c5_269 = arith.constant 5 : index
    %c0_270 = arith.constant 0 : index
    %c0_271 = arith.constant 0 : index
    %274 = vector.load %arg18[%c5_269, %c0_270, %c0_271] : memref<8x32x32xf32, #tpu.memory_space<vmem>>, vector<1x32x32xf32>
    %275 = vector.shape_cast %274 : vector<1x32x32xf32> to vector<32x32xf32>
    %c0_272 = arith.constant 0 : index
    %c130_273 = arith.constant 130 : index
    %276 = vector.load %arg29[%c0_272, %c130_273] : memref<32x384xf32, #tpu.memory_space<vmem>>, vector<32x128xf32>
    %cst_274 = arith.constant dense<0.000000e+00> : vector<32x128xf32>
    %277 = tpu.matmul %275, %276, %cst_274 {dimension_numbers = #tpu.dot_dimension_numbers<[1], [0], [0], [1], [0, 0, 1, 1], [], []>} : vector<32x32xf32>, vector<32x128xf32>, vector<32x128xf32> -> vector<32x128xf32>
    %278 = arith.addf %273, %277 : vector<32x128xf32>
    %c6_275 = arith.constant 6 : index
    %c0_276 = arith.constant 0 : index
    %c0_277 = arith.constant 0 : index
    %279 = vector.load %arg18[%c6_275, %c0_276, %c0_277] : memref<8x32x32xf32, #tpu.memory_space<vmem>>, vector<1x32x32xf32>
    %280 = vector.shape_cast %279 : vector<1x32x32xf32> to vector<32x32xf32>
    %c0_278 = arith.constant 0 : index
    %c131_279 = arith.constant 131 : index
    %281 = vector.load %arg29[%c0_278, %c131_279] : memref<32x384xf32, #tpu.memory_space<vmem>>, vector<32x128xf32>
    %cst_280 = arith.constant dense<0.000000e+00> : vector<32x128xf32>
    %282 = tpu.matmul %280, %281, %cst_280 {dimension_numbers = #tpu.dot_dimension_numbers<[1], [0], [0], [1], [0, 0, 1, 1], [], []>} : vector<32x32xf32>, vector<32x128xf32>, vector<32x128xf32> -> vector<32x128xf32>
    %283 = arith.addf %278, %282 : vector<32x128xf32>
    %c7_281 = arith.constant 7 : index
    %c0_282 = arith.constant 0 : index
    %c0_283 = arith.constant 0 : index
    %284 = vector.load %arg18[%c7_281, %c0_282, %c0_283] : memref<8x32x32xf32, #tpu.memory_space<vmem>>, vector<1x32x32xf32>
    %285 = vector.shape_cast %284 : vector<1x32x32xf32> to vector<32x32xf32>
    %c0_284 = arith.constant 0 : index
    %c132_285 = arith.constant 132 : index
    %286 = vector.load %arg29[%c0_284, %c132_285] : memref<32x384xf32, #tpu.memory_space<vmem>>, vector<32x128xf32>
    %cst_286 = arith.constant dense<0.000000e+00> : vector<32x128xf32>
    %287 = tpu.matmul %285, %286, %cst_286 {dimension_numbers = #tpu.dot_dimension_numbers<[1], [0], [0], [1], [0, 0, 1, 1], [], []>} : vector<32x32xf32>, vector<32x128xf32>, vector<32x128xf32> -> vector<32x128xf32>
    %288 = arith.addf %283, %287 : vector<32x128xf32>
    %c0_287 = arith.constant 0 : index
    %c0_288 = arith.constant 0 : index
    %289 = vector.load %arg19[%c0_287, %c0_288] : memref<32x1xf32, #tpu.memory_space<vmem>>, vector<32x1xf32>
    %290 = vector.broadcast %289 : vector<32x1xf32> to vector<32x128xf32>
    %291 = arith.addf %288, %290 : vector<32x128xf32>
    %cst_289 = arith.constant 0.000000e+00 : f32
    %292 = vector.broadcast %cst_289 : f32 to vector<32x128xf32>
    %293 = arith.maximumf %291, %292 : vector<32x128xf32>
    %294 = vector.broadcast %33 : vector<1x128xf32> to vector<32x128xf32>
    %295 = arith.mulf %293, %294 : vector<32x128xf32>
    %c0_290 = arith.constant 0 : index
    %c128_291 = arith.constant 128 : index
    %296 = vector.load %arg27[%c0_290, %c128_291] : memref<32x384xf32, #tpu.memory_space<vmem>>, vector<32x128xf32>
    tpu.vector_store %arg27[%c0_290, %c128_291], %295 {strides = array<i32>} : memref<32x384xf32, #tpu.memory_space<vmem>>, vector<32x128xf32>,
    %c0_292 = arith.constant 0 : index
    %c0_293 = arith.constant 0 : index
    %c0_294 = arith.constant 0 : index
    %297 = vector.load %arg20[%c0_292, %c0_293, %c0_294] : memref<5x32x32xf32, #tpu.memory_space<vmem>>, vector<1x32x32xf32>
    %298 = vector.shape_cast %297 : vector<1x32x32xf32> to vector<32x32xf32>
    %c0_295 = arith.constant 0 : index
    %c126_296 = arith.constant 126 : index
    %299 = vector.load %arg27[%c0_295, %c126_296] : memref<32x384xf32, #tpu.memory_space<vmem>>, vector<32x128xf32>
    %cst_297 = arith.constant dense<0.000000e+00> : vector<32x128xf32>
    %300 = tpu.matmul %298, %299, %cst_297 {dimension_numbers = #tpu.dot_dimension_numbers<[1], [0], [0], [1], [0, 0, 1, 1], [], []>} : vector<32x32xf32>, vector<32x128xf32>, vector<32x128xf32> -> vector<32x128xf32>
    %c1_298 = arith.constant 1 : index
    %c0_299 = arith.constant 0 : index
    %c0_300 = arith.constant 0 : index
    %301 = vector.load %arg20[%c1_298, %c0_299, %c0_300] : memref<5x32x32xf32, #tpu.memory_space<vmem>>, vector<1x32x32xf32>
    %302 = vector.shape_cast %301 : vector<1x32x32xf32> to vector<32x32xf32>
    %c0_301 = arith.constant 0 : index
    %c127_302 = arith.constant 127 : index
    %303 = vector.load %arg27[%c0_301, %c127_302] : memref<32x384xf32, #tpu.memory_space<vmem>>, vector<32x128xf32>
    %cst_303 = arith.constant dense<0.000000e+00> : vector<32x128xf32>
    %304 = tpu.matmul %302, %303, %cst_303 {dimension_numbers = #tpu.dot_dimension_numbers<[1], [0], [0], [1], [0, 0, 1, 1], [], []>} : vector<32x32xf32>, vector<32x128xf32>, vector<32x128xf32> -> vector<32x128xf32>
    %305 = arith.addf %300, %304 : vector<32x128xf32>
    %c2_304 = arith.constant 2 : index
    %c0_305 = arith.constant 0 : index
    %c0_306 = arith.constant 0 : index
    %306 = vector.load %arg20[%c2_304, %c0_305, %c0_306] : memref<5x32x32xf32, #tpu.memory_space<vmem>>, vector<1x32x32xf32>
    %307 = vector.shape_cast %306 : vector<1x32x32xf32> to vector<32x32xf32>
    %c0_307 = arith.constant 0 : index
    %c128_308 = arith.constant 128 : index
    %308 = vector.load %arg27[%c0_307, %c128_308] : memref<32x384xf32, #tpu.memory_space<vmem>>, vector<32x128xf32>
    %cst_309 = arith.constant dense<0.000000e+00> : vector<32x128xf32>
    %309 = tpu.matmul %307, %308, %cst_309 {dimension_numbers = #tpu.dot_dimension_numbers<[1], [0], [0], [1], [0, 0, 1, 1], [], []>} : vector<32x32xf32>, vector<32x128xf32>, vector<32x128xf32> -> vector<32x128xf32>
    %310 = arith.addf %305, %309 : vector<32x128xf32>
    %c3_310 = arith.constant 3 : index
    %c0_311 = arith.constant 0 : index
    %c0_312 = arith.constant 0 : index
    %311 = vector.load %arg20[%c3_310, %c0_311, %c0_312] : memref<5x32x32xf32, #tpu.memory_space<vmem>>, vector<1x32x32xf32>
    %312 = vector.shape_cast %311 : vector<1x32x32xf32> to vector<32x32xf32>
    %c0_313 = arith.constant 0 : index
    %c129_314 = arith.constant 129 : index
    %313 = vector.load %arg27[%c0_313, %c129_314] : memref<32x384xf32, #tpu.memory_space<vmem>>, vector<32x128xf32>
    %cst_315 = arith.constant dense<0.000000e+00> : vector<32x128xf32>
    %314 = tpu.matmul %312, %313, %cst_315 {dimension_numbers = #tpu.dot_dimension_numbers<[1], [0], [0], [1], [0, 0, 1, 1], [], []>} : vector<32x32xf32>, vector<32x128xf32>, vector<32x128xf32> -> vector<32x128xf32>
    %315 = arith.addf %310, %314 : vector<32x128xf32>
    %c4_316 = arith.constant 4 : index
    %c0_317 = arith.constant 0 : index
    %c0_318 = arith.constant 0 : index
    %316 = vector.load %arg20[%c4_316, %c0_317, %c0_318] : memref<5x32x32xf32, #tpu.memory_space<vmem>>, vector<1x32x32xf32>
    %317 = vector.shape_cast %316 : vector<1x32x32xf32> to vector<32x32xf32>
    %c0_319 = arith.constant 0 : index
    %c130_320 = arith.constant 130 : index
    %318 = vector.load %arg27[%c0_319, %c130_320] : memref<32x384xf32, #tpu.memory_space<vmem>>, vector<32x128xf32>
    %cst_321 = arith.constant dense<0.000000e+00> : vector<32x128xf32>
    %319 = tpu.matmul %317, %318, %cst_321 {dimension_numbers = #tpu.dot_dimension_numbers<[1], [0], [0], [1], [0, 0, 1, 1], [], []>} : vector<32x32xf32>, vector<32x128xf32>, vector<32x128xf32> -> vector<32x128xf32>
    %320 = arith.addf %315, %319 : vector<32x128xf32>
    %c0_322 = arith.constant 0 : index
    %c0_323 = arith.constant 0 : index
    %321 = vector.load %arg21[%c0_322, %c0_323] : memref<32x1xf32, #tpu.memory_space<vmem>>, vector<32x1xf32>
    %322 = vector.broadcast %321 : vector<32x1xf32> to vector<32x128xf32>
    %323 = arith.addf %320, %322 : vector<32x128xf32>
    %cst_324 = arith.constant 0.000000e+00 : f32
    %324 = vector.broadcast %cst_324 : f32 to vector<32x128xf32>
    %325 = arith.maximumf %323, %324 : vector<32x128xf32>
    %326 = vector.broadcast %33 : vector<1x128xf32> to vector<32x128xf32>
    %327 = arith.mulf %325, %326 : vector<32x128xf32>
    %c0_325 = arith.constant 0 : index
    %c128_326 = arith.constant 128 : index
    %328 = vector.load %arg28[%c0_325, %c128_326] : memref<32x384xf32, #tpu.memory_space<vmem>>, vector<32x128xf32>
    tpu.vector_store %arg28[%c0_325, %c128_326], %327 {strides = array<i32>} : memref<32x384xf32, #tpu.memory_space<vmem>>, vector<32x128xf32>,
    %c0_327 = arith.constant 0 : index
    %c0_328 = arith.constant 0 : index
    %c0_329 = arith.constant 0 : index
    %329 = vector.load %arg22[%c0_327, %c0_328, %c0_329] : memref<3x32x32xf32, #tpu.memory_space<vmem>>, vector<1x32x32xf32>
    %330 = vector.shape_cast %329 : vector<1x32x32xf32> to vector<32x32xf32>
    %c0_330 = arith.constant 0 : index
    %c127_331 = arith.constant 127 : index
    %331 = vector.load %arg28[%c0_330, %c127_331] : memref<32x384xf32, #tpu.memory_space<vmem>>, vector<32x128xf32>
    %cst_332 = arith.constant dense<0.000000e+00> : vector<32x128xf32>
    %332 = tpu.matmul %330, %331, %cst_332 {dimension_numbers = #tpu.dot_dimension_numbers<[1], [0], [0], [1], [0, 0, 1, 1], [], []>} : vector<32x32xf32>, vector<32x128xf32>, vector<32x128xf32> -> vector<32x128xf32>
    %c1_333 = arith.constant 1 : index
    %c0_334 = arith.constant 0 : index
    %c0_335 = arith.constant 0 : index
    %333 = vector.load %arg22[%c1_333, %c0_334, %c0_335] : memref<3x32x32xf32, #tpu.memory_space<vmem>>, vector<1x32x32xf32>
    %334 = vector.shape_cast %333 : vector<1x32x32xf32> to vector<32x32xf32>
    %c0_336 = arith.constant 0 : index
    %c128_337 = arith.constant 128 : index
    %335 = vector.load %arg28[%c0_336, %c128_337] : memref<32x384xf32, #tpu.memory_space<vmem>>, vector<32x128xf32>
    %cst_338 = arith.constant dense<0.000000e+00> : vector<32x128xf32>
    %336 = tpu.matmul %334, %335, %cst_338 {dimension_numbers = #tpu.dot_dimension_numbers<[1], [0], [0], [1], [0, 0, 1, 1], [], []>} : vector<32x32xf32>, vector<32x128xf32>, vector<32x128xf32> -> vector<32x128xf32>
    %337 = arith.addf %332, %336 : vector<32x128xf32>
    %c2_339 = arith.constant 2 : index
    %c0_340 = arith.constant 0 : index
    %c0_341 = arith.constant 0 : index
    %338 = vector.load %arg22[%c2_339, %c0_340, %c0_341] : memref<3x32x32xf32, #tpu.memory_space<vmem>>, vector<1x32x32xf32>
    %339 = vector.shape_cast %338 : vector<1x32x32xf32> to vector<32x32xf32>
    %c0_342 = arith.constant 0 : index
    %c129_343 = arith.constant 129 : index
    %340 = vector.load %arg28[%c0_342, %c129_343] : memref<32x384xf32, #tpu.memory_space<vmem>>, vector<32x128xf32>
    %cst_344 = arith.constant dense<0.000000e+00> : vector<32x128xf32>
    %341 = tpu.matmul %339, %340, %cst_344 {dimension_numbers = #tpu.dot_dimension_numbers<[1], [0], [0], [1], [0, 0, 1, 1], [], []>} : vector<32x32xf32>, vector<32x128xf32>, vector<32x128xf32> -> vector<32x128xf32>
    %342 = arith.addf %337, %341 : vector<32x128xf32>
    %c0_345 = arith.constant 0 : index
    %c0_346 = arith.constant 0 : index
    %343 = vector.load %arg23[%c0_345, %c0_346] : memref<32x1xf32, #tpu.memory_space<vmem>>, vector<32x1xf32>
    %344 = vector.broadcast %343 : vector<32x1xf32> to vector<32x128xf32>
    %345 = arith.addf %342, %344 : vector<32x128xf32>
    %cst_347 = arith.constant 0.000000e+00 : f32
    %346 = vector.broadcast %cst_347 : f32 to vector<32x128xf32>
    %347 = arith.maximumf %345, %346 : vector<32x128xf32>
    %348 = vector.broadcast %33 : vector<1x128xf32> to vector<32x128xf32>
    %349 = arith.mulf %347, %348 : vector<32x128xf32>
    %c0_348 = arith.constant 0 : index
    %c128_349 = arith.constant 128 : index
    %350 = vector.load %arg27[%c0_348, %c128_349] : memref<32x384xf32, #tpu.memory_space<vmem>>, vector<32x128xf32>
    tpu.vector_store %arg27[%c0_348, %c128_349], %349 {strides = array<i32>} : memref<32x384xf32, #tpu.memory_space<vmem>>, vector<32x128xf32>,
    %c0_350 = arith.constant 0 : index
    %c128_351 = arith.constant 128 : index
    %351 = vector.load %arg27[%c0_350, %c128_351] : memref<32x384xf32, #tpu.memory_space<vmem>>, vector<32x128xf32>
    %352 = vector.shape_cast %351 : vector<32x128xf32> to vector<32x1x128xf32>
    %cst_352 = arith.constant dense<0.000000e+00> : vector<32x1xf32>
    %353 = vector.multi_reduction <add>, %352, %cst_352 [2] : vector<32x1x128xf32> to vector<32x1xf32>
    %cst_353 = arith.constant 6.250000e-02 : f32
    %354 = vector.broadcast %cst_353 : f32 to vector<32x1xf32>
    %355 = arith.mulf %353, %354 : vector<32x1xf32>
    %c0_354 = arith.constant 0 : index
    %c0_355 = arith.constant 0 : index
    %356 = vector.load %arg24[%c0_354, %c0_355] : memref<4x32xf32, #tpu.memory_space<vmem>>, vector<4x32xf32>
    %cst_356 = arith.constant dense<0.000000e+00> : vector<4x1xf32>
    %357 = tpu.matmul %356, %355, %cst_356 {dimension_numbers = #tpu.dot_dimension_numbers<[1], [0], [0], [1], [0, 0, 1, 1], [], []>} : vector<4x32xf32>, vector<32x1xf32>, vector<4x1xf32> -> vector<4x1xf32>
    %c0_357 = arith.constant 0 : index
    %c0_358 = arith.constant 0 : index
    %358 = vector.load %arg25[%c0_357, %c0_358] : memref<4x1xf32, #tpu.memory_space<vmem>>, vector<4x1xf32>
    %359 = arith.addf %357, %358 : vector<4x1xf32>
    %cst_359 = arith.constant dense<0xFF800000> : vector<1xf32>
    %360 = vector.multi_reduction <maximumf>, %359, %cst_359 [0] : vector<4x1xf32> to vector<1xf32>
    %361 = vector.shape_cast %360 : vector<1xf32> to vector<1x1xf32>
    %362 = vector.broadcast %361 : vector<1x1xf32> to vector<4x1xf32>
    %363 = arith.subf %359, %362 : vector<4x1xf32>
    %364 = math.exp %363 : vector<4x1xf32>
    %cst_360 = arith.constant dense<0.000000e+00> : vector<1xf32>
    %365 = vector.multi_reduction <add>, %364, %cst_360 [0] : vector<4x1xf32> to vector<1xf32>
    %366 = vector.shape_cast %365 : vector<1xf32> to vector<1x1xf32>
    %367 = math.log %366 : vector<1x1xf32>
    %368 = arith.addf %367, %361 : vector<1x1xf32>
    %369 = vector.broadcast %368 : vector<1x1xf32> to vector<4x1xf32>
    %370 = arith.subf %359, %369 : vector<4x1xf32>
    %c0_361 = arith.constant 0 : index
    %c0_362 = arith.constant 0 : index
    %c0_363 = arith.constant 0 : index
    %371 = vector.load %arg26[%c0_361, %c0_362, %c0_363] : memref<1x4x1xf32, #tpu.memory_space<vmem>>, vector<1x4x1xf32>
    %372 = vector.shape_cast %371 : vector<1x4x1xf32> to vector<4x1xf32>
    %373 = vector.shape_cast %370 : vector<4x1xf32> to vector<1x4x1xf32>
    tpu.vector_store %arg26[%c0_361, %c0_362, %c0_363], %373 {strides = array<i32>} : memref<1x4x1xf32, #tpu.memory_space<vmem>>, vector<1x4x1xf32>,
    return
  }
  func.func @transform_0(%arg0: i32) -> (i32, i32, i32) {
    %c0_i32 = arith.constant 0 : i32
    %c0_i32_0 = arith.constant 0 : i32
    %c0_i32_1 = arith.constant 0 : i32
    return %arg0, %c0_i32, %c0_i32_0 : i32, i32, i32
  }
  func.func @transform_1(%arg0: i32) -> (i32, i32, i32) {
    %c0_i32 = arith.constant 0 : i32
    %c0_i32_0 = arith.constant 0 : i32
    %c0_i32_1 = arith.constant 0 : i32
    %c0_i32_2 = arith.constant 0 : i32
    return %c0_i32, %c0_i32_0, %c0_i32_1 : i32, i32, i32
  }
  func.func @transform_2(%arg0: i32) -> (i32, i32) {
    %c0_i32 = arith.constant 0 : i32
    %c0_i32_0 = arith.constant 0 : i32
    %c0_i32_1 = arith.constant 0 : i32
    return %c0_i32, %c0_i32_0 : i32, i32
  }
  func.func @transform_3(%arg0: i32) -> (i32, i32, i32) {
    %c0_i32 = arith.constant 0 : i32
    %c0_i32_0 = arith.constant 0 : i32
    %c0_i32_1 = arith.constant 0 : i32
    %c0_i32_2 = arith.constant 0 : i32
    return %c0_i32, %c0_i32_0, %c0_i32_1 : i32, i32, i32
  }
  func.func @transform_4(%arg0: i32) -> (i32, i32) {
    %c0_i32 = arith.constant 0 : i32
    %c0_i32_0 = arith.constant 0 : i32
    %c0_i32_1 = arith.constant 0 : i32
    return %c0_i32, %c0_i32_0 : i32, i32
  }
  func.func @transform_5(%arg0: i32) -> (i32, i32, i32) {
    %c0_i32 = arith.constant 0 : i32
    %c0_i32_0 = arith.constant 0 : i32
    %c0_i32_1 = arith.constant 0 : i32
    %c0_i32_2 = arith.constant 0 : i32
    return %c0_i32, %c0_i32_0, %c0_i32_1 : i32, i32, i32
  }
  func.func @transform_6(%arg0: i32) -> (i32, i32) {
    %c0_i32 = arith.constant 0 : i32
    %c0_i32_0 = arith.constant 0 : i32
    %c0_i32_1 = arith.constant 0 : i32
    return %c0_i32, %c0_i32_0 : i32, i32
  }
  func.func @transform_7(%arg0: i32) -> (i32, i32) {
    %c0_i32 = arith.constant 0 : i32
    %c0_i32_0 = arith.constant 0 : i32
    %c0_i32_1 = arith.constant 0 : i32
    return %c0_i32, %c0_i32_0 : i32, i32
  }
  func.func @transform_8(%arg0: i32) -> (i32, i32) {
    %c0_i32 = arith.constant 0 : i32
    %c0_i32_0 = arith.constant 0 : i32
    %c0_i32_1 = arith.constant 0 : i32
    return %c0_i32, %c0_i32_0 : i32, i32
  }
  func.func @transform_9(%arg0: i32) -> (i32, i32, i32) {
    %c0_i32 = arith.constant 0 : i32
    %c0_i32_0 = arith.constant 0 : i32
    %c0_i32_1 = arith.constant 0 : i32
    %c0_i32_2 = arith.constant 0 : i32
    return %c0_i32, %c0_i32_0, %c0_i32_1 : i32, i32, i32
  }
  func.func @transform_10(%arg0: i32) -> (i32, i32) {
    %c0_i32 = arith.constant 0 : i32
    %c0_i32_0 = arith.constant 0 : i32
    %c0_i32_1 = arith.constant 0 : i32
    return %c0_i32, %c0_i32_0 : i32, i32
  }
  func.func @transform_11(%arg0: i32) -> (i32, i32, i32) {
    %c0_i32 = arith.constant 0 : i32
    %c0_i32_0 = arith.constant 0 : i32
    %c0_i32_1 = arith.constant 0 : i32
    %c0_i32_2 = arith.constant 0 : i32
    return %c0_i32, %c0_i32_0, %c0_i32_1 : i32, i32, i32
  }
  func.func @transform_12(%arg0: i32) -> (i32, i32) {
    %c0_i32 = arith.constant 0 : i32
    %c0_i32_0 = arith.constant 0 : i32
    %c0_i32_1 = arith.constant 0 : i32
    return %c0_i32, %c0_i32_0 : i32, i32
  }
  func.func @transform_13(%arg0: i32) -> (i32, i32, i32) {
    %c0_i32 = arith.constant 0 : i32
    %c0_i32_0 = arith.constant 0 : i32
    %c0_i32_1 = arith.constant 0 : i32
    %c0_i32_2 = arith.constant 0 : i32
    return %c0_i32, %c0_i32_0, %c0_i32_1 : i32, i32, i32
  }
  func.func @transform_14(%arg0: i32) -> (i32, i32) {
    %c0_i32 = arith.constant 0 : i32
    %c0_i32_0 = arith.constant 0 : i32
    %c0_i32_1 = arith.constant 0 : i32
    return %c0_i32, %c0_i32_0 : i32, i32
  }
  func.func @transform_15(%arg0: i32) -> (i32, i32) {
    %c0_i32 = arith.constant 0 : i32
    %c0_i32_0 = arith.constant 0 : i32
    %c0_i32_1 = arith.constant 0 : i32
    return %c0_i32, %c0_i32_0 : i32, i32
  }
  func.func @transform_16(%arg0: i32) -> (i32, i32) {
    %c0_i32 = arith.constant 0 : i32
    %c0_i32_0 = arith.constant 0 : i32
    %c0_i32_1 = arith.constant 0 : i32
    return %c0_i32, %c0_i32_0 : i32, i32
  }
  func.func @transform_17(%arg0: i32) -> (i32, i32, i32) {
    %c0_i32 = arith.constant 0 : i32
    %c0_i32_0 = arith.constant 0 : i32
    %c0_i32_1 = arith.constant 0 : i32
    %c0_i32_2 = arith.constant 0 : i32
    return %c0_i32, %c0_i32_0, %c0_i32_1 : i32, i32, i32
  }
  func.func @transform_18(%arg0: i32) -> (i32, i32) {
    %c0_i32 = arith.constant 0 : i32
    %c0_i32_0 = arith.constant 0 : i32
    %c0_i32_1 = arith.constant 0 : i32
    return %c0_i32, %c0_i32_0 : i32, i32
  }
  func.func @transform_19(%arg0: i32) -> (i32, i32, i32) {
    %c0_i32 = arith.constant 0 : i32
    %c0_i32_0 = arith.constant 0 : i32
    %c0_i32_1 = arith.constant 0 : i32
    %c0_i32_2 = arith.constant 0 : i32
    return %c0_i32, %c0_i32_0, %c0_i32_1 : i32, i32, i32
  }
  func.func @transform_20(%arg0: i32) -> (i32, i32) {
    %c0_i32 = arith.constant 0 : i32
    %c0_i32_0 = arith.constant 0 : i32
    %c0_i32_1 = arith.constant 0 : i32
    return %c0_i32, %c0_i32_0 : i32, i32
  }
  func.func @transform_21(%arg0: i32) -> (i32, i32, i32) {
    %c0_i32 = arith.constant 0 : i32
    %c0_i32_0 = arith.constant 0 : i32
    %c0_i32_1 = arith.constant 0 : i32
    %c0_i32_2 = arith.constant 0 : i32
    return %c0_i32, %c0_i32_0, %c0_i32_1 : i32, i32, i32
  }
  func.func @transform_22(%arg0: i32) -> (i32, i32) {
    %c0_i32 = arith.constant 0 : i32
    %c0_i32_0 = arith.constant 0 : i32
    %c0_i32_1 = arith.constant 0 : i32
    return %c0_i32, %c0_i32_0 : i32, i32
  }
  func.func @transform_23(%arg0: i32) -> (i32, i32) {
    %c0_i32 = arith.constant 0 : i32
    %c0_i32_0 = arith.constant 0 : i32
    %c0_i32_1 = arith.constant 0 : i32
    return %c0_i32, %c0_i32_0 : i32, i32
  }
  func.func @transform_24(%arg0: i32) -> (i32, i32) {
    %c0_i32 = arith.constant 0 : i32
    %c0_i32_0 = arith.constant 0 : i32
    %c0_i32_1 = arith.constant 0 : i32
    return %c0_i32, %c0_i32_0 : i32, i32
  }
  func.func @transform_25(%arg0: i32) -> (i32, i32, i32) {
    %c0_i32 = arith.constant 0 : i32
    %c0_i32_0 = arith.constant 0 : i32
    %c0_i32_1 = arith.constant 0 : i32
    return %arg0, %c0_i32, %c0_i32_0 : i32, i32, i32
  }
}

</mosaic_0001>

<bundles_post_ra>
// kernel: tpu_custom_call.1
= control target key start
LH: loop header
LB: loop body
LE: loop exit
PB: predicated region body
PF: predicated region fallthrough
CT: control target
= control target key end

     0   :  { %s11457_s0 = inlined_call_operand.hbm [shape: f32[2,32,128], index: 0, kind: input, shape index: {}]   ;;  %s11458_s1 = inlined_call_operand.hbm [shape: f32[8,16,32], index: 1, kind: input, shape index: {}]   ;;  %s11459_s2 = inlined_call_operand.vmem [shape: f32[16,1], index: 2, kind: input, shape index: {}]   ;;  %s11460_s3 = inlined_call_operand.hbm [shape: f32[5,16,16], index: 3, kind: input, shape index: {}]   ;;  %s11461_s4 = inlined_call_operand.vmem [shape: f32[16,1], index: 4, kind: input, shape index: {}]   ;;  %s11462_s5 = inlined_call_operand.hbm [shape: f32[3,16,16], index: 5, kind: input, shape index: {}]   ;;  %s11463_s6 = inlined_call_operand.vmem [shape: f32[16,1], index: 6, kind: input, shape index: {}]   ;;  %s11464_s7 = inlined_call_operand.vmem [shape: f32[16,32], index: 7, kind: input, shape index: {}]   ;;  %s11465_s8 = inlined_call_operand.vmem [shape: f32[16,1], index: 8, kind: input, shape index: {}]   ;;  %s11466_s9 = inlined_call_operand.vmem [shape: f32[8,32,16], index: 9, kind: input, shape index: {}]   ;;  %s11467_s10 = inlined_call_operand.vmem [shape: f32[32,1], index: 10, kind: input, shape index: {}]   ;;  %s11468_s11 = inlined_call_operand.vmem [shape: f32[5,32,32], index: 11, kind: input, shape index: {}]   ;;  %s11469_s12 = inlined_call_operand.vmem [shape: f32[32,1], index: 12, kind: input, shape index: {}]   ;;  %s11470_s13 = inlined_call_operand.hbm [shape: f32[3,32,32], index: 13, kind: input, shape index: {}]   ;;  %s11471_s14 = inlined_call_operand.vmem [shape: f32[32,1], index: 14, kind: input, shape index: {}]   ;;  %s11472_s15 = inlined_call_operand.vmem [shape: f32[32,16], index: 15, kind: input, shape index: {}]   ;;  %s11473_s16 = inlined_call_operand.vmem [shape: f32[32,1], index: 16, kind: input, shape index: {}]   ;;  %s11474_s17 = inlined_call_operand.vmem [shape: f32[8,32,32], index: 17, kind: input, shape index: {}]   ;;  %s11475_s18 = inlined_call_operand.vmem [shape: f32[32,1], index: 18, kind: input, shape index: {}]   ;;  %s11476_s19 = inlined_call_operand.vmem [shape: f32[5,32,32], index: 19, kind: input, shape index: {}]   ;;  %s11477_s20 = inlined_call_operand.vmem [shape: f32[32,1], index: 20, kind: input, shape index: {}]   ;;  %s11478_s21 = inlined_call_operand.hbm [shape: f32[3,32,32], index: 21, kind: input, shape index: {}]   ;;  %s11479_s22 = inlined_call_operand.vmem [shape: f32[32,1], index: 22, kind: input, shape index: {}]   ;;  %s11480_s23 = inlined_call_operand.vmem [shape: f32[4,32], index: 23, kind: input, shape index: {}]   ;;  %s11481_s24 = inlined_call_operand.vmem [shape: f32[4,1], index: 24, kind: input, shape index: {}]   ;;  %s11482_s25 = inlined_call_operand.vmem [shape: f32[2,4,1], index: 25, kind: output, shape index: {}]  }
   0x1   :  { %11515 = sst [smem:[#allocation19_spill]] %s11457_s0 }
   0x2   :  { %11516 = sst [smem:[#allocation20_spill]] %s11458_s1 }
   0x3   :  { %11517 = sst [smem:[#allocation21_spill]] %s11459_s2 }
   0x4   :  { %11518 = sst [smem:[#allocation22_spill]] %s11460_s3 }
   0x5   :  { %11519 = sst [smem:[#allocation23_spill]] %s11461_s4 }
   0x6   :  { %11520 = sst [smem:[#allocation24_spill]] %s11462_s5 }
   0x7   :  { %11521 = sst [smem:[#allocation25_spill]] %s11463_s6 }
   0x8   :  { %11522 = sst [smem:[#allocation26_spill]] %s11464_s7 }
   0x9   :  { %11523 = sst [smem:[#allocation27_spill]] %s11465_s8 }
   0xa   :  { %11524 = sst [smem:[#allocation28_spill]] %s11466_s9 }
   0xb   :  { %11525 = sst [smem:[#allocation29_spill]] %s11467_s10 }
   0xc   :  { %11526 = sst [smem:[#allocation30_spill]] %s11468_s11 }
   0xd   :  { %11527 = sst [smem:[#allocation31_spill]] %s11469_s12 }
   0xe   :  { %11528 = sst [smem:[#allocation32_spill]] %s11470_s13 }
   0xf   :  { %11529 = sst [smem:[#allocation33_spill]] %s11478_s21 }
  0x10   :  { %11530 = sst [smem:[#allocation34_spill]] %s11479_s22 }
  0x11   :  { %11531 = sst [smem:[#allocation35_spill]] %s11480_s23 }
  0x12   :  { %11532 = sst [smem:[#allocation36_spill]] %s11481_s24 }
  0x13   :  { %11533 = sst [smem:[#allocation37_spill]] %s11482_s25 }
  0x14   :  { %30 = vsyncpa [#allocation6], 0 }
  0x15   :  { %32 = vsyncpa [#allocation6 + $0x1], 0 }
  0x16   :  { %33 = vsyncpa [#allocation8], 0 }
  0x17   :  { %34 = vsyncpa [#allocation11], 0 }
  0x18   :  { %35 = vsyncpa [#allocation14], 0  ;;  %s9793_s29 = smov 0   ;;  %s9795_s2 = smov 0  }
  0x19   :  { %s9797_s6 = smov 0   ;;  %s9799_s30 = smov 0  }
  0x1a LB: > { %s9644_s7 = smov [#allocation7]   ;;  %s9814_s26 = sadd.s32 4294967295, %s9642_s30   ;;  %s9642_s30 = sphi %s9799_s30, %s11580_s30   ;;  %s9638_s6 = sphi %s9797_s6, %s11579_s6   ;;  %s9634_s2 = sphi %s9795_s2, %s11578_s2   ;;  %s9630_s29 = sphi %s9793_s29, %s11577_s29  }
  0x1b   : > { %s614_s3 = sshll.u32 %s9644_s7, 4  ;;  %p7843_p0 = scmp.ge.s32.totalorder %s9642_s30, 1  ;;  %s615_s3 = int_to_ptr.vmem [resolvable:$true] %s614_s3 }
  0x1c   : > { %p11493_p1 = scmp.eq.s32.totalorder %s9814_s26, 0  ;;  %p602_p2 = scmp.lt.s32.totalorder %s9642_s30, 3 }
  0x1d   : > { %s9645_s8 = smov [#allocation10]   ;;  %s9646_s28 = smov [#allocation9]  }
  0x1e   : > { %p9819_p3 = pnand %p7843_p0, %p602_p2  ;;  %s646_s27 = sshll.u32 %s9645_s8, 4  ;;  %s9831_s27 = int_to_ptr.vmem [resolvable:$true] %s646_s27 }
  0x1f   : > { %s630_s9 = sshll.u32 %s9646_s28, 4  ;;  %s9449_s0 = scalar_lea.vmem %s615_s3, 2048  ;;  %s9833_s9 = int_to_ptr.vmem [resolvable:$true] %s630_s9 }
  0x20   : > { %s11534_s1 = scalar_select %p9819_p3, 1, 0 }
  0x21   : > { %p9071_p4 = pneg %p9819_p3  ;;  %p9450_p7 = scmp.ne.s32.totalorder %s615_s3, %s9449_s0 }
  0x22   : > { %p9457_p10 = scmp.lt.s32.totalorder %s615_s3, %s615_s3  ;;  %p9458_p11 = scmp.lt.s32.totalorder %s9449_s0, %s9449_s0 }
  0x23   : > { %p9827_p5 = pnand %p9071_p4, %p11493_p1 }
  0x24   : > { %p9459_p12 = por %p9458_p11, %p9457_p10 }
  0x25   : > { %p9837_p6 = pneg %p9827_p5 }
  0x27   : > { %p9452_p8 = pnand %p9450_p7, %p9837_p6 }
  0x29   : > { %p9453_p9 = pneg %p9452_p8 }
  0x2b   : > { %p9460_p13 = pnand %p9459_p12, %p9453_p9 }
  0x2d   : > { %9463 = shalt.err (!%p9460_p13)
}
  0x2e   : > { %s11491_s7 = smov 128   ;;  %s11492_s8 = smov 8  }
  0x2f   : > { %s11537_s24 = sld [smem:[#allocation20_spill]]  ;;  %s9475_s23 = scalar_lea.vmem %s9831_s27, 768 }
  0x30   : > { %p9476_p0 = scmp.ne.s32.totalorder %s9831_s27, %s9475_s23  ;;  %p9483_p7 = scmp.lt.s32.totalorder %s9831_s27, %s9831_s27 }
  0x31   : > { %p9484_p8 = scmp.lt.s32.totalorder %s9475_s23, %s9475_s23 }
  0x32   : > { %p9478_p2 = pnand %p9476_p0, %p9837_p6 }
  0x33   : > { %p9485_p9 = por %p9484_p8, %p9483_p7 }
  0x34   : > { %p9479_p4 = pneg %p9478_p2 }
  0x35   : > { %9074 = dma.hbm_to_vmem [thread:$0]  (!%p9827_p5), %s11537_s24, 2048, %s615_s3, [#allocation8], %s11491_s7, %s11491_s7, %s11492_s8  }
  0x36   : > { %p9486_p10 = pnand %p9485_p9, %p9479_p4 }
  0x38   : > { %9489 = shalt.err (!%p9486_p10)
}
  0x39   : > { %s11538_s24 = sld [smem:[#allocation24_spill]]  ;;  %s9501_s3 = scalar_lea.vmem %s9833_s9, 1280 }
  0x3a   : > { %p9502_p11 = scmp.ne.s32.totalorder %s9833_s9, %s9501_s3  ;;  %p9509_p0 = scmp.lt.s32.totalorder %s9833_s9, %s9833_s9 }
  0x3b   : > { %p9510_p2 = scmp.lt.s32.totalorder %s9501_s3, %s9501_s3 }
  0x3c   : > { %p9504_p12 = pnand %p9502_p11, %p9837_p6 }
  0x3d   : > { %p9511_p4 = por %p9510_p2, %p9509_p0 }
  0x3e   : > { %p9505_p13 = pneg %p9504_p12 }
  0x3f   : > { %9080 = dma.hbm_to_vmem [thread:$0]  (!%p9827_p5), %s11538_s24, 768, %s9831_s27, [#allocation11], %s11491_s7, %s11491_s7, %s11492_s8  }
  0x40   : > { %p9512_p7 = pnand %p9511_p4, %p9505_p13 }
  0x42   : > { %9515 = shalt.err (!%p9512_p7)
}
  0x43   : > { %s11539_s27 = sld [smem:[#allocation22_spill]]  ;;  %s9649_s0 = smov [#allocation12]  }
  0x44   : > { %s680_s25 = sshll.u32 %s9649_s0, 4  ;;  %s9650_s24 = smov [#allocation13]   ;;  %s681_s25 = int_to_ptr.vmem [resolvable:$true] %s680_s25 }
  0x45   : > { %s714_s22 = sshll.u32 %s9650_s24, 4  ;;  %s9527_s3 = scalar_lea.vmem %s681_s25, 1536  ;;  %s715_s22 = int_to_ptr.vmem [resolvable:$true] %s714_s22 }
  0x46   : > { %p9528_p8 = scmp.ne.s32.totalorder %s681_s25, %s9527_s3  ;;  %p9535_p11 = scmp.lt.s32.totalorder %s681_s25, %s681_s25 }
  0x47   : > { %p9536_p12 = scmp.lt.s32.totalorder %s9527_s3, %s9527_s3 }
  0x48   : > { %p9530_p9 = pnand %p9528_p8, %p9837_p6 }
  0x49   : > { %9077 = dma.hbm_to_vmem [thread:$0]  (!%p9827_p5), %s11539_s27, 1280, %s9833_s9, [#allocation8], %s11491_s7, %s11491_s7, %s11492_s8  }
  0x4a   : > { %p9531_p10 = pneg %p9530_p9  ;;  %p9537_p13 = por %p9536_p12, %p9535_p11 }
  0x4c   : > { %p9538_p0 = pnand %p9537_p13, %p9531_p10 }
  0x4e   : > { %9541 = shalt.err (!%p9538_p0)
}
  0x4f   : > { %s11540_s13 = sld [smem:[#allocation32_spill]]  ;;  %s9553_s28 = scalar_lea.vmem %s715_s22, 1536 }
  0x50   : > { %p9554_p2 = scmp.ne.s32.totalorder %s715_s22, %s9553_s28  ;;  %p9561_p8 = scmp.lt.s32.totalorder %s715_s22, %s715_s22 }
  0x51   : > { %p9562_p9 = scmp.lt.s32.totalorder %s9553_s28, %s9553_s28 }
  0x52   : > { %p9556_p4 = pnand %p9554_p2, %p9837_p6 }
  0x53   : > { %p9563_p10 = por %p9562_p9, %p9561_p8 }
  0x54   : > { %p9557_p7 = pneg %p9556_p4 }
  0x55   : > { %9083 = dma.hbm_to_vmem [thread:$0]  (!%p9827_p5), %s11540_s13, 1536, %s681_s25, [#allocation11], %s11491_s7, %s11491_s7, %s11492_s8  }
  0x56   : > { %p9564_p11 = pnand %p9563_p10, %p9557_p7 }
  0x58   : > { %9567 = shalt.err (!%p9564_p11)
}
  0x59   : > { %s11541_s21 = sld [smem:[#allocation33_spill]]  ;;  %s9902_s4 = sadd.s32 1, %s9642_s30  }
  0x5a   : > { %s45_s5 = ssub.s32 %s9642_s30, %s9902_s4  ;;  %s48_s25 = sadd.s32 1, %s9638_s6 }
  0x5b   : > { %p46_p6 = scmp.eq.s32.totalorder %s45_s5, 0  ;;  %p55_p12 = scmp.ne.s32.totalorder %s9638_s6, %s9634_s2 }
  0x5c   : > { %p56_p13 = scmp.eq.s32.totalorder %s9642_s30, 0  ;;  %p61_p0 = scmp.ne.s32.totalorder %s9634_s2, %s9630_s29 }
  0x5d   : > { %s9913_s24 = scalar_select %p46_p6, %s9638_s6, %s48_s25  }
  0x5e   : > { %p57_p2 = por %p56_p13, %p55_p12  ;;  %p9917_p4 = por %p11493_p1, %p61_p0 }
  0x5f   : > { %9086 = dma.hbm_to_vmem [thread:$0]  (!%p9827_p5), %s11541_s21, 1536, %s715_s22, [#allocation14], %s11491_s7, %s11491_s7, %s11492_s8  }
  0x60   : > { %s11542_s3 = scalar_select %p9917_p4, 1, 0 }
  0x61   : > { %p9096_p7 = scmp.lt.s32.totalorder %s9642_s30, 2  ;;  %s737_s9 = sand.u32 1, %s9638_s6  }
  0x62   : > { %s7850_s22 = sshll.u32 %s737_s9, 5  ;;  %s8119_s23 = sshll.u32 %s9642_s30, 9 }
  0x63   : > { %s11543_s0 = sld [smem:[#allocation19_spill]]  ;;  %s741_s29 = scalar_lea.vmem [#allocation5], %s7850_s22 }
  0x64   : > { %s748_s5 = sshll.u32 %s741_s29, 4  ;;  %p9931_p5 = pnand %p9096_p7, %p57_p2  ;;  %s9929_s5 = int_to_ptr.vmem [resolvable:$true] %s748_s5 }
  0x65   : > { %s9935_s8 = scalar_lea.sflag [#allocation6], %s737_s9 }
  0x66   : > { %p9570_p9 = pneg %p9931_p5 }
  0x69   : > { %s9927_s7 = scalar_lea.hbm %s11543_s0, %s8119_s23  ;;  %s9573_s22 = scalar_lea.hbm %s11543_s0, 1024 }
  0x6a   : > { %s9568_s30 = scalar_lea.hbm %s9927_s7, 512  ;;  %p9574_p6 = scmp.lt.s32.totalorder %s9927_s7, %s11543_s0 }
  0x6b   : > { %p9569_p8 = scmp.ne.s32.totalorder %s9927_s7, %s9568_s30  ;;  %p9575_p12 = scmp.lt.s32.totalorder %s9573_s22, %s9568_s30 }
  0x6d   : > { %p9571_p10 = pnand %p9570_p9, %p9569_p8  ;;  %p9576_p13 = por %p9575_p12, %p9574_p6 }
  0x6f   : > { %p9572_p11 = pneg %p9571_p10 }
  0x71   : > { %p9577_p0 = pnand %p9576_p13, %p9572_p11 }
  0x73   : > { %9580 = shalt.err (!%p9577_p0)
}
  0x74   : > { %s9581_s9 = scalar_lea.vmem %s9929_s5, 512  ;;  %s9651_s13 = smov [#allocation5]  }
  0x75   : > { %p9582_p2 = scmp.ne.s32.totalorder %s9929_s5, %s9581_s9  ;;  %s9586_s21 = sshll.u32 %s9651_s13, 4  ;;  %s9587_s21 = int_to_ptr.vmem [resolvable:$false] %s9586_s21 }
  0x76   : > { %s9588_s23 = scalar_lea.vmem %s9587_s21, 1024  ;;  %p9589_p10 = scmp.lt.s32.totalorder %s9929_s5, %s9587_s21 }
  0x77   : > { %p9584_p7 = pnand %p9582_p2, %p9570_p9  ;;  %p9590_p1 = scmp.lt.s32.totalorder %s9588_s23, %s9581_s9 }
  0x79   : > { %p9585_p8 = pneg %p9584_p7  ;;  %p9591_p4 = por %p9590_p1, %p9589_p10 }
  0x7b   : > { %p9592_p3 = pnand %p9591_p4, %p9585_p8 }
  0x7d   : > { %9595 = shalt.err (!%p9592_p3)
}
  0x7e   : > { %s11545_s30 = smov 8   ;;  %s11546_s28 = smov 128  }
  0x7f   : > { %9090 = dma.hbm_to_vmem [thread:$0]  (!%p9931_p5), %s9927_s7, 512, %s9929_s5, %s9935_s8, %s11546_s28, %s11546_s28, %s11545_s30  }
  0x80   : > { %p11547_p9 = scmp.ne.s32.totalorder %s11534_s1, 0 }
  0x81   : > { %s762_s13 = sand.u32 (!%p11547_p9), 1, %s9634_s2   ;;  %p11548_p1 = scmp.ne.s32.totalorder (!%p11547_p9), %s11542_s3, 0 }
  0x82   : > { %760 = sbr.rel (%p11547_p9) target bundleno = 3834 (0xefa), region = 120  ;;  %s7854_s21 = sshll.u32 (!%p11547_p9), %s762_s13, 5 }
  0x83   : > { %s763_s22 = scalar_lea.sflag (!%p11547_p9), [#allocation6], %s762_s13  ;;  %s766_s27 = scalar_lea.vmem (!%p11547_p9), [#allocation5], %s7854_s21 }
  0x87   : > { %9613 = dma.done.wait (%p11548_p1), %s763_s22, 512  }
  0x88   : > { %9615 = vsyncadd (%p11548_p1), %s763_s22, 4294966784  ;;  %p11549_p3 = scmp.eq.s32.totalorder %s9814_s26, 0 }
  0x8a   : > { %9617 = dma.done.wait (%p11549_p3), [#allocation8], 3328   ;;  %p11550_p4 = pmov %p11549_p3 }
  0x8b   : > { %p11551_p5 = pmov %p11549_p3 }
  0x8c   : > { %9619 = vsyncadd (%p11550_p4), [#allocation8], 4294963968 }
  0x8d   : > { %9621 = dma.done.wait (%p11551_p5), [#allocation11], 2304   ;;  %p11552_p11 = pmov %p11549_p3 }
  0x8e   : > { %p11553_p6 = pmov %p11549_p3 }
  0x8f   : > { %9623 = vsyncadd (%p11552_p11), [#allocation11], 4294964992 }
  0x90   : > { %9625 = dma.done.wait (%p11553_p6), [#allocation14], 1536   ;;  %p11554_p12 = pmov %p11549_p3 }
  0x91   : > { %v9652_v0 = vmov 0.0   ;;  %s11502_s1 = smov 3   ;;  %s11506_s7 = smov 2   ;;  %v9984_v1 = vld [vmem:[%s766_s27 + $0x18] sm:$0xff]  ;;  %v9988_v2 = vld [vmem:[%s766_s27 + $0x10] sm:$0xff]  ;;  %v9994_v3 = vld [vmem:[%s766_s27 + $0x8] sm:$0xff] }
  0x92   : > { %9627 = vsyncadd (%p11554_p12), [#allocation14], 4294965760  ;;  %9158 = vrot.lane.b32.xlu1 %v9652_v0, %s11502_s1  ;;  %9153 = vrot.lane.b32.xlu0 %v9652_v0, %s11506_s7  ;;  %v10000_v4 = vld [vmem:[%s766_s27] sm:$0xff]  ;;  %v918_v5 = vld [vmem:[#allocation7 + $0x10] sm:$0xff]  ;;  %vm953_vm0 = vcmask 261120   ;;  %s11508_s8 = smov 1  }
  0x93   : > { %8465 = vmatprep.mubr.msk.f32.mxu0 %vm953_vm0, %v918_v5  ;;  %v907_v6 = vld [vmem:[#allocation7] sm:$0xff]  ;;  %s11504_s3 = smov 127   ;;  %s11500_s5 = smov 126   ;;  %v9660_v7 = vmov 0   ;;  %vm944_vm1 = vcmask 15360   ;;  %vm1051_vm2 = vcmask 23552  }
  0x94   : > { %8476 = vmatprep.mubr.msk.f32.mxu1 %vm953_vm0, %v907_v6  ;;  %s11498_s25 = smov 125   ;;  %s11496_s29 = smov 124   ;;  %9218 = vset.pattern.permute.xlu0 %v9660_v7  ;;  %v919_v34 = vld [vmem:[#allocation7 + $0x18] sm:$0xff]  ;;  %v1142_v35 = vld [vmem:[#allocation7 + $0x20] sm:$0xff]  ;;  %v908_v41 = vld [vmem:[#allocation7 + $0x8] sm:$0xff]  ;;  %vm1160_vm3 = vcmask 7168  }
  0x95   : > { %9217 = vset.pattern.permute.xlu1 %v9660_v7  ;;  %s11555_s30 = sld [smem:[#allocation21_spill]]  ;;  %v1253_v43 = vld [vmem:[#allocation7 + $0x30] sm:$0xff]  ;;  %v1254_v53 = vld [vmem:[#allocation7 + $0x38] sm:$0xff]  ;;  %vm1373_vm4 = vcmask 1039360   ;;  %v1143_v59 = vld [vmem:[#allocation7 + $0x28] sm:$0xff]  ;;  %vm1484_vm5 = vcmask 1031168  }
  0x96   : > { %9163 = vrot.lane.b32.xlu1 %v9652_v0, %s11506_s7  ;;  %942 = vrot.lane.b32.xlu0 %v9984_v1, %s11506_s7  ;;  %v1466_v55 = vld [vmem:[#allocation7 + $0x50] sm:$0xff]  ;;  %v1339_v62 = vld [vmem:[#allocation7 + $0x40] sm:$0xff]  ;;  %vm1595_vm6 = vcmask 1022976   ;;  %vm1706_vm7 = vcmask 1014784   ;;  %vm1843_vm11 = vcmask 130048   ;;  %s11557_s9 = sld [smem:[#allocation23_spill]] }
  0x97   : > { %s11558_s22 = sld [smem:[#allocation25_spill]]  ;;  %s11562_s23 = smov 3   ;;  %vm7403_vm12 = vcmask 1040384   ;;  %vm9662_vm13 = vmmov 0   ;;  %vm7567_vm14 = vcmask 1041409   ;;  %vm7570_vm15 = vcmask 1042434  }
  0x98   : > { %s11564_s27 = smov 126   ;;  %s11567_s10 = sld [smem:[#allocation29_spill]] }
  0x99   : > { %s11571_s11 = sld [smem:[#allocation30_spill]]  ;;  %p852_p13 = scmp.lt.s32.totalorder %s9814_s26, 1 }
  0x9a   : > { %938 = vrot.lane.b32.xlu1 %v9988_v2, %s11506_s7  ;;  %1049 = vrot.lane.b32.xlu0 %v9984_v1, %s11502_s1  ;;  %s11572_s12 = sld [smem:[#allocation31_spill]] }
  0x9b   : > { %s11556_s28 = smov %s11555_s30  ;;  %v1799_v8 = vld [vmem:[%s11555_s30 + $0x8] sm:$0xff]  ;;  %s11565_s30 = smov 125  }
  0x9c   : > { %v1798_v9 = vld [vmem:[%s11556_s28] sm:$0xff]  ;;  %s11575_s21 = sld [smem:[#allocation36_spill]]  ;;  %s11582_s26 = smov (!%p852_p13, %s9814_s26), 1 }
  0x9d   : > { %s7860_s0 = sshll.u32 %s11582_s26, 2 }
  0x9e   : > { %1045 = vrot.lane.b32.xlu1 %v9988_v2, %s11502_s1  ;;  %934 = vrot.lane.b32.xlu0 %v9994_v3, %s11506_s7 }
  0xa2   : > { %9168 = vrot.lane.b32.xlu1 %v9652_v0, %s11502_s1  ;;  %930 = vrot.lane.b32.xlu0 %v10000_v4, %s11506_s7 }
  0xa6   : > { %1037 = vrot.lane.b32.xlu1 %v10000_v4, %s11502_s1  ;;  %1041 = vrot.lane.b32.xlu0 %v9994_v3, %s11502_s1  ;;  %s11566_s1 = smov 124  }
  0xaa   : > { %1158 = vrot.lane.b32.xlu1 %v9984_v1, %s11508_s8  ;;  %9173 = vrot.lane.b32.xlu0 %v9652_v0, %s11508_s8 }
  0xae   : > { %9178 = vrot.lane.b32.xlu1 %v9652_v0, %s11508_s8  ;;  %1154 = vrot.lane.b32.xlu0 %v9988_v2, %s11508_s8 }
  0xb2   : > { %1146 = vrot.lane.b32.xlu1 %v10000_v4, %s11508_s8  ;;  %1150 = vrot.lane.b32.xlu0 %v9994_v3, %s11508_s8 }
  0xb6   : > { %9183 = vrot.lane.b32.xlu1 %v9652_v0, %s11504_s3  ;;  %1369 = vrot.lane.b32.xlu0 %v9984_v1, %s11504_s3 }
  0xba   : > { %1480 = vrot.lane.b32.xlu1 %v9984_v1, %s11500_s5  ;;  %1365 = vrot.lane.b32.xlu0 %v9988_v2, %s11504_s3 }
  0xbe   : > { %1361 = vrot.lane.b32.xlu1 %v9994_v3, %s11504_s3  ;;  %9188 = vrot.lane.b32.xlu0 %v9652_v0, %s11500_s5 }
  0xc2   : > { %1476 = vrot.lane.b32.xlu1 %v9988_v2, %s11500_s5  ;;  %9193 = vrot.lane.b32.xlu0 %v9652_v0, %s11504_s3 }
  0xc6   : > { %1472 = vrot.lane.b32.xlu1 %v9994_v3, %s11500_s5  ;;  %1357 = vrot.lane.b32.xlu0 %v10000_v4, %s11504_s3 }
  0xca   : > { %1468 = vrot.lane.b32.xlu1 %v10000_v4, %s11500_s5  ;;  %9198 = vrot.lane.b32.xlu0 %v9652_v0, %s11500_s5 }
  0xce   : > { %9203 = vrot.lane.b32.xlu1 %v9652_v0, %s11498_s25  ;;  %1591 = vrot.lane.b32.xlu0 %v9984_v1, %s11498_s25 }
  0xd2   : > { %1702 = vrot.lane.b32.xlu1 %v9984_v1, %s11496_s29  ;;  %1587 = vrot.lane.b32.xlu0 %v9988_v2, %s11498_s25 }
  0xd6   : > { %1583 = vrot.lane.b32.xlu1 %v9994_v3, %s11498_s25  ;;  %9208 = vrot.lane.b32.xlu0 %v9652_v0, %s11496_s29 }
  0xda   : > { %1698 = vrot.lane.b32.xlu1 %v9988_v2, %s11496_s29  ;;  %9213 = vrot.lane.b32.xlu0 %v9652_v0, %s11498_s25 }
  0xde   : > { %1694 = vrot.lane.b32.xlu1 %v9994_v3, %s11496_s29  ;;  %1579 = vrot.lane.b32.xlu0 %v10000_v4, %s11498_s25  ;;  %s11559_s25 = sld [smem:[#allocation27_spill]] }
  0xe2   : > { %1690 = vrot.lane.b32.xlu1 %v10000_v4, %s11496_s29  ;;  %1696 = vrot.lane.b32.xlu0 %v9652_v0, %s11496_s29 }
  0xe6   : > { %1807 = vperm.xlu1 %9217, %v1799_v8   ;;  %1692 = vrot.lane.b32.xlu0 %v9652_v0, %s11496_s29  ;;  %s11560_s29 = sld [smem:[#allocation26_spill]] }
  0xea   : > { %1802 = vperm.xlu0 %9218, %v1798_v9   ;;  %9220 = vrot.lane.b32.xlu1 %v9652_v0, %s11508_s8 }
  0xec   : > { %s11561_s13 = smov %s11560_s29 }
  0xee   : > { %9225 = vrot.lane.b32.xlu1 %v9652_v0, %s11506_s7 }
  0xf2   : > { %9230 = vrot.lane.b32.xlu1 %v9652_v0, %s11504_s3 }
 0x104   : > { %v9159_v10 = vpop.permute.xlu1 %9158  ;;  %v9154_v11 = vpop.permute.xlu0 %9153 }
 0x105   : > { %v9155_v12 = vunpack.i.l.bf16 %v9154_v11  ;;  %v9156_v16 = vunpack.i.h.bf16 %v9154_v11  ;;  %v9160_v17 = vunpack.i.l.bf16 %v9159_v10  ;;  %v9161_v22 = vunpack.i.h.bf16 %v9159_v10 }
 0x108   : > { %v9164_v13 = vpop.permute.xlu1 %9163  ;;  %v943_v14 = vpop.permute.xlu0 %942 }
 0x109   : > { %v948_v15 = vsel %vm944_vm1, %v9155_v12, %v943_v14  ;;  %v9165_v23 = vunpack.i.l.bf16 %v9164_v13  ;;  %v9166_v28 = vunpack.i.h.bf16 %v9164_v13 }
 0x10a   : > { %8457 = vmatprep.subr.mxu0 %v948_v15 }
 0x10b   : > { %8458 = vmatpush3.msra.mxu0 %v948_v15 }
 0x10c   : > { %v939_v18 = vpop.permute.xlu1 %938  ;;  %v1050_v19 = vpop.permute.xlu0 %1049 }
 0x10d   : > { %v947_v20 = vsel %vm944_vm1, %v9156_v16, %v939_v18  ;;  %v1055_v21 = vsel %vm1051_vm2, %v9160_v17, %v1050_v19 }
 0x10e   : > { %8459 = vmatprep.subr.mxu0 %v947_v20  ;;  %8468 = vmatprep.subr.mxu1 %v1055_v21 }
 0x10f   : > { %8460 = vmatpush3.msra.mxu0 %v947_v20  ;;  %8469 = vmatpush3.msra.mxu1 %v1055_v21 }
 0x110   : > { %v1046_v24 = vpop.permute.xlu1 %1045  ;;  %v935_v25 = vpop.permute.xlu0 %934 }
 0x111   : > { %v1054_v26 = vsel %vm1051_vm2, %v9161_v22, %v1046_v24  ;;  %v946_v27 = vsel %vm944_vm1, %v9165_v23, %v935_v25  ;;  %v1340_v23 = vld [vmem:[#allocation7 + $0x48] sm:$0xff]  ;;  %v1577_v24 = vld [vmem:[#allocation7 + $0x60] sm:$0xff] }
 0x112   : > { %8470 = vmatprep.subr.mxu1 %v1054_v26  ;;  %8461 = vmatprep.subr.mxu0 %v946_v27 }
 0x113   : > { %8471 = vmatpush3.msra.mxu1 %v1054_v26  ;;  %8462 = vmatpush3.msra.mxu0 %v946_v27 }
 0x114   : > { %v9169_v29 = vpop.permute.xlu1 %9168  ;;  %v931_v30 = vpop.permute.xlu0 %930 }
 0x115   : > { %v9171_v31 = vunpack.i.h.bf16 %v9169_v29  ;;  %v9170_v32 = vunpack.i.l.bf16 %v9169_v29  ;;  %v945_v33 = vsel %vm944_vm1, %v9166_v28, %v931_v30 }
 0x116   : > { %8463 = vmatprep.subr.mxu0 %v945_v33 }
 0x117   : > { %8464 = vmatpush3.msra.mxu0 %v945_v33 }
 0x118   : > { %v1038_v36 = vpop.permute.xlu1 %1037  ;;  %v1042_v37 = vpop.permute.xlu0 %1041  ;;  %8466 = vmatmul.mubr.msk.f32.vlgmr.msra.gmra.mxu0 %vm953_vm0, %v919_v34 }
 0x119   : > { %v1053_v38 = vsel %vm1051_vm2, %v9170_v32, %v1042_v37  ;;  %v1052_v39 = vsel %vm1051_vm2, %v9171_v31, %v1038_v36  ;;  %8487 = vmatprep.mubr.msk.f32.mxu0 %vm953_vm0, %v1142_v35  ;;  %v1467_v35 = vld [vmem:[#allocation7 + $0x58] sm:$0xff]  ;;  %v1688_v37 = vld [vmem:[#allocation7 + $0x70] sm:$0xff] }
 0x11a   : > { %8472 = vmatprep.subr.mxu1 %v1053_v38 }
 0x11b   : > { %8473 = vmatpush3.msra.mxu1 %v1053_v38 }
 0x11c   : > { %v1159_v40 = vpop.permute.xlu1 %1158  ;;  %8474 = vmatprep.subr.mxu1 %v1052_v39  ;;  %v9174_v42 = vpop.permute.xlu0 %9173 }
 0x11d   : > { %v9175_v44 = vunpack.i.l.bf16 %v9174_v42  ;;  %8475 = vmatpush3.msra.mxu1 %v1052_v39  ;;  %v9176_v45 = vunpack.i.h.bf16 %v9174_v42 }
 0x11e   : > { %8490 = vmatprep.subr.mxu1 %v9984_v1  ;;  %8477 = vmatmul.mubr.msk.f32.vlgmr.msra.gmra.mxu1 %vm953_vm0, %v908_v41 }
 0x11f   : > { %v1164_v47 = vsel %vm1160_vm3, %v9175_v44, %v1159_v40  ;;  %8491 = vmatpush3.msra.mxu1 %v9984_v1  ;;  %8498 = vmatprep.mubr.msk.f32.mxu1 %vm953_vm0, %v1253_v43 }
 0x120   : > { %v9179_v46 = vpop.permute.xlu1 %9178  ;;  %v1155_v48 = vpop.permute.xlu0 %1154  ;;  %8479 = vmatprep.subr.mxu0 %v1164_v47  ;;  %8492 = vmatprep.subr.mxu1 %v9988_v2 }
 0x121   : > { %v9181_v49 = vunpack.i.h.bf16 %v9179_v46  ;;  %v9180_v50 = vunpack.i.l.bf16 %v9179_v46  ;;  %8480 = vmatpush3.msra.mxu0 %v1164_v47  ;;  %v1163_v51 = vsel %vm1160_vm3, %v9176_v45, %v1155_v48  ;;  %8493 = vmatpush3.msra.mxu1 %v9988_v2 }
 0x122   : > { %8481 = vmatprep.subr.mxu0 %v1163_v51  ;;  %8494 = vmatprep.subr.mxu1 %v9994_v3 }
 0x123   : > { %8482 = vmatpush3.msra.mxu0 %v1163_v51  ;;  %8495 = vmatpush3.msra.mxu1 %v9994_v3 }
 0x124   : > { %v1147_v52 = vpop.permute.xlu1 %1146  ;;  %v1151_v54 = vpop.permute.xlu0 %1150  ;;  %8496 = vmatprep.subr.mxu1 %v10000_v4 }
 0x125   : > { %v1162_v56 = vsel %vm1160_vm3, %v9180_v50, %v1151_v54  ;;  %v1161_v57 = vsel %vm1160_vm3, %v9181_v49, %v1147_v52  ;;  %8497 = vmatpush3.msra.mxu1 %v10000_v4 }
 0x126   : > { %8483 = vmatprep.subr.mxu0 %v1162_v56  ;;  %8499 = vmatmul.mubr.msk.f32.vlgmr.msra.gmra.mxu1 %vm953_vm0, %v1254_v53 }
 0x127   : > { %8484 = vmatpush3.msra.mxu0 %v1162_v56  ;;  %8520 = vmatprep.mubr.msk.f32.mxu1 %vm953_vm0, %v1466_v55  ;;  %v1578_v55 = vld [vmem:[#allocation7 + $0x68] sm:$0xff] }
 0x128   : > { %v9184_v58 = vpop.permute.xlu1 %9183  ;;  %v1370_v61 = vpop.permute.xlu0 %1369  ;;  %8485 = vmatprep.subr.mxu0 %v1161_v57 }
 0x129   : > { %v9185_v60 = vunpack.i.l.bf16 %v9184_v58  ;;  %v9186_v63 = vunpack.i.h.bf16 %v9184_v58  ;;  %8486 = vmatpush3.msra.mxu0 %v1161_v57 }
 0x12a   : > { %8488 = vmatmul.mubr.msk.f32.vlgmr.msra.gmra.mxu0 %vm953_vm0, %v1143_v59 }
 0x12b   : > { %v1377_v5 = vsel %vm1373_vm4, %v1370_v61, %v9185_v60  ;;  %8509 = vmatprep.mubr.msk.f32.mxu0 %vm953_vm0, %v1339_v62  ;;  %v1689_v61 = vld [vmem:[#allocation7 + $0x78] sm:$0xff] }
 0x12c   : > { %v1481_v6 = vpop.permute.xlu1 %1480  ;;  %8501 = vmatprep.subr.mxu0 %v1377_v5  ;;  %v1366_v7 = vpop.permute.xlu0 %1365 }
 0x12d   : > { %8502 = vmatpush3.msra.mxu0 %v1377_v5  ;;  %v1376_v8 = vsel %vm1373_vm4, %v1366_v7, %v9186_v63 }
 0x12e   : > { %8503 = vmatprep.subr.mxu0 %v1376_v8 }
 0x12f   : > { %8504 = vmatpush3.msra.mxu0 %v1376_v8 }
 0x130   : > { %v1362_v9 = vpop.permute.xlu1 %1361  ;;  %v9189_v10 = vpop.permute.xlu0 %9188 }
 0x131   : > { %v9191_v11 = vunpack.i.h.bf16 %v9189_v10  ;;  %v9190_v12 = vunpack.i.l.bf16 %v9189_v10 }
 0x133   : > { %v1488_v14 = vsel %vm1484_vm5, %v1481_v6, %v9190_v12 }
 0x134   : > { %v1477_v13 = vpop.permute.xlu1 %1476  ;;  %v9194_v15 = vpop.permute.xlu0 %9193  ;;  %8512 = vmatprep.subr.mxu1 %v1488_v14 }
 0x135   : > { %v1487_v16 = vsel %vm1484_vm5, %v1477_v13, %v9191_v11  ;;  %v9195_v17 = vunpack.i.l.bf16 %v9194_v15  ;;  %8513 = vmatpush3.msra.mxu1 %v1488_v14  ;;  %v9196_v18 = vunpack.i.h.bf16 %v9194_v15 }
 0x136   : > { %8514 = vmatprep.subr.mxu1 %v1487_v16 }
 0x137   : > { %8515 = vmatpush3.msra.mxu1 %v1487_v16  ;;  %v1375_v20 = vsel %vm1373_vm4, %v1362_v9, %v9195_v17  ;;  %v888_v17 = vlaneseq }
 0x138   : > { %v1473_v19 = vpop.permute.xlu1 %1472  ;;  %v1358_v21 = vpop.permute.xlu0 %1357  ;;  %8505 = vmatprep.subr.mxu0 %v1375_v20 }
 0x139   : > { %8506 = vmatpush3.msra.mxu0 %v1375_v20  ;;  %v1374_v22 = vsel %vm1373_vm4, %v1358_v21, %v9196_v18 }
 0x13a   : > { %8507 = vmatprep.subr.mxu0 %v1374_v22 }
 0x13b   : > { %8508 = vmatpush3.msra.mxu0 %v1374_v22 }
 0x13c   : > { %v1469_v25 = vpop.permute.xlu1 %1468  ;;  %v9199_v26 = vpop.permute.xlu0 %9198  ;;  %8510 = vmatmul.mubr.msk.f32.vlgmr.msra.gmra.mxu0 %vm953_vm0, %v1340_v23  ;;  %v889_v23 = vand.u32 127, %v888_v17 }
 0x13d   : > { %v9201_v27 = vunpack.i.h.bf16 %v9199_v26  ;;  %v9200_v28 = vunpack.i.l.bf16 %v9199_v26  ;;  %8531 = vmatprep.mubr.msk.f32.mxu0 %vm953_vm0, %v1577_v24 }
 0x13e   : > { %vm902_vm8 = vcmp.ge.s32.totalorder %v889_v23, 4  ;;  %vm903_vm9 = vcmp.lt.s32.totalorder %v889_v23, 20 }
 0x13f   : > { %v1486_v30 = vsel %vm1484_vm5, %v1473_v19, %v9200_v28  ;;  %v1485_v34 = vsel %vm1484_vm5, %v1469_v25, %v9201_v27  ;;  %vm904_vm10 = vmand %vm902_vm8, %vm903_vm9 }
 0x140   : > { %v9204_v29 = vpop.permute.xlu1 %9203  ;;  %v1592_v32 = vpop.permute.xlu0 %1591  ;;  %8516 = vmatprep.subr.mxu1 %v1486_v30 }
 0x141   : > { %v9205_v31 = vunpack.i.l.bf16 %v9204_v29  ;;  %v9206_v33 = vunpack.i.h.bf16 %v9204_v29  ;;  %8517 = vmatpush3.msra.mxu1 %v1486_v30 }
 0x142   : > { %8518 = vmatprep.subr.mxu1 %v1485_v34 }
 0x143   : > { %v1599_v36 = vsel %vm1595_vm6, %v1592_v32, %v9205_v31  ;;  %8519 = vmatpush3.msra.mxu1 %v1485_v34 }
 0x144   : > { %v1703_v38 = vpop.permute.xlu1 %1702  ;;  %8523 = vmatprep.subr.mxu0 %v1599_v36  ;;  %v1588_v39 = vpop.permute.xlu0 %1587  ;;  %8521 = vmatmul.mubr.msk.f32.vlgmr.msra.gmra.mxu1 %vm953_vm0, %v1467_v35 }
 0x145   : > { %8524 = vmatpush3.msra.mxu0 %v1599_v36  ;;  %v1598_v40 = vsel %vm1595_vm6, %v1588_v39, %v9206_v33  ;;  %8542 = vmatprep.mubr.msk.f32.mxu1 %vm953_vm0, %v1688_v37  ;;  %v1818_v36 = vld [vmem:[#allocation9] sm:$0xff]  ;;  %v10139_v39 = vsel %vm904_vm10, 1.0, %v9652_v0 }
 0x146   : > { %8525 = vmatprep.subr.mxu0 %v1598_v40 }
 0x147   : > { %8526 = vmatpush3.msra.mxu0 %v1598_v40 }
 0x148   : > { %v1584_v41 = vpop.permute.xlu1 %1583  ;;  %v9209_v42 = vpop.permute.xlu0 %9208 }
 0x149   : > { %v9211_v43 = vunpack.i.h.bf16 %v9209_v42  ;;  %v9210_v44 = vunpack.i.l.bf16 %v9209_v42  ;;  %v1825_v42 = vld [vmem:[#allocation9 + $0x10] sm:$0xff] }
 0x14b   : > { %v1710_v46 = vsel %vm1706_vm7, %v1703_v38, %v9210_v44 }
 0x14c   : > { %v1699_v45 = vpop.permute.xlu1 %1698  ;;  %v9214_v47 = vpop.permute.xlu0 %9213  ;;  %8534 = vmatprep.subr.mxu1 %v1710_v46 }
 0x14d   : > { %v1709_v48 = vsel %vm1706_vm7, %v1699_v45, %v9211_v43  ;;  %v9215_v49 = vunpack.i.l.bf16 %v9214_v47  ;;  %8535 = vmatpush3.msra.mxu1 %v1710_v46  ;;  %v9216_v50 = vunpack.i.h.bf16 %v9214_v47  ;;  %v2309_v46 = vld [vmem:[%s11557_s9 + $0x8] sm:$0xff]  ;;  %v2308_v47 = vld [vmem:[%s11557_s9] sm:$0xff]  ;;  %s11568_s9 = smov 1  }
 0x14e   : > { %8536 = vmatprep.subr.mxu1 %v1709_v48 }
 0x14f   : > { %8537 = vmatpush3.msra.mxu1 %v1709_v48  ;;  %v1597_v51 = vsel %vm1595_vm6, %v1584_v41, %v9215_v49 }
 0x150   : > { %v1580_v52 = vpop.permute.xlu0 %1579  ;;  %8527 = vmatprep.subr.mxu0 %v1597_v51  ;;  %v1695_v53 = vpop.permute.xlu1 %1694 }
 0x151   : > { %8528 = vmatpush3.msra.mxu0 %v1597_v51  ;;  %v1596_v54 = vsel %vm1595_vm6, %v1580_v52, %v9216_v50 }
 0x152   : > { %8529 = vmatprep.subr.mxu0 %v1596_v54 }
 0x153   : > { %8530 = vmatpush3.msra.mxu0 %v1596_v54 }
 0x154   : > { %v1697_v56 = vpop.permute.xlu0 %1696  ;;  %8532 = vmatmul.mubr.msk.f32.vlgmr.msra.gmra.mxu0 %vm953_vm0, %v1578_v55  ;;  %v1691_v58 = vpop.permute.xlu1 %1690 }
 0x155   : > { %v1708_v57 = vsel %vm1706_vm7, %v1695_v53, %v1697_v56  ;;  %8549 = vmatprep.mubr.msk.f32.mxu0 %vm1843_vm11, %v1825_v42 }
 0x156   : > { %8538 = vmatprep.subr.mxu1 %v1708_v57 }
 0x157   : > { %8539 = vmatpush3.msra.mxu1 %v1708_v57 }
 0x158   : > { %v1693_v59 = vpop.permute.xlu0 %1692 }
 0x159   : > { %v1707_v60 = vsel %vm1706_vm7, %v1691_v58, %v1693_v59 }
 0x15a   : > { %8540 = vmatprep.subr.mxu1 %v1707_v60 }
 0x15b   : > { %8541 = vmatpush3.msra.mxu1 %v1707_v60 }
 0x15c   : > { %8543 = vmatmul.mubr.msk.f32.vlgmr.msra.gmra.mxu1 %vm953_vm0, %v1689_v61 }
 0x15d   : > { %8556 = vmatprep.mubr.msk.f32.mxu1 %vm1843_vm11, %v1818_v36 }
 0x161   : > { %v1808_v31 = vpop.permute.xlu1 %1807 }
 0x165   : > { %v1803_v35 = vpop.permute.xlu0 %1802  ;;  %v9221_v48 = vpop.permute.xlu1 %9220 }
 0x166   : > { %v9222_v52 = vunpack.i.l.bf16 %v9221_v48 }
 0x169   : > { %v9226_v49 = vpop.permute.xlu1 %9225 }
 0x16a   : > { %v9227_v51 = vunpack.i.l.bf16 %v9226_v49  ;;  %v9228_v57 = vunpack.i.h.bf16 %v9226_v49 }
 0x16d   : > { %v9231_v50 = vpop.permute.xlu1 %9230 }
 0x16e   : > { %v9232_v58 = vunpack.i.l.bf16 %v9231_v50 }
 0x1d8   : > { %v8467_v62 = vpop.f32.mrf.mxu0 }
 0x1da   : > { %v1026_v63 = vpop.f32.mrf.mxu0 }
 0x1de   : > { %v8478_v5 = vpop.f32.mrf.mxu1 }
 0x1df   : > { %v1138_v8 = vadd.f32 %v8478_v5, %v8467_v62  ;;  %v1819_v62 = vld [vmem:[#allocation9 + $0x8] sm:$0xff]  ;;  %v9223_v5 = vunpack.i.h.bf16 %v9221_v48 }
 0x1e0   : > { %v1132_v6 = vpop.f32.mrf.mxu1 }
 0x1e1   : > { %v1133_v9 = vadd.f32 %v1132_v6, %v1026_v63  ;;  %v2105_v63 = vld [vmem:[#allocation9 + $0x30] sm:$0xff] }
 0x1e6   : > { %v8500_v11 = vpop.f32.mrf.mxu1 }
 0x1e8   : > { %v1327_v14 = vpop.f32.mrf.mxu1 }
 0x1ea   : > { %v8489_v7 = vpop.f32.mrf.mxu0 }
 0x1eb   : > { %v1251_v12 = vadd.f32 %v8489_v7, %v1138_v8 }
 0x1ec   : > { %v1241_v10 = vpop.f32.mrf.mxu0 }
 0x1ed   : > { %v1250_v13 = vadd.f32 %v1241_v10, %v1133_v9  ;;  %v1337_v16 = vadd.f32 %v8500_v11, %v1251_v12  ;;  %v1826_v9 = vld [vmem:[#allocation9 + $0x18] sm:$0xff]  ;;  %v2019_v10 = vld [vmem:[#allocation9 + $0x20] sm:$0xff]  ;;  %v2020_v12 = vld [vmem:[#allocation9 + $0x28] sm:$0xff] }
 0x1ef   : > { %v1336_v18 = vadd.f32 %v1327_v14, %v1250_v13  ;;  %v2211_v14 = vld [vmem:[#allocation9 + $0x40] sm:$0xff] }
 0x1fc   : > { %v8511_v15 = vpop.f32.mrf.mxu0 }
 0x1fd   : > { %v1464_v21 = vadd.f32 %v8511_v15, %v1337_v16  ;;  %v9233_v15 = vunpack.i.h.bf16 %v9231_v50 }
 0x1fe   : > { %v1454_v19 = vpop.f32.mrf.mxu0 }
 0x1ff   : > { %v1463_v24 = vadd.f32 %v1454_v19, %v1336_v18 }
 0x204   : > { %v8522_v20 = vpop.f32.mrf.mxu1 }
 0x205   : > { %v1575_v26 = vadd.f32 %v8522_v20, %v1464_v21  ;;  %v2106_v20 = vld [vmem:[#allocation9 + $0x38] sm:$0xff] }
 0x206   : > { %v1565_v25 = vpop.f32.mrf.mxu1 }
 0x207   : > { %v1574_v28 = vadd.f32 %v1565_v25, %v1463_v24  ;;  %v2212_v24 = vld [vmem:[#allocation9 + $0x48] sm:$0xff] }
 0x214   : > { %v8533_v22 = vpop.f32.mrf.mxu0 }
 0x215   : > { %v1686_v29 = vadd.f32 %v8533_v22, %v1575_v26 }
 0x216   : > { %v1676_v27 = vpop.f32.mrf.mxu0 }
 0x217   : > { %v1685_v32 = vadd.f32 %v1676_v27, %v1574_v28 }
 0x21c   : > { %v8544_v30 = vpop.f32.mrf.mxu1 }
 0x21d   : > { %v1797_v33 = vadd.f32 %v8544_v30, %v1686_v29 }
 0x21e   : > { %v1787_v34 = vpop.f32.mrf.mxu1 }
 0x21f   : > { %v1811_v37 = vadd.f32 %v1808_v31, %v1797_v33  ;;  %v1796_v38 = vadd.f32 %v1787_v34, %v1685_v32 }
 0x221   : > { %v1813_v40 = vmax.f32 %v1811_v37, 0.0  ;;  %v1810_v41 = vadd.f32 %v1803_v35, %v1796_v38  ;;  %v2335_v38 = vld [vmem:[#allocation10 + $0x10] sm:$0xff] }
 0x223   : > { %v1815_v43 = vmul.f32 %v10139_v39, %v1813_v40  ;;  %v1812_v44 = vmax.f32 %v1810_v41, 0.0  ;;  %v2328_v40 = vld [vmem:[#allocation10] sm:$0xff] }
 0x225   : > { %1931 = vrot.lane.b32.xlu0 %v1815_v43, %s11506_s7  ;;  %1837 = vrot.lane.b32.xlu1 %v1815_v43, %s11508_s8  ;;  %v1814_v45 = vmul.f32 %v10139_v39, %v1812_v44 }
 0x229   : > { %2119 = vrot.lane.b32.xlu0 %v1815_v43, %s11504_s3  ;;  %1927 = vrot.lane.b32.xlu1 %v1814_v45, %s11506_s7 }
 0x22d   : > { %2217 = vrot.lane.b32.xlu1 %v1815_v43, %s11500_s5  ;;  %1833 = vrot.lane.b32.xlu0 %v1814_v45, %s11508_s8 }
 0x231   : > { %2213 = vrot.lane.b32.xlu1 %v1814_v45, %s11500_s5  ;;  %2219 = vrot.lane.b32.xlu0 %v9652_v0, %s11500_s5 }
 0x235   : > { %2317 = vperm.xlu1 %9217, %v2309_v46   ;;  %2115 = vrot.lane.b32.xlu0 %v1814_v45, %s11504_s3 }
 0x239   : > { %2215 = vrot.lane.b32.xlu0 %v9652_v0, %s11500_s5  ;;  %9235 = vrot.lane.b32.xlu1 %v9652_v0, %s11508_s8  ;;  %s11563_s5 = sld [smem:[#allocation28_spill]] }
 0x23d   : > { %2312 = vperm.xlu0 %9218, %v2308_v47   ;;  %2532 = vrot.lane.b32.xlu1 %v9652_v0, %s11504_s3 }
 0x297   : > { %v1932_v53 = vpop.permute.xlu0 %1931  ;;  %v1838_v54 = vpop.permute.xlu1 %1837 }
 0x298   : > { %v1840_v55 = vsel %vm1160_vm3, %v9222_v52, %v1838_v54  ;;  %v1934_v56 = vsel %vm944_vm1, %v9227_v51, %v1932_v53  ;;  %v2336_v54 = vld [vmem:[#allocation10 + $0x18] sm:$0xff] }
 0x299   : > { %8545 = vmatprep.subr.mxu0 %v1840_v55  ;;  %8552 = vmatprep.subr.mxu1 %v1934_v56 }
 0x29a   : > { %8546 = vmatpush3.msra.mxu0 %v1840_v55  ;;  %8553 = vmatpush3.msra.mxu1 %v1934_v56  ;;  %v2516_v55 = vld [vmem:[#allocation10 + $0x20] sm:$0xff]  ;;  %v2621_v56 = vld [vmem:[%s11558_s22] sm:$0xff] }
 0x29b   : > { %v2120_v59 = vpop.permute.xlu0 %2119  ;;  %v1928_v60 = vpop.permute.xlu1 %1927 }
 0x29c   : > { %v1933_v61 = vsel %vm944_vm1, %v9228_v57, %v1928_v60  ;;  %v2124_v6 = vsel %vm1373_vm4, %v2120_v59, %v9232_v58  ;;  %v2622_v57 = vld [vmem:[%s11558_s22 + $0x8] sm:$0xff]  ;;  %v2643_v58 = vld [vmem:[%s11559_s25] sm:$0xff] }
 0x29d   : > { %8554 = vmatprep.subr.mxu1 %v1933_v61  ;;  %v2644_v59 = vld [vmem:[%s11559_s25 + $0x8] sm:$0xff] }
 0x29e   : > { %8555 = vmatpush3.msra.mxu1 %v1933_v61 }
 0x29f   : > { %8566 = vmatprep.subr.mxu1 %v2124_v6  ;;  %v1834_v7 = vpop.permute.xlu0 %1833  ;;  %8557 = vmatmul.mubr.msk.f32.vlgmr.msra.gmra.mxu1 %vm1843_vm11, %v1819_v62  ;;  %v2218_v13 = vpop.permute.xlu1 %2217 }
 0x2a0   : > { %8567 = vmatpush3.msra.mxu1 %v2124_v6  ;;  %v1839_v8 = vsel %vm1160_vm3, %v9223_v5, %v1834_v7  ;;  %8570 = vmatprep.mubr.msk.f32.mxu1 %vm1843_vm11, %v2105_v63 }
 0x2a1   : > { %8547 = vmatprep.subr.mxu0 %v1839_v8 }
 0x2a2   : > { %8548 = vmatpush3.msra.mxu0 %v1839_v8 }
 0x2a3   : > { %8550 = vmatmul.mubr.msk.f32.vlgmr.msra.gmra.mxu0 %vm1843_vm11, %v1826_v9  ;;  %8559 = vmatprep.subr.mxu0 %v1815_v43  ;;  %v2220_v11 = vpop.permute.xlu0 %2219  ;;  %v2214_v21 = vpop.permute.xlu1 %2213  ;;  %v2329_v9 = vld [vmem:[#allocation10 + $0x8] sm:$0xff] }
 0x2a4   : > { %8560 = vmatpush3.msra.mxu0 %v1815_v43  ;;  %8563 = vmatprep.mubr.msk.f32.mxu0 %vm1843_vm11, %v2019_v10  ;;  %v2222_v16 = vsel %vm1484_vm5, %v2218_v13, %v2220_v11 }
 0x2a5   : > { %8561 = vmatprep.subr.mxu0 %v1814_v45 }
 0x2a6   : > { %8562 = vmatpush3.msra.mxu0 %v1814_v45 }
 0x2a7   : > { %8564 = vmatmul.mubr.msk.f32.vlgmr.msra.gmra.mxu0 %vm1843_vm11, %v2020_v12  ;;  %8573 = vmatprep.subr.mxu0 %v2222_v16  ;;  %v2116_v18 = vpop.permute.xlu0 %2115  ;;  %v2637_v12 = vld [vmem:[%s11560_s29] sm:$0xff]  ;;  %s11570_s29 = smov 127  }
 0x2a8   : > { %8574 = vmatpush3.msra.mxu0 %v2222_v16  ;;  %v2123_v19 = vsel %vm1373_vm4, %v2116_v18, %v9233_v15  ;;  %8577 = vmatprep.mubr.msk.f32.mxu0 %vm1843_vm11, %v2211_v14  ;;  %v2517_v16 = vld [vmem:[#allocation10 + $0x28] sm:$0xff] }
 0x2a9   : > { %8568 = vmatprep.subr.mxu1 %v2123_v19 }
 0x2aa   : > { %8569 = vmatpush3.msra.mxu1 %v2123_v19 }
 0x2ab   : > { %8571 = vmatmul.mubr.msk.f32.vlgmr.msra.gmra.mxu1 %vm1843_vm11, %v2106_v20  ;;  %v2216_v22 = vpop.permute.xlu0 %2215 }
 0x2ac   : > { %v2221_v23 = vsel %vm1484_vm5, %v2214_v21, %v2216_v22  ;;  %8584 = vmatprep.mubr.msk.f32.mxu1 %vm1843_vm11, %v2335_v38 }
 0x2ad   : > { %8575 = vmatprep.subr.mxu0 %v2221_v23 }
 0x2ae   : > { %8576 = vmatpush3.msra.mxu0 %v2221_v23 }
 0x2af   : > { %8578 = vmatmul.mubr.msk.f32.vlgmr.msra.gmra.mxu0 %vm1843_vm11, %v2212_v24 }
 0x2b0   : > { %8591 = vmatprep.mubr.msk.f32.mxu0 %vm1843_vm11, %v2328_v40  ;;  %v2318_v44 = vpop.permute.xlu1 %2317 }
 0x2b4   : > { %v9236_v60 = vpop.permute.xlu1 %9235 }
 0x2b5   : > { %v9237_v62 = vunpack.i.l.bf16 %v9236_v60  ;;  %v9238_v5 = vunpack.i.h.bf16 %v9236_v60 }
 0x2b8   : > { %v2313_v48 = vpop.permute.xlu0 %2312  ;;  %v2533_v61 = vpop.permute.xlu1 %2532 }
 0x35f   : > { %v8558_v26 = vpop.f32.mrf.mxu1 }
 0x361   : > { %v2009_v29 = vpop.f32.mrf.mxu1 }
 0x363   : > { %v8551_v25 = vpop.f32.mrf.mxu0 }
 0x364   : > { %v2015_v28 = vadd.f32 %v8558_v26, %v8551_v25 }
 0x365   : > { %v1916_v27 = vpop.f32.mrf.mxu0 }
 0x366   : > { %v2010_v31 = vadd.f32 %v2009_v29, %v1916_v27 }
 0x367   : > { %v8565_v30 = vpop.f32.mrf.mxu0 }
 0x368   : > { %v2103_v32 = vadd.f32 %v8565_v30, %v2015_v28  ;;  %v7896_v30 = vld [vmem:[%s11563_s5 + $0x20] sm:$0xff] }
 0x369   : > { %v2093_v33 = vpop.f32.mrf.mxu0 }
 0x36a   : > { %v2102_v36 = vadd.f32 %v2093_v33, %v2010_v31 }
 0x36b   : > { %v8572_v34 = vpop.f32.mrf.mxu1 }
 0x36c   : > { %v2209_v37 = vadd.f32 %v8572_v34, %v2103_v32 }
 0x36d   : > { %v2199_v35 = vpop.f32.mrf.mxu1 }
 0x36e   : > { %v2208_v42 = vadd.f32 %v2199_v35, %v2102_v36 }
 0x36f   : > { %v8579_v41 = vpop.f32.mrf.mxu0 }
 0x370   : > { %v2307_v43 = vadd.f32 %v8579_v41, %v2209_v37 }
 0x371   : > { %v2297_v45 = vpop.f32.mrf.mxu0 }
 0x372   : > { %v2321_v46 = vadd.f32 %v2318_v44, %v2307_v43  ;;  %v2306_v47 = vadd.f32 %v2297_v45, %v2208_v42  ;;  %v2742_v42 = vld [vmem:[%s11563_s5] sm:$0xff]  ;;  %v3684_v44 = vld [vmem:[%s11567_s10 + $0x18] sm:$0xff]  ;;  %v3682_v45 = vld [vmem:[%s11567_s10 + $0x8] sm:$0xff] }
 0x374   : > { %v2323_v49 = vmax.f32 %v2321_v46, 0.0  ;;  %v2320_v50 = vadd.f32 %v2313_v48, %v2306_v47  ;;  %v3683_v46 = vld [vmem:[%s11567_s10 + $0x10] sm:$0xff]  ;;  %v3681_v47 = vld [vmem:[%s11567_s10] sm:$0xff] }
 0x376   : > { %v2325_v51 = vmul.f32 %v10139_v39, %v2323_v49  ;;  %v2322_v52 = vmax.f32 %v2320_v50, 0.0 }
 0x378   : > { %v2324_v53 = vmul.f32 %v10139_v39, %v2322_v52  ;;  %2428 = vrot.lane.b32.xlu0 %v2325_v51, %s11508_s8  ;;  %8580 = vmatprep.subr.mxu1 %v2325_v51 }
 0x379   : > { %8581 = vmatpush3.msra.mxu1 %v2325_v51 }
 0x37a   : > { %2424 = vrot.lane.b32.xlu1 %v2324_v53, %s11508_s8  ;;  %8582 = vmatprep.subr.mxu1 %v2324_v53 }
 0x37b   : > { %8583 = vmatpush3.msra.mxu1 %v2324_v53 }
 0x37c   : > { %2530 = vrot.lane.b32.xlu0 %v2325_v51, %s11504_s3  ;;  %8585 = vmatmul.mubr.msk.f32.vlgmr.msra.gmra.mxu1 %vm1843_vm11, %v2336_v54 }
 0x37d   : > { %8598 = vmatprep.mubr.msk.f32.mxu1 %vm1843_vm11, %v2516_v55 }
 0x37e   : > { %2528 = vrot.lane.b32.xlu1 %v9652_v0, %s11504_s3 }
 0x380   : > { %2526 = vrot.lane.b32.xlu0 %v2324_v53, %s11504_s3 }
 0x382   : > { %2625 = vperm.xlu1 %9217, %v2621_v56  }
 0x384   : > { %2630 = vperm.xlu0 %9218, %v2622_v57  }
 0x386   : > { %2647 = vperm.xlu1 %9217, %v2643_v58  }
 0x388   : > { %2652 = vperm.xlu0 %9218, %v2644_v59  }
 0x38a   : > { %9245 = vrot.lane.b32.xlu1 %v9652_v0, %s11562_s23 }
 0x38c   : > { %9240 = vrot.lane.b32.xlu0 %v9652_v0, %s11506_s7 }
 0x390   : > { %9250 = vrot.lane.b32.xlu0 %v9652_v0, %s11508_s8 }
 0x3ea   : > { %v2429_v63 = vpop.permute.xlu0 %2428 }
 0x3eb   : > { %v2431_v6 = vsel %vm1160_vm3, %v9237_v62, %v2429_v63  ;;  %v7897_v62 = vld [vmem:[%s11563_s5 + $0x28] sm:$0xff]  ;;  %v7898_v63 = vld [vmem:[%s11563_s5 + $0x30] sm:$0xff] }
 0x3ec   : > { %v2425_v7 = vpop.permute.xlu1 %2424  ;;  %8587 = vmatprep.subr.mxu0 %v2431_v6 }
 0x3ed   : > { %8588 = vmatpush3.msra.mxu0 %v2431_v6  ;;  %v2430_v8 = vsel %vm1160_vm3, %v9238_v5, %v2425_v7 }
 0x3ee   : > { %8589 = vmatprep.subr.mxu0 %v2430_v8  ;;  %v2531_v10 = vpop.permute.xlu0 %2530 }
 0x3ef   : > { %8590 = vmatpush3.msra.mxu0 %v2430_v8  ;;  %v2535_v11 = vsel %vm1373_vm4, %v2531_v10, %v2533_v61  ;;  %v7899_v8 = vld [vmem:[%s11563_s5 + $0x38] sm:$0xff] }
 0x3f0   : > { %8592 = vmatmul.mubr.msk.f32.vlgmr.msra.gmra.mxu0 %vm1843_vm11, %v2329_v9  ;;  %8594 = vmatprep.subr.mxu1 %v2535_v11  ;;  %v2529_v13 = vpop.permute.xlu1 %2528  ;;  %v7908_v9 = vld [vmem:[%s11563_s5 + $0x40] sm:$0xff] }
 0x3f1   : > { %8601 = vmatprep.subr.mxu0 %v9984_v1  ;;  %8595 = vmatpush3.msra.mxu1 %v2535_v11 }
 0x3f2   : > { %8602 = vmatpush3.msra.mxu0 %v9984_v1  ;;  %v2527_v14 = vpop.permute.xlu0 %2526  ;;  %8609 = vmatprep.mubr.msk.f32.mxu0 %vm953_vm0, %v2637_v12  ;;  %v2638_v1 = vld [vmem:[%s11561_s13 + $0x8] sm:$0xff]  ;;  %s11569_s13 = smov 2  }
 0x3f3   : > { %8603 = vmatprep.subr.mxu0 %v9988_v2  ;;  %v2534_v15 = vsel %vm1373_vm4, %v2527_v14, %v2529_v13 }
 0x3f4   : > { %8604 = vmatpush3.msra.mxu0 %v9988_v2  ;;  %8596 = vmatprep.subr.mxu1 %v2534_v15 }
 0x3f5   : > { %8605 = vmatprep.subr.mxu0 %v9994_v3  ;;  %8597 = vmatpush3.msra.mxu1 %v2534_v15 }
 0x3f6   : > { %8606 = vmatpush3.msra.mxu0 %v9994_v3  ;;  %8599 = vmatmul.mubr.msk.f32.vlgmr.msra.gmra.mxu1 %vm1843_vm11, %v2517_v16 }
 0x3f7   : > { %8607 = vmatprep.subr.mxu0 %v10000_v4  ;;  %8616 = vmatprep.mubr.msk.f32.mxu1 %vm1843_vm11, %v7896_v30 }
 0x3f8   : > { %8608 = vmatpush3.msra.mxu0 %v10000_v4 }
 0x3f9   : > { %8610 = vmatmul.mubr.msk.f32.vlgmr.msra.gmra.mxu0 %vm953_vm0, %v2638_v1  ;;  %v2743_v1 = vld [vmem:[%s11563_s5 + $0x8] sm:$0xff] }
 0x3fa   : > { %8626 = vmatprep.mubr.msk.f32.mxu0 %vm1843_vm11, %v2742_v42 }
 0x3fd   : > { %v2626_v22 = vpop.permute.xlu1 %2625 }
 0x3ff   : > { %v2631_v18 = vpop.permute.xlu0 %2630 }
 0x401   : > { %v2648_v35 = vpop.permute.xlu1 %2647 }
 0x403   : > { %v2653_v29 = vpop.permute.xlu0 %2652 }
 0x405   : > { %v9246_v49 = vpop.permute.xlu1 %9245 }
 0x406   : > { %v9247_v52 = vunpack.i.l.bf16 %v9246_v49  ;;  %v9248_v10 = vunpack.i.h.bf16 %v9246_v49  ;;  %v7933_v49 = vld [vmem:[%s11563_s5 + $0xa8] sm:$0xff] }
 0x407   : > { %v9241_v48 = vpop.permute.xlu0 %9240 }
 0x408   : > { %v9242_v51 = vunpack.i.l.bf16 %v9241_v48  ;;  %v9243_v57 = vunpack.i.h.bf16 %v9241_v48  ;;  %v7932_v48 = vld [vmem:[%s11563_s5 + $0xa0] sm:$0xff] }
 0x40b   : > { %v9251_v50 = vpop.permute.xlu0 %9250 }
 0x40c   : > { %v9252_v60 = vunpack.i.l.bf16 %v9251_v50  ;;  %v9253_v11 = vunpack.i.h.bf16 %v9251_v50  ;;  %v7927_v50 = vld [vmem:[%s11563_s5 + $0x98] sm:$0xff] }
 0x43c   : > { %v8586_v2 = vpop.f32.mrf.mxu1 }
 0x43e   : > { %v2409_v19 = vpop.f32.mrf.mxu1 }
 0x4b0   : > { %v8593_v3 = vpop.f32.mrf.mxu0 }
 0x4b1   : > { %v2512_v21 = vadd.f32 %v8593_v3, %v8586_v2  ;;  %v7909_v2 = vld [vmem:[%s11563_s5 + $0x48] sm:$0xff] }
 0x4b2   : > { %v2506_v20 = vpop.f32.mrf.mxu0 }
 0x4b3   : > { %v2507_v4 = vadd.f32 %v2506_v20, %v2409_v19  ;;  %v2744_v20 = vld [vmem:[%s11563_s5 + $0x10] sm:$0xff] }
 0x4b6   : > { %v8600_v23 = vpop.f32.mrf.mxu1 }
 0x4b7   : > { %v2620_v24 = vadd.f32 %v8600_v23, %v2512_v21  ;;  %v2745_v23 = vld [vmem:[%s11563_s5 + $0x18] sm:$0xff] }
 0x4b8   : > { %v2610_v25 = vpop.f32.mrf.mxu1 }
 0x4b9   : > { %v2634_v26 = vadd.f32 %v2631_v18, %v2620_v24  ;;  %v2619_v27 = vadd.f32 %v2610_v25, %v2507_v4  ;;  %v8611_v28 = vpop.f32.mrf.mxu0  ;;  %v7911_v24 = vld [vmem:[%s11563_s5 + $0x58] sm:$0xff]  ;;  %v7916_v25 = vld [vmem:[%s11563_s5 + $0x60] sm:$0xff] }
 0x4ba   : > { %v2733_v33 = vadd.f32 %v8611_v28, %v2653_v29  ;;  %v7924_v28 = vld [vmem:[%s11563_s5 + $0x80] sm:$0xff]  ;;  %v7917_v29 = vld [vmem:[%s11563_s5 + $0x68] sm:$0xff] }
 0x4bb   : > { %v2636_v31 = vmax.f32 %v2634_v26, 0.0  ;;  %v2633_v32 = vadd.f32 %v2626_v22, %v2619_v27  ;;  %v2727_v34 = vpop.f32.mrf.mxu0  ;;  %v7910_v22 = vld [vmem:[%s11563_s5 + $0x50] sm:$0xff] }
 0x4bc   : > { %v2728_v38 = vadd.f32 %v2727_v34, %v2648_v35  ;;  %v7918_v34 = vld [vmem:[%s11563_s5 + $0x70] sm:$0xff] }
 0x4bd   : > { %v2635_v36 = vmax.f32 %v2633_v32, 0.0  ;;  %v2737_v37 = vadd.f32 %v2733_v33, %v2636_v31 }
 0x4bf   : > { %v10239_v40 = vmul.f32 %v10139_v39, %v2737_v37  ;;  %v2736_v41 = vadd.f32 %v2728_v38, %v2635_v36  ;;  %v7919_v38 = vld [vmem:[%s11563_s5 + $0x78] sm:$0xff] }
 0x4c1   : > { %2874 = vrot.lane.b32.xlu0 %v10239_v40, %s11562_s23  ;;  %2765 = vrot.lane.b32.xlu1 %v10239_v40, %s11506_s7  ;;  %v10249_v43 = vmul.f32 %v10139_v39, %v2736_v41  ;;  %v7925_v41 = vld [vmem:[%s11563_s5 + $0x88] sm:$0xff] }
 0x4c5   : > { %2761 = vrot.lane.b32.xlu0 %v10249_v43, %s11506_s7  ;;  %2988 = vrot.lane.b32.xlu1 %v10239_v40, %s11508_s8  ;;  %s11576_s7 = sld [smem:[#allocation37_spill]] }
 0x4c9   : > { %9255 = vrot.lane.b32.xlu0 %v9652_v0, %s11504_s3  ;;  %3218 = vrot.lane.b32.xlu1 %v10239_v40, %s11504_s3 }
 0x4cd   : > { %2984 = vrot.lane.b32.xlu0 %v10249_v43, %s11508_s8  ;;  %2870 = vrot.lane.b32.xlu1 %v10249_v43, %s11562_s23  ;;  %s855_s8 = scalar_lea.vmem %s11576_s7, %s7860_s0 }
 0x4d1   : > { %3336 = vrot.lane.b32.xlu0 %v10239_v40, %s11564_s27  ;;  %9260 = vrot.lane.b32.xlu1 %v9652_v0, %s11564_s27 }
 0x4d5   : > { %9265 = vrot.lane.b32.xlu0 %v9652_v0, %s11565_s30  ;;  %3454 = vrot.lane.b32.xlu1 %v10239_v40, %s11565_s30 }
 0x4d9   : > { %3332 = vrot.lane.b32.xlu0 %v10249_v43, %s11564_s27  ;;  %3214 = vrot.lane.b32.xlu1 %v10249_v43, %s11504_s3 }
 0x4dd   : > { %3572 = vrot.lane.b32.xlu0 %v10239_v40, %s11566_s1  ;;  %3574 = vrot.lane.b32.xlu1 %v9652_v0, %s11566_s1 }
 0x4e1   : > { %3568 = vrot.lane.b32.xlu0 %v10249_v43, %s11566_s1  ;;  %3450 = vrot.lane.b32.xlu1 %v10249_v43, %s11565_s30 }
 0x4e5   : > { %3702 = vperm.xlu0 %9218, %v3684_v44   ;;  %3570 = vrot.lane.b32.xlu1 %v9652_v0, %s11566_s1 }
 0x4e9   : > { %3692 = vperm.xlu0 %9218, %v3682_v45   ;;  %3697 = vperm.xlu1 %9217, %v3683_v46   ;;  %v7926_v45 = vld [vmem:[%s11563_s5 + $0x90] sm:$0xff] }
 0x4ed   : > { %3687 = vperm.xlu1 %9217, %v3681_v47   ;;  %9270 = vrot.lane.b32.xlu0 %v9652_v0, %s11568_s9 }
 0x4f1   : > { %9275 = vrot.lane.b32.xlu1 %v9652_v0, %s11568_s9  ;;  %9280 = vrot.lane.b32.xlu0 %v9652_v0, %s11569_s13 }
 0x4f5   : > { %9285 = vrot.lane.b32.xlu1 %v9652_v0, %s11569_s13  ;;  %9295 = vrot.lane.b32.xlu0 %v9652_v0, %s11564_s27 }
 0x4f9   : > { %9290 = vrot.lane.b32.xlu1 %v9652_v0, %s11570_s29 }
 0x533   : > { %v2766_v53 = vpop.permute.xlu1 %2765  ;;  %v2875_v54 = vpop.permute.xlu0 %2874 }
 0x534   : > { %v2768_v55 = vsel %vm944_vm1, %v9242_v51, %v2766_v53  ;;  %v2877_v56 = vsel %vm1051_vm2, %v9247_v52, %v2875_v54  ;;  %v7934_v53 = vld [vmem:[%s11563_s5 + $0xb0] sm:$0xff] }
 0x535   : > { %8612 = vmatprep.subr.mxu1 %v2768_v55  ;;  %8622 = vmatprep.subr.mxu0 %v2877_v56 }
 0x536   : > { %8613 = vmatpush3.msra.mxu1 %v2768_v55  ;;  %8623 = vmatpush3.msra.mxu0 %v2877_v56  ;;  %v7940_v55 = vld [vmem:[%s11563_s5 + $0xc0] sm:$0xff]  ;;  %v7935_v56 = vld [vmem:[%s11563_s5 + $0xb8] sm:$0xff] }
 0x537   : > { %v2989_v58 = vpop.permute.xlu1 %2988  ;;  %v2762_v59 = vpop.permute.xlu0 %2761 }
 0x538   : > { %v2767_v61 = vsel %vm944_vm1, %v9243_v57, %v2762_v59  ;;  %v2991_v5 = vsel %vm1160_vm3, %v9252_v60, %v2989_v58  ;;  %v7941_v57 = vld [vmem:[%s11563_s5 + $0xc8] sm:$0xff]  ;;  %v7942_v58 = vld [vmem:[%s11563_s5 + $0xd0] sm:$0xff] }
 0x539   : > { %8614 = vmatprep.subr.mxu1 %v2767_v61 }
 0x53a   : > { %8615 = vmatpush3.msra.mxu1 %v2767_v61  ;;  %v7948_v61 = vld [vmem:[%s11563_s5 + $0xe0] sm:$0xff] }
 0x53b   : > { %v3219_v6 = vpop.permute.xlu1 %3218  ;;  %v9256_v7 = vpop.permute.xlu0 %9255  ;;  %8632 = vmatprep.subr.mxu1 %v2991_v5  ;;  %8617 = vmatmul.mubr.msk.f32.vlgmr.msra.gmra.mxu1 %vm1843_vm11, %v7897_v62 }
 0x53c   : > { %8633 = vmatpush3.msra.mxu1 %v2991_v5  ;;  %8619 = vmatprep.mubr.msk.f32.mxu1 %vm1843_vm11, %v7898_v63  ;;  %v9257_v12 = vunpack.i.l.bf16 %v9256_v7  ;;  %v9258_v30 = vunpack.i.h.bf16 %v9256_v7  ;;  %v7943_v63 = vld [vmem:[%s11563_s5 + $0xd8] sm:$0xff]  ;;  %v7949_v5 = vld [vmem:[%s11563_s5 + $0xe8] sm:$0xff] }
 0x53d   : > { %v7951_v7 = vld [vmem:[%s11563_s5 + $0xf8] sm:$0xff] }
 0x53e   : > { %v3223_v19 = vsel %vm1373_vm4, %v3219_v6, %v9257_v12  ;;  %v7950_v6 = vld [vmem:[%s11563_s5 + $0xf0] sm:$0xff] }
 0x53f   : > { %v2871_v13 = vpop.permute.xlu1 %2870  ;;  %v2985_v14 = vpop.permute.xlu0 %2984  ;;  %8620 = vmatmul.mubr.msk.f32.gmra.mxu1 %vm1843_vm11, %v7899_v8 }
 0x540   : > { %v2876_v15 = vsel %vm1051_vm2, %v9248_v10, %v2871_v13  ;;  %v2990_v16 = vsel %vm1160_vm3, %v9253_v11, %v2985_v14  ;;  %8636 = vmatprep.mubr.msk.f32.mxu1 %vm1843_vm11, %v7908_v9 }
 0x541   : > { %8624 = vmatprep.subr.mxu0 %v2876_v15  ;;  %8634 = vmatprep.subr.mxu1 %v2990_v16 }
 0x542   : > { %8625 = vmatpush3.msra.mxu0 %v2876_v15  ;;  %8635 = vmatpush3.msra.mxu1 %v2990_v16 }
 0x543   : > { %v9261_v3 = vpop.permute.xlu1 %9260  ;;  %8627 = vmatmul.mubr.msk.f32.vlgmr.msra.gmra.mxu0 %vm1843_vm11, %v2743_v1  ;;  %8642 = vmatprep.subr.mxu0 %v10239_v40  ;;  %v3337_v18 = vpop.permute.xlu0 %3336 }
 0x544   : > { %v9262_v21 = vunpack.i.l.bf16 %v9261_v3  ;;  %8652 = vmatprep.subr.mxu1 %v3223_v19  ;;  %8637 = vmatmul.mubr.msk.f32.vlgmr.msra.gmra.mxu1 %vm1843_vm11, %v7909_v2  ;;  %v9263_v31 = vunpack.i.h.bf16 %v9261_v3 }
 0x545   : > { %8643 = vmatpush3.msra.mxu0 %v10239_v40  ;;  %8653 = vmatpush3.msra.mxu1 %v3223_v19 }
 0x546   : > { %8644 = vmatprep.subr.mxu0 %v10249_v43  ;;  %8629 = vmatprep.mubr.msk.f32.mxu0 %vm1843_vm11, %v2744_v20  ;;  %v3341_v4 = vsel %vm1484_vm5, %v3337_v18, %v9262_v21 }
 0x547   : > { %8645 = vmatpush3.msra.mxu0 %v10249_v43  ;;  %v3455_v26 = vpop.permute.xlu1 %3454  ;;  %v9266_v27 = vpop.permute.xlu0 %9265  ;;  %8639 = vmatprep.mubr.msk.f32.mxu1 %vm1843_vm11, %v7910_v22 }
 0x548   : > { %8630 = vmatmul.mubr.msk.f32.gmra.mxu0 %vm1843_vm11, %v2745_v23  ;;  %8662 = vmatprep.subr.mxu0 %v3341_v4  ;;  %v9267_v35 = vunpack.i.l.bf16 %v9266_v27  ;;  %v9268_v51 = vunpack.i.h.bf16 %v9266_v27 }
 0x549   : > { %8640 = vmatmul.mubr.msk.f32.gmra.mxu1 %vm1843_vm11, %v7911_v24  ;;  %8646 = vmatprep.mubr.msk.f32.mxu0 %vm1843_vm11, %v7916_v25 }
 0x54a   : > { %8656 = vmatprep.mubr.msk.f32.mxu1 %vm1843_vm11, %v7924_v28  ;;  %v3459_v46 = vsel %vm1595_vm6, %v3455_v26, %v9267_v35 }
 0x54b   : > { %v3215_v32 = vpop.permute.xlu1 %3214  ;;  %v3333_v33 = vpop.permute.xlu0 %3332 }
 0x54c   : > { %8647 = vmatmul.mubr.msk.f32.vlgmr.msra.gmra.mxu0 %vm1843_vm11, %v7917_v29  ;;  %v3222_v36 = vsel %vm1373_vm4, %v3215_v32, %v9258_v30  ;;  %v3340_v37 = vsel %vm1484_vm5, %v3333_v33, %v9263_v31 }
 0x54d   : > { %8663 = vmatpush3.msra.mxu0 %v3341_v4  ;;  %8654 = vmatprep.subr.mxu1 %v3222_v36 }
 0x54e   : > { %8664 = vmatprep.subr.mxu0 %v3340_v37  ;;  %8649 = vmatprep.mubr.msk.f32.mxu0 %vm1843_vm11, %v7918_v34 }
 0x54f   : > { %8655 = vmatpush3.msra.mxu1 %v3222_v36  ;;  %8665 = vmatpush3.msra.mxu0 %v3340_v37  ;;  %v3575_v42 = vpop.permute.xlu1 %3574  ;;  %v3573_v44 = vpop.permute.xlu0 %3572 }
 0x550   : > { %8650 = vmatmul.mubr.msk.f32.gmra.mxu0 %vm1843_vm11, %v7919_v38  ;;  %8657 = vmatmul.mubr.msk.f32.vlgmr.msra.gmra.mxu1 %vm1843_vm11, %v7925_v41  ;;  %v3577_v47 = vsel %vm1706_vm7, %v3573_v44, %v3575_v42 }
 0x551   : > { %8672 = vmatprep.subr.mxu1 %v3459_v46  ;;  %8682 = vmatprep.subr.mxu0 %v3577_v47 }
 0x552   : > { %8673 = vmatpush3.msra.mxu1 %v3459_v46  ;;  %8659 = vmatprep.mubr.msk.f32.mxu1 %vm1843_vm11, %v7926_v45 }
 0x553   : > { %8666 = vmatprep.mubr.msk.f32.mxu0 %vm1843_vm11, %v7932_v48  ;;  %v3451_v52 = vpop.permute.xlu1 %3450  ;;  %v3569_v59 = vpop.permute.xlu0 %3568 }
 0x554   : > { %8667 = vmatmul.mubr.msk.f32.vlgmr.msra.gmra.mxu0 %vm1843_vm11, %v7933_v49  ;;  %8660 = vmatmul.mubr.msk.f32.gmra.mxu1 %vm1843_vm11, %v7927_v50  ;;  %v3458_v54 = vsel %vm1595_vm6, %v3451_v52, %v9268_v51 }
 0x555   : > { %8683 = vmatpush3.msra.mxu0 %v3577_v47  ;;  %8674 = vmatprep.subr.mxu1 %v3458_v54 }
 0x556   : > { %8669 = vmatprep.mubr.msk.f32.mxu0 %vm1843_vm11, %v7934_v53  ;;  %8675 = vmatpush3.msra.mxu1 %v3458_v54 }
 0x557   : > { %8676 = vmatprep.mubr.msk.f32.mxu1 %vm1843_vm11, %v7940_v55  ;;  %v3571_v60 = vpop.permute.xlu1 %3570 }
 0x558   : > { %8670 = vmatmul.mubr.msk.f32.gmra.mxu0 %vm1843_vm11, %v7935_v56  ;;  %8677 = vmatmul.mubr.msk.f32.vlgmr.msra.gmra.mxu1 %vm1843_vm11, %v7941_v57  ;;  %v3576_v62 = vsel %vm1706_vm7, %v3569_v59, %v3571_v60 }
 0x559   : > { %8684 = vmatprep.subr.mxu0 %v3576_v62  ;;  %8679 = vmatprep.mubr.msk.f32.mxu1 %vm1843_vm11, %v7942_v58 }
 0x55a   : > { %8685 = vmatpush3.msra.mxu0 %v3576_v62  ;;  %8686 = vmatprep.mubr.msk.f32.mxu0 %vm1843_vm11, %v7948_v61 }
 0x55c   : > { %8680 = vmatmul.mubr.msk.f32.gmra.mxu1 %vm1843_vm11, %v7943_v63  ;;  %8687 = vmatmul.mubr.msk.f32.vlgmr.msra.gmra.mxu0 %vm1843_vm11, %v7949_v5 }
 0x55d   : > { %8689 = vmatprep.mubr.msk.f32.mxu0 %vm1843_vm11, %v7950_v6 }
 0x560   : > { %8690 = vmatmul.mubr.msk.f32.gmra.mxu0 %vm1843_vm11, %v7951_v7  ;;  %v3703_v33 = vpop.permute.xlu0 %3702 }
 0x564   : > { %v3698_v41 = vpop.permute.xlu1 %3697  ;;  %v3693_v58 = vpop.permute.xlu0 %3692 }
 0x568   : > { %v3688_v5 = vpop.permute.xlu1 %3687 }
 0x5fb   : > { %v8618_v8 = vpop.f32.mrf.mxu1 }
 0x5fd   : > { %v2849_v9 = vpop.f32.mrf.mxu1 }
 0x5ff   : > { %v8621_v10 = vpop.f32.mrf.mxu1 }
 0x601   : > { %v2859_v11 = vpop.f32.mrf.mxu1 }
 0x603   : > { %v8628_v12 = vpop.f32.mrf.mxu0 }
 0x604   : > { %v8638_v13 = vpop.f32.mrf.mxu1  ;;  %v2964_v20 = vadd.f32 %v8628_v12, %v8618_v8 }
 0x605   : > { %v2958_v14 = vpop.f32.mrf.mxu0 }
 0x606   : > { %v3072_v15 = vpop.f32.mrf.mxu1  ;;  %v2959_v23 = vadd.f32 %v2958_v14, %v2849_v9  ;;  %v3092_v25 = vadd.f32 %v8638_v13, %v2964_v20 }
 0x608   : > { %v8631_v16 = vpop.f32.mrf.mxu0  ;;  %v3091_v29 = vadd.f32 %v3072_v15, %v2959_v23  ;;  %v3721_v23 = vld [vmem:[%s11571_s11] sm:$0xff] }
 0x609   : > { %v8641_v2 = vpop.f32.mrf.mxu1  ;;  %v2974_v26 = vadd.f32 %v8631_v16, %v8621_v10  ;;  %8714 = vmatprep.mubr.msk.f32.mxu0 %vm953_vm0, %v3721_v23 }
 0x60a   : > { %v2968_v1 = vpop.f32.mrf.mxu0 }
 0x60b   : > { %v3082_v18 = vpop.f32.mrf.mxu1  ;;  %v3094_v34 = vadd.f32 %v8641_v2, %v2974_v26  ;;  %v2969_v42 = vadd.f32 %v2968_v1, %v2859_v11  ;;  %v4371_v26 = vld [vmem:[%s11572_s12 + $0x8] sm:$0xff] }
 0x60c   : > { %v8648_v3 = vpop.f32.mrf.mxu0 }
 0x60d   : > { %v3198_v30 = vadd.f32 %v8648_v3, %v3092_v25  ;;  %v3093_v54 = vadd.f32 %v3082_v18, %v2969_v42  ;;  %v4372_v25 = vld [vmem:[%s11572_s12 + $0x10] sm:$0xff] }
 0x60e   : > { %v3178_v19 = vpop.f32.mrf.mxu0 }
 0x60f   : > { %v3197_v35 = vadd.f32 %v3178_v19, %v3091_v29  ;;  %v9276_v29 = vpop.permute.xlu1 %9275 }
 0x610   : > { %v8651_v21 = vpop.f32.mrf.mxu0  ;;  %v8658_v22 = vpop.f32.mrf.mxu1 }
 0x611   : > { %v3324_v36 = vadd.f32 %v8658_v22, %v3198_v30  ;;  %v3200_v44 = vadd.f32 %v8651_v21, %v3094_v34  ;;  %v7956_v21 = vld [vmem:[%s11571_s11 + $0x20] sm:$0xff] }
 0x612   : > { %v3188_v4 = vpop.f32.mrf.mxu0  ;;  %v3304_v24 = vpop.f32.mrf.mxu1  ;;  %8700 = vmatprep.mubr.msk.f32.mxu1 %vm953_vm0, %v7956_v21 }
 0x613   : > { %v3323_v45 = vadd.f32 %v3304_v24, %v3197_v35  ;;  %v3199_v60 = vadd.f32 %v3188_v4, %v3093_v54  ;;  %v4373_v24 = vld [vmem:[%s11572_s12 + $0x18] sm:$0xff] }
 0x614   : > { %v8661_v27 = vpop.f32.mrf.mxu1  ;;  %v8668_v28 = vpop.f32.mrf.mxu0 }
 0x615   : > { %v3442_v46 = vadd.f32 %v8668_v28, %v3324_v36  ;;  %v3326_v49 = vadd.f32 %v8661_v27, %v3200_v44  ;;  %v4370_v27 = vld [vmem:[%s11572_s12] sm:$0xff]  ;;  %v9271_v28 = vpop.permute.xlu0 %9270 }
 0x616   : > { %v3314_v31 = vpop.f32.mrf.mxu1  ;;  %v3422_v32 = vpop.f32.mrf.mxu0 }
 0x617   : > { %v3441_v50 = vadd.f32 %v3422_v32, %v3323_v45  ;;  %v3325_v7 = vadd.f32 %v3314_v31, %v3199_v60  ;;  %v9286_v31 = vpop.permute.xlu1 %9285 }
 0x618   : > { %v8671_v37 = vpop.f32.mrf.mxu0  ;;  %v8678_v38 = vpop.f32.mrf.mxu1 }
 0x619   : > { %v3560_v51 = vadd.f32 %v8678_v38, %v3442_v46  ;;  %v3444_v55 = vadd.f32 %v8671_v37, %v3326_v49  ;;  %v9281_v30 = vpop.permute.xlu0 %9280  ;;  %v9277_v49 = vunpack.i.l.bf16 %v9276_v29 }
 0x61a   : > { %v3432_v47 = vpop.f32.mrf.mxu0  ;;  %v3540_v48 = vpop.f32.mrf.mxu1  ;;  %v9283_v54 = vunpack.i.h.bf16 %v9281_v30 }
 0x61b   : > { %v3559_v56 = vadd.f32 %v3540_v48, %v3441_v50  ;;  %v3443_v12 = vadd.f32 %v3432_v47, %v3325_v7  ;;  %v9273_v47 = vunpack.i.h.bf16 %v9271_v28  ;;  %v9282_v50 = vunpack.i.l.bf16 %v9281_v30  ;;  %v7958_v7 = vld [vmem:[%s11571_s11 + $0x30] sm:$0xff]  ;;  %v7971_v30 = vld [vmem:[%s11571_s11 + $0x58] sm:$0xff] }
 0x61c   : > { %v8681_v52 = vpop.f32.mrf.mxu1  ;;  %v8688_v53 = vpop.f32.mrf.mxu0 }
 0x61d   : > { %v3678_v57 = vadd.f32 %v8688_v53, %v3560_v51  ;;  %v3562_v61 = vadd.f32 %v8681_v52, %v3444_v55  ;;  %v10518_v32 = vpop.permute.xlu0 %9295  ;;  %v9278_v53 = vunpack.i.h.bf16 %v9276_v29  ;;  %v7976_v29 = vld [vmem:[%s11571_s11 + $0x60] sm:$0xff] }
 0x61e   : > { %v3658_v59 = vpop.f32.mrf.mxu0  ;;  %v3550_v11 = vpop.f32.mrf.mxu1 }
 0x61f   : > { %v3706_v62 = vadd.f32 %v3693_v58, %v3678_v57  ;;  %v3677_v63 = vadd.f32 %v3658_v59, %v3559_v56  ;;  %v3561_v16 = vadd.f32 %v3550_v11, %v3443_v12  ;;  %v9287_v58 = vunpack.i.l.bf16 %v9286_v31 }
 0x620   : > { %v8691_v6 = vpop.f32.mrf.mxu0 }
 0x621   : > { %v3710_v8 = vmax.f32 %v3706_v62, 0.0  ;;  %v3705_v9 = vadd.f32 %v3688_v5, %v3677_v63  ;;  %v3680_v10 = vadd.f32 %v8691_v6, %v3562_v61  ;;  %v7957_v61 = vld [vmem:[%s11571_s11 + $0x28] sm:$0xff]  ;;  %v9288_v63 = vunpack.i.h.bf16 %v9286_v31 }
 0x622   : > { %v3668_v15 = vpop.f32.mrf.mxu0  ;;  %v7977_v31 = vld [vmem:[%s11571_s11 + $0x68] sm:$0xff] }
 0x623   : > { %v10449_v13 = vmul.f32 %v10139_v39, %v3710_v8  ;;  %v3709_v14 = vmax.f32 %v3705_v9, 0.0  ;;  %v3708_v2 = vadd.f32 %v3703_v33, %v3680_v10  ;;  %v3679_v3 = vadd.f32 %v3668_v15, %v3561_v16  ;;  %v10520_v33 = vpop.permute.xlu1 %9290  ;;  %v7959_v9 = vld [vmem:[%s11571_s11 + $0x38] sm:$0xff]  ;;  %v3722_v10 = vld [vmem:[%s11571_s11 + $0x8] sm:$0xff] }
 0x624   : > { %v9293_v11 = vunpack.i.h.bf16 %v10520_v33  ;;  %v9292_v12 = vunpack.i.l.bf16 %v10520_v33  ;;  %v7978_v33 = vld [vmem:[%s11571_s11 + $0x70] sm:$0xff] }
 0x625   : > { %v10452_v1 = vmul.f32 %v10139_v39, %v3709_v14  ;;  %3752 = vrot.lane.b32.xlu0 %v10449_v13, %s11568_s9  ;;  %v3712_v18 = vmax.f32 %v3708_v2, 0.0  ;;  %v3707_v19 = vadd.f32 %v3698_v41, %v3679_v3  ;;  %v9272_v41 = vunpack.i.l.bf16 %v9271_v28  ;;  %v3723_v3 = vld [vmem:[%s11571_s11 + $0x10] sm:$0xff] }
 0x627   : > { %3748 = vrot.lane.b32.xlu1 %v10452_v1, %s11568_s9  ;;  %v10463_v20 = vmul.f32 %v10139_v39, %v3712_v18  ;;  %v3711_v22 = vmax.f32 %v3707_v19, 0.0  ;;  %v7968_v18 = vld [vmem:[%s11571_s11 + $0x40] sm:$0xff]  ;;  %v3724_v19 = vld [vmem:[%s11571_s11 + $0x18] sm:$0xff] }
 0x629   : > { %3873 = vrot.lane.b32.xlu0 %v10449_v13, %s11569_s13  ;;  %v10479_v4 = vmul.f32 %v10139_v39, %v3711_v22  ;;  %v9297_v22 = vunpack.i.l.bf16 %v10518_v32 }
 0x62b   : > { %3869 = vrot.lane.b32.xlu1 %v10452_v1, %s11569_s13 }
 0x62d   : > { %9300 = vrot.lane.b32.xlu0 %v9652_v0, %s11570_s29 }
 0x62f   : > { %3760 = vrot.lane.b32.xlu1 %v10463_v20, %s11568_s9 }
 0x631   : > { %4127 = vrot.lane.b32.xlu0 %v10463_v20, %s11570_s29 }
 0x633   : > { %4119 = vrot.lane.b32.xlu1 %v10449_v13, %s11570_s29 }
 0x635   : > { %3756 = vrot.lane.b32.xlu0 %v10479_v4, %s11568_s9 }
 0x637   : > { %3881 = vrot.lane.b32.xlu1 %v10463_v20, %s11569_s13 }
 0x639   : > { %3877 = vrot.lane.b32.xlu0 %v10479_v4, %s11569_s13 }
 0x63b   : > { %4257 = vrot.lane.b32.xlu1 %v10463_v20, %s11564_s27 }
 0x63d   : > { %4115 = vrot.lane.b32.xlu0 %v10452_v1, %s11570_s29 }
 0x63f   : > { %4249 = vrot.lane.b32.xlu1 %v10449_v13, %s11564_s27 }
 0x641   : > { %4123 = vrot.lane.b32.xlu0 %v10479_v4, %s11570_s29 }
 0x643   : > { %4253 = vrot.lane.b32.xlu1 %v10479_v4, %s11564_s27 }
 0x645   : > { %4251 = vrot.lane.b32.xlu0 %v9652_v0, %s11564_s27 }
 0x647   : > { %4245 = vrot.lane.b32.xlu1 %v10452_v1, %s11564_s27 }
 0x649   : > { %4247 = vrot.lane.b32.xlu0 %v9652_v0, %s11564_s27 }
 0x64b   : > { %4391 = vperm.xlu1 %9217, %v4373_v24  }
 0x64d   : > { %4386 = vperm.xlu0 %9218, %v4372_v25  }
 0x64f   : > { %4381 = vperm.xlu1 %9217, %v4371_v26  }
 0x651   : > { %4376 = vperm.xlu0 %9218, %v4370_v27  }
 0x653   : > { %9305 = vrot.lane.b32.xlu1 %v9652_v0, %s11568_s9 }
 0x655   : > { %9310 = vrot.lane.b32.xlu0 %v9652_v0, %s11568_s9 }
 0x657   : > { %9315 = vrot.lane.b32.xlu1 %v9652_v0, %s11570_s29 }
 0x697   : > { %v3753_v34 = vpop.permute.xlu0 %3752 }
 0x698   : > { %v3763_v55 = vsel %vm1160_vm3, %v9277_v49, %v3753_v34 }
 0x699   : > { %v3749_v35 = vpop.permute.xlu1 %3748 }
 0x69a   : > { %v3762_v59 = vsel %vm1160_vm3, %v9278_v53, %v3749_v35  ;;  %v7984_v35 = vld [vmem:[%s11571_s11 + $0x80] sm:$0xff] }
 0x69b   : > { %v3874_v36 = vpop.permute.xlu0 %3873 }
 0x69c   : > { %v3884_v5 = vsel %vm944_vm1, %v9287_v58, %v3874_v36 }
 0x69d   : > { %v3870_v37 = vpop.permute.xlu1 %3869 }
 0x69e   : > { %v3883_v8 = vsel %vm944_vm1, %v9288_v63, %v3870_v37 }
 0x69f   : > { %v10522_v38 = vpop.permute.xlu0 %9300 }
 0x6a0   : > { %v9303_v24 = vunpack.i.h.bf16 %v10522_v38 }
 0x6a1   : > { %v3761_v42 = vpop.permute.xlu1 %3760 }
 0x6a2   : > { %v3765_v44 = vsel %vm1160_vm3, %v9272_v41, %v3761_v42  ;;  %v7985_v41 = vld [vmem:[%s11571_s11 + $0x88] sm:$0xff]  ;;  %v7986_v42 = vld [vmem:[%s11571_s11 + $0x90] sm:$0xff] }
 0x6a3   : > { %v4128_v45 = vpop.permute.xlu0 %4127  ;;  %8692 = vmatprep.subr.mxu1 %v3765_v44 }
 0x6a4   : > { %8693 = vmatpush3.msra.mxu1 %v3765_v44  ;;  %v4134_v16 = vsel %vm1373_vm4, %v4128_v45, %v9292_v12  ;;  %v7987_v44 = vld [vmem:[%s11571_s11 + $0x98] sm:$0xff] }
 0x6a5   : > { %v10525_v46 = vpop.permute.xlu1 %4119 }
 0x6a7   : > { %v3757_v48 = vpop.permute.xlu0 %3756 }
 0x6a8   : > { %v3764_v51 = vsel %vm1160_vm3, %v9273_v47, %v3757_v48 }
 0x6a9   : > { %v3882_v52 = vpop.permute.xlu1 %3881  ;;  %8694 = vmatprep.subr.mxu1 %v3764_v51 }
 0x6aa   : > { %8695 = vmatpush3.msra.mxu1 %v3764_v51  ;;  %v3886_v56 = vsel %vm944_vm1, %v9282_v50, %v3882_v52 }
 0x6ab   : > { %8696 = vmatprep.subr.mxu1 %v3763_v55  ;;  %8706 = vmatprep.subr.mxu0 %v3886_v56  ;;  %v3878_v57 = vpop.permute.xlu0 %3877 }
 0x6ac   : > { %8697 = vmatpush3.msra.mxu1 %v3763_v55  ;;  %8707 = vmatpush3.msra.mxu0 %v3886_v56  ;;  %v3885_v60 = vsel %vm944_vm1, %v9283_v54, %v3878_v57 }
 0x6ad   : > { %v4258_v62 = vpop.permute.xlu1 %4257  ;;  %8698 = vmatprep.subr.mxu1 %v3762_v59  ;;  %8708 = vmatprep.subr.mxu0 %v3885_v60 }
 0x6ae   : > { %8699 = vmatpush3.msra.mxu1 %v3762_v59  ;;  %8709 = vmatpush3.msra.mxu0 %v3885_v60  ;;  %v4264_v26 = vsel %vm1484_vm5, %v4258_v62, %v9297_v22 }
 0x6af   : > { %8701 = vmatmul.mubr.msk.f32.vlgmr.msra.gmra.mxu1 %vm953_vm0, %v7957_v61  ;;  %8710 = vmatprep.subr.mxu0 %v3884_v5  ;;  %v4116_v6 = vpop.permute.xlu0 %4115 }
 0x6b0   : > { %8720 = vmatprep.subr.mxu1 %v10463_v20  ;;  %8711 = vmatpush3.msra.mxu0 %v3884_v5  ;;  %v4131_v27 = vsel %vm1373_vm4, %v4116_v6, %v9303_v24 }
 0x6b1   : > { %8721 = vmatpush3.msra.mxu1 %v10463_v20  ;;  %8712 = vmatprep.subr.mxu0 %v3883_v8  ;;  %v4250_v14 = vpop.permute.xlu1 %4249  ;;  %v7969_v20 = vld [vmem:[%s11571_s11 + $0x48] sm:$0xff] }
 0x6b2   : > { %8722 = vmatprep.subr.mxu1 %v10479_v4  ;;  %8703 = vmatprep.mubr.msk.f32.mxu1 %vm953_vm0, %v7958_v7 }
 0x6b3   : > { %8713 = vmatpush3.msra.mxu0 %v3883_v8  ;;  %8723 = vmatpush3.msra.mxu1 %v10479_v4  ;;  %v4124_v15 = vpop.permute.xlu0 %4123  ;;  %v9298_v4 = vunpack.i.h.bf16 %v10518_v32 }
 0x6b4   : > { %8704 = vmatmul.mubr.msk.f32.gmra.mxu1 %vm953_vm0, %v7959_v9  ;;  %8715 = vmatmul.mubr.msk.f32.vlgmr.msra.gmra.mxu0 %vm953_vm0, %v3722_v10  ;;  %v4133_v2 = vsel %vm1373_vm4, %v4124_v15, %v9293_v11 }
 0x6b5   : > { %8724 = vmatprep.subr.mxu1 %v10449_v13  ;;  %8734 = vmatprep.subr.mxu0 %v4134_v16  ;;  %v4254_v23 = vpop.permute.xlu1 %4253 }
 0x6b6   : > { %8725 = vmatpush3.msra.mxu1 %v10449_v13  ;;  %8735 = vmatpush3.msra.mxu0 %v4134_v16  ;;  %v9302_v13 = vunpack.i.l.bf16 %v10522_v38  ;;  %v4263_v28 = vsel %vm1484_vm5, %v4254_v23, %v9298_v4  ;;  %v7979_v38 = vld [vmem:[%s11571_s11 + $0x78] sm:$0xff] }
 0x6b7   : > { %8726 = vmatprep.subr.mxu1 %v10452_v1  ;;  %8736 = vmatprep.subr.mxu0 %v4133_v2  ;;  %v4252_v21 = vpop.permute.xlu0 %4251 }
 0x6b8   : > { %8717 = vmatprep.mubr.msk.f32.mxu0 %vm953_vm0, %v3723_v3  ;;  %8727 = vmatpush3.msra.mxu1 %v10452_v1  ;;  %v4132_v25 = vsel %vm1373_vm4, %v10525_v46, %v9302_v13  ;;  %v7970_v1 = vld [vmem:[%s11571_s11 + $0x50] sm:$0xff]  ;;  %v4262_v36 = vsel %vm1484_vm5, %v4250_v14, %v4252_v21 }
 0x6b9   : > { %8728 = vmatprep.mubr.msk.f32.mxu1 %vm953_vm0, %v7968_v18  ;;  %8737 = vmatpush3.msra.mxu0 %v4133_v2  ;;  %v4246_v34 = vpop.permute.xlu1 %4245 }
 0x6ba   : > { %8718 = vmatmul.mubr.msk.f32.gmra.mxu0 %vm953_vm0, %v3724_v19  ;;  %8729 = vmatmul.mubr.msk.f32.vlgmr.msra.gmra.mxu1 %vm953_vm0, %v7969_v20 }
 0x6bb   : > { %8738 = vmatprep.subr.mxu0 %v4132_v25  ;;  %8748 = vmatprep.subr.mxu1 %v4264_v26  ;;  %v4248_v32 = vpop.permute.xlu0 %4247 }
 0x6bc   : > { %8739 = vmatpush3.msra.mxu0 %v4132_v25  ;;  %8749 = vmatpush3.msra.mxu1 %v4264_v26  ;;  %v4261_v37 = vsel %vm1484_vm5, %v4246_v34, %v4248_v32  ;;  %v4423_v25 = vld [vmem:[#allocation12 + $0x20] sm:$0xff] }
 0x6bd   : > { %8740 = vmatprep.subr.mxu0 %v4131_v27  ;;  %8750 = vmatprep.subr.mxu1 %v4263_v28 }
 0x6be   : > { %8731 = vmatprep.mubr.msk.f32.mxu1 %vm953_vm0, %v7970_v1  ;;  %8741 = vmatpush3.msra.mxu0 %v4131_v27 }
 0x6bf   : > { %8742 = vmatprep.mubr.msk.f32.mxu0 %vm953_vm0, %v7976_v29  ;;  %8751 = vmatpush3.msra.mxu1 %v4263_v28 }
 0x6c0   : > { %8732 = vmatmul.mubr.msk.f32.gmra.mxu1 %vm953_vm0, %v7971_v30  ;;  %8743 = vmatmul.mubr.msk.f32.vlgmr.msra.gmra.mxu0 %vm953_vm0, %v7977_v31 }
 0x6c1   : > { %8752 = vmatprep.subr.mxu1 %v4262_v36  ;;  %8745 = vmatprep.mubr.msk.f32.mxu0 %vm953_vm0, %v7978_v33  ;;  %v4410_v33 = vld [vmem:[#allocation12] sm:$0xff] }
 0x6c2   : > { %8753 = vmatpush3.msra.mxu1 %v4262_v36  ;;  %8756 = vmatprep.mubr.msk.f32.mxu1 %vm953_vm0, %v7984_v35 }
 0x6c3   : > { %8754 = vmatprep.subr.mxu1 %v4261_v37 }
 0x6c4   : > { %8755 = vmatpush3.msra.mxu1 %v4261_v37  ;;  %8746 = vmatmul.mubr.msk.f32.gmra.mxu0 %vm953_vm0, %v7979_v38  ;;  %v4424_v37 = vld [vmem:[#allocation12 + $0x28] sm:$0xff]  ;;  %v4425_v38 = vld [vmem:[#allocation12 + $0x30] sm:$0xff] }
 0x6c5   : > { %8757 = vmatmul.mubr.msk.f32.vlgmr.msra.gmra.mxu1 %vm953_vm0, %v7985_v41  ;;  %8770 = vmatprep.mubr.msk.f32.mxu0 %vm953_vm0, %v4423_v25  ;;  %v4426_v41 = vld [vmem:[#allocation12 + $0x38] sm:$0xff] }
 0x6c6   : > { %8759 = vmatprep.mubr.msk.f32.mxu1 %vm953_vm0, %v7986_v42  ;;  %v4392_v55 = vpop.permute.xlu1 %4391  ;;  %v4654_v42 = vld [vmem:[#allocation12 + $0x40] sm:$0xff]  ;;  %v4834_v25 = vld [vmem:[%s11472_s15 + $0x18] sm:$0xff] }
 0x6c8   : > { %v4387_v63 = vpop.permute.xlu0 %4386 }
 0x6c9   : > { %8760 = vmatmul.mubr.msk.f32.gmra.mxu1 %vm953_vm0, %v7987_v44  ;;  %v4801_v44 = vld [vmem:[%s11471_s14 + $0x10] sm:$0xff] }
 0x6ca   : > { %v4382_v10 = vpop.permute.xlu1 %4381  ;;  %8784 = vmatprep.mubr.msk.f32.mxu1 %vm953_vm0, %v4410_v33 }
 0x6cc   : > { %v4377_v21 = vpop.permute.xlu0 %4376 }
 0x76f   : > { %v8702_v45 = vpop.f32.mrf.mxu1 }
 0x771   : > { %v3848_v46 = vpop.f32.mrf.mxu1 }
 0x774   : > { %v8705_v47 = vpop.f32.mrf.mxu1  ;;  %v8716_v48 = vpop.f32.mrf.mxu0 }
 0x775   : > { %v3975_v56 = vadd.f32 %v8716_v48, %v8702_v45  ;;  %v4802_v45 = vld [vmem:[%s11471_s14 + $0x18] sm:$0xff]  ;;  %v4799_v48 = vld [vmem:[%s11471_s14] sm:$0xff] }
 0x776   : > { %v3858_v49 = vpop.f32.mrf.mxu1  ;;  %v3969_v50 = vpop.f32.mrf.mxu0 }
 0x777   : > { %v3970_v59 = vadd.f32 %v3969_v50, %v3848_v46  ;;  %v4800_v46 = vld [vmem:[%s11471_s14 + $0x8] sm:$0xff]  ;;  %v4837_v50 = vld [vmem:[%s11473_s16] sm:$0xff] }
 0x77a   : > { %v8719_v51 = vpop.f32.mrf.mxu0  ;;  %v8730_v52 = vpop.f32.mrf.mxu1 }
 0x77b   : > { %v4091_v60 = vadd.f32 %v8730_v52, %v3975_v56  ;;  %v3985_v5 = vadd.f32 %v8719_v51, %v8705_v47  ;;  %v4840_v47 = vld [vmem:[%s11473_s16 + $0x18] sm:$0xff]  ;;  %v4838_v51 = vld [vmem:[%s11473_s16 + $0x8] sm:$0xff]  ;;  %v9306_v52 = vpop.permute.xlu1 %9305 }
 0x77c   : > { %v3979_v53 = vpop.f32.mrf.mxu0  ;;  %v4071_v54 = vpop.f32.mrf.mxu1 }
 0x77d   : > { %v4090_v6 = vadd.f32 %v4071_v54, %v3970_v59  ;;  %v3980_v11 = vadd.f32 %v3979_v53, %v3858_v49  ;;  %v4839_v49 = vld [vmem:[%s11473_s16 + $0x10] sm:$0xff]  ;;  %v9311_v54 = vpop.permute.xlu0 %9310 }
 0x77f   : > { %v9316_v53 = vpop.permute.xlu1 %9315 }
 0x780   : > { %v8733_v57 = vpop.f32.mrf.mxu1  ;;  %v8744_v58 = vpop.f32.mrf.mxu0 }
 0x781   : > { %v4237_v7 = vadd.f32 %v8744_v58, %v4091_v60  ;;  %v4093_v12 = vadd.f32 %v8733_v57, %v3985_v5  ;;  %v9307_v58 = vunpack.i.l.bf16 %v9306_v52  ;;  %v9308_v60 = vunpack.i.h.bf16 %v9306_v52 }
 0x782   : > { %v4081_v61 = vpop.f32.mrf.mxu1  ;;  %v4217_v62 = vpop.f32.mrf.mxu0  ;;  %v9317_v5 = vunpack.i.l.bf16 %v9316_v53 }
 0x783   : > { %v4236_v14 = vadd.f32 %v4217_v62, %v4090_v6  ;;  %v4092_v3 = vadd.f32 %v4081_v61, %v3980_v11  ;;  %v9312_v61 = vunpack.i.l.bf16 %v9311_v54 }
 0x784   : > { %v8747_v8 = vpop.f32.mrf.mxu0 }
 0x785   : > { %v8758_v9 = vpop.f32.mrf.mxu1  ;;  %v4239_v18 = vadd.f32 %v8747_v8, %v4093_v12  ;;  %v9318_v8 = vunpack.i.h.bf16 %v9316_v53 }
 0x786   : > { %v4367_v15 = vadd.f32 %v8758_v9, %v4237_v7  ;;  %v4227_v16 = vpop.f32.mrf.mxu0  ;;  %v9313_v9 = vunpack.i.h.bf16 %v9311_v54 }
 0x787   : > { %v4347_v2 = vpop.f32.mrf.mxu1  ;;  %v4238_v23 = vadd.f32 %v4227_v16, %v4092_v3  ;;  %v4411_v16 = vld [vmem:[#allocation12 + $0x8] sm:$0xff] }
 0x788   : > { %v4395_v19 = vadd.f32 %v4382_v10, %v4367_v15  ;;  %v4366_v20 = vadd.f32 %v4347_v2, %v4236_v14 }
 0x789   : > { %v8761_v22 = vpop.f32.mrf.mxu1 }
 0x78a   : > { %v4399_v13 = vmax.f32 %v4395_v19, 0.0  ;;  %v4394_v4 = vadd.f32 %v4377_v21, %v4366_v20  ;;  %v4369_v24 = vadd.f32 %v8761_v22, %v4239_v18  ;;  %v4412_v18 = vld [vmem:[#allocation12 + $0x10] sm:$0xff]  ;;  %v4413_v21 = vld [vmem:[#allocation12 + $0x18] sm:$0xff] }
 0x78b   : > { %v4357_v26 = vpop.f32.mrf.mxu1 }
 0x78c   : > { %v4403_v1 = vmul.f32 %v10139_v39, %v4399_v13  ;;  %v4398_v27 = vmax.f32 %v4394_v4, 0.0  ;;  %v4397_v28 = vadd.f32 %v4392_v55, %v4369_v24  ;;  %v4368_v29 = vadd.f32 %v4357_v26, %v4238_v23  ;;  %v4655_v13 = vld [vmem:[#allocation12 + $0x48] sm:$0xff]  ;;  %v4831_v23 = vld [vmem:[%s11472_s15] sm:$0xff]  ;;  %v4656_v4 = vld [vmem:[#allocation12 + $0x50] sm:$0xff] }
 0x78d   : > { %v4657_v24 = vld [vmem:[#allocation12 + $0x58] sm:$0xff] }
 0x78e   : > { %v4402_v30 = vmul.f32 %v10139_v39, %v4398_v27  ;;  %v4401_v31 = vmax.f32 %v4397_v28, 0.0  ;;  %v4396_v32 = vadd.f32 %v4387_v63, %v4368_v29  ;;  %4538 = vrot.lane.b32.xlu1 %v4403_v1, %s11568_s9 }
 0x790   : > { %v4405_v34 = vmul.f32 %v10139_v39, %v4401_v31  ;;  %v4400_v35 = vmax.f32 %v4396_v32, 0.0  ;;  %4534 = vrot.lane.b32.xlu0 %v4402_v30, %s11568_s9 }
 0x792   : > { %v4404_v36 = vmul.f32 %v10139_v39, %v4400_v35  ;;  %4680 = vrot.lane.b32.xlu1 %v9652_v0, %s11570_s29  ;;  %8762 = vmatprep.subr.mxu0 %v4405_v34 }
 0x793   : > { %8763 = vmatpush3.msra.mxu0 %v4405_v34 }
 0x794   : > { %8764 = vmatprep.subr.mxu0 %v4404_v36  ;;  %4546 = vrot.lane.b32.xlu0 %v4405_v34, %s11568_s9 }
 0x795   : > { %8765 = vmatpush3.msra.mxu0 %v4404_v36 }
 0x796   : > { %4542 = vrot.lane.b32.xlu1 %v4404_v36, %s11568_s9  ;;  %8766 = vmatprep.subr.mxu0 %v4403_v1 }
 0x797   : > { %8767 = vmatpush3.msra.mxu0 %v4403_v1 }
 0x798   : > { %4686 = vrot.lane.b32.xlu0 %v4405_v34, %s11570_s29  ;;  %8768 = vmatprep.subr.mxu0 %v4402_v30 }
 0x799   : > { %8769 = vmatpush3.msra.mxu0 %v4402_v30 }
 0x79a   : > { %4682 = vrot.lane.b32.xlu1 %v4404_v36, %s11570_s29  ;;  %8771 = vmatmul.mubr.msk.f32.vlgmr.msra.gmra.mxu0 %vm953_vm0, %v4424_v37 }
 0x79b   : > { %8773 = vmatprep.mubr.msk.f32.mxu0 %vm953_vm0, %v4425_v38 }
 0x79c   : > { %4678 = vrot.lane.b32.xlu0 %v4403_v1, %s11570_s29 }
 0x79e   : > { %4676 = vrot.lane.b32.xlu1 %v9652_v0, %s11570_s29  ;;  %8774 = vmatmul.mubr.msk.f32.gmra.mxu0 %vm953_vm0, %v4426_v41 }
 0x79f   : > { %8798 = vmatprep.mubr.msk.f32.mxu0 %vm953_vm0, %v4654_v42 }
 0x7a0   : > { %4674 = vrot.lane.b32.xlu0 %v4402_v30, %s11570_s29 }
 0x7a2   : > { %4815 = vperm.xlu1 %9217, %v4801_v44  }
 0x7a4   : > { %4820 = vperm.xlu0 %9218, %v4802_v45  }
 0x7a6   : > { %4810 = vperm.xlu1 %9217, %v4800_v46  }
 0x7a8   : > { %4858 = vperm.xlu0 %9218, %v4840_v47  }
 0x7aa   : > { %4805 = vperm.xlu1 %9217, %v4799_v48  }
 0x7ac   : > { %4853 = vperm.xlu0 %9218, %v4839_v49  }
 0x7ae   : > { %4843 = vperm.xlu1 %9217, %v4837_v50  }
 0x7b0   : > { %4848 = vperm.xlu0 %9218, %v4838_v51  }
 0x7b2   : > { %9325 = vrot.lane.b32.xlu1 %v9652_v0, %s11562_s23 }
 0x7b4   : > { %9320 = vrot.lane.b32.xlu0 %v9652_v0, %s11569_s13 }
 0x7b6   : > { %9330 = vrot.lane.b32.xlu1 %v9652_v0, %s11569_s13 }
 0x7b8   : > { %9340 = vrot.lane.b32.xlu0 %v9652_v0, %s11568_s9 }
 0x7ba   : > { %9335 = vrot.lane.b32.xlu1 %v9652_v0, %s11562_s23 }
 0x7bc   : > { %9355 = vrot.lane.b32.xlu0 %v9652_v0, %s11564_s27 }
 0x7be   : > { %9345 = vrot.lane.b32.xlu1 %v9652_v0, %s11568_s9 }
 0x7c0   : > { %9360 = vrot.lane.b32.xlu0 %v9652_v0, %s11570_s29 }
 0x7c2   : > { %9350 = vrot.lane.b32.xlu1 %v9652_v0, %s11570_s29 }
 0x7c4   : > { %9365 = vrot.lane.b32.xlu0 %v9652_v0, %s11564_s27 }
 0x800   : > { %v4539_v55 = vpop.permute.xlu1 %4538 }
 0x801   : > { %v4549_v10 = vsel %vm1160_vm3, %v9312_v61, %v4539_v55 }
 0x802   : > { %v4535_v56 = vpop.permute.xlu0 %4534 }
 0x803   : > { %v4548_v15 = vsel %vm1160_vm3, %v9313_v9, %v4535_v56 }
 0x804   : > { %v4681_v57 = vpop.permute.xlu1 %4680 }
 0x806   : > { %v4547_v59 = vpop.permute.xlu0 %4546 }
 0x807   : > { %v4551_v62 = vsel %vm1160_vm3, %v9307_v58, %v4547_v59 }
 0x808   : > { %v4543_v63 = vpop.permute.xlu1 %4542  ;;  %8776 = vmatprep.subr.mxu1 %v4551_v62 }
 0x809   : > { %8777 = vmatpush3.msra.mxu1 %v4551_v62  ;;  %v4550_v6 = vsel %vm1160_vm3, %v9308_v60, %v4543_v63 }
 0x80a   : > { %8778 = vmatprep.subr.mxu1 %v4550_v6  ;;  %v4687_v7 = vpop.permute.xlu0 %4686 }
 0x80b   : > { %8779 = vmatpush3.msra.mxu1 %v4550_v6  ;;  %v4693_v11 = vsel %vm1373_vm4, %v4687_v7, %v9317_v5 }
 0x80c   : > { %v4683_v12 = vpop.permute.xlu1 %4682  ;;  %8780 = vmatprep.subr.mxu1 %v4549_v10  ;;  %8790 = vmatprep.subr.mxu0 %v4693_v11 }
 0x80d   : > { %8781 = vmatpush3.msra.mxu1 %v4549_v10  ;;  %8791 = vmatpush3.msra.mxu0 %v4693_v11  ;;  %v4692_v14 = vsel %vm1373_vm4, %v4683_v12, %v9318_v8 }
 0x80e   : > { %8792 = vmatprep.subr.mxu0 %v4692_v14  ;;  %v4679_v2 = vpop.permute.xlu0 %4678  ;;  %8782 = vmatprep.subr.mxu1 %v4548_v15 }
 0x80f   : > { %8783 = vmatpush3.msra.mxu1 %v4548_v15  ;;  %8793 = vmatpush3.msra.mxu0 %v4692_v14  ;;  %v4691_v3 = vsel %vm1373_vm4, %v4679_v2, %v4681_v57 }
 0x810   : > { %8785 = vmatmul.mubr.msk.f32.vlgmr.msra.gmra.mxu1 %vm953_vm0, %v4411_v16  ;;  %8794 = vmatprep.subr.mxu0 %v4691_v3  ;;  %v4677_v19 = vpop.permute.xlu1 %4676 }
 0x811   : > { %8804 = vmatprep.subr.mxu1 %v10239_v40  ;;  %8795 = vmatpush3.msra.mxu0 %v4691_v3 }
 0x812   : > { %8805 = vmatpush3.msra.mxu1 %v10239_v40  ;;  %v4675_v20 = vpop.permute.xlu0 %4674  ;;  %8787 = vmatprep.mubr.msk.f32.mxu1 %vm953_vm0, %v4412_v18  ;;  %v4832_v40 = vld [vmem:[%s11472_s15 + $0x8] sm:$0xff] }
 0x813   : > { %8806 = vmatprep.subr.mxu1 %v10249_v43  ;;  %v4690_v22 = vsel %vm1373_vm4, %v4675_v20, %v4677_v19  ;;  %v8008_v19 = vld [vmem:[%s11474_s17 + $0x20] sm:$0xff] }
 0x814   : > { %8807 = vmatpush3.msra.mxu1 %v10249_v43  ;;  %8796 = vmatprep.subr.mxu0 %v4690_v22  ;;  %v4833_v43 = vld [vmem:[%s11472_s15 + $0x10] sm:$0xff]  ;;  %v4970_v20 = vld [vmem:[%s11474_s17] sm:$0xff] }
 0x815   : > { %8788 = vmatmul.mubr.msk.f32.gmra.mxu1 %vm953_vm0, %v4413_v21  ;;  %8797 = vmatpush3.msra.mxu0 %v4690_v22 }
 0x816   : > { %8799 = vmatmul.mubr.msk.f32.vlgmr.msra.gmra.mxu0 %vm953_vm0, %v4655_v13  ;;  %8808 = vmatprep.mubr.msk.f32.mxu1 %vm1843_vm11, %v4831_v23  ;;  %v6012_v13 = vld [vmem:[%s11475_s18 + $0x18] sm:$0xff]  ;;  %v6010_v23 = vld [vmem:[%s11475_s18 + $0x8] sm:$0xff] }
 0x817   : > { %8801 = vmatprep.mubr.msk.f32.mxu0 %vm953_vm0, %v4656_v4  ;;  %v6011_v4 = vld [vmem:[%s11475_s18 + $0x10] sm:$0xff] }
 0x819   : > { %8809 = vmatmul.mubr.msk.f32.vlgmr.msra.gmra.mxu1 %vm1843_vm11, %v4832_v40  ;;  %v6009_v40 = vld [vmem:[%s11475_s18] sm:$0xff] }
 0x81a   : > { %8802 = vmatmul.mubr.msk.f32.gmra.mxu0 %vm953_vm0, %v4657_v24  ;;  %8811 = vmatprep.mubr.msk.f32.mxu1 %vm1843_vm11, %v4833_v43 }
 0x81b   : > { %8822 = vmatprep.mubr.msk.f32.mxu0 %vm953_vm0, %v8008_v19 }
 0x81d   : > { %8812 = vmatmul.mubr.msk.f32.gmra.mxu1 %vm1843_vm11, %v4834_v25  ;;  %v4816_v28 = vpop.permute.xlu1 %4815 }
 0x81e   : > { %8836 = vmatprep.mubr.msk.f32.mxu1 %vm953_vm0, %v4970_v20 }
 0x81f   : > { %v4821_v26 = vpop.permute.xlu0 %4820 }
 0x821   : > { %v4811_v33 = vpop.permute.xlu1 %4810 }
 0x823   : > { %v4859_v29 = vpop.permute.xlu0 %4858 }
 0x825   : > { %v4806_v49 = vpop.permute.xlu1 %4805 }
 0x827   : > { %v4854_v34 = vpop.permute.xlu0 %4853 }
 0x829   : > { %v4844_v58 = vpop.permute.xlu1 %4843 }
 0x82b   : > { %v4849_v50 = vpop.permute.xlu0 %4848 }
 0x82d   : > { %v9326_v24 = vpop.permute.xlu1 %9325 }
 0x82f   : > { %v9321_v43 = vpop.permute.xlu0 %9320 }
 0x831   : > { %v9331_v25 = vpop.permute.xlu1 %9330 }
 0x85a   : > { %v8772_v1 = vpop.f32.mrf.mxu0 }
 0x85c   : > { %v4505_v27 = vpop.f32.mrf.mxu0 }
 0x85e   : > { %v8775_v31 = vpop.f32.mrf.mxu0 }
 0x860   : > { %v4515_v35 = vpop.f32.mrf.mxu0 }
 0x8d0   : > { %v8786_v30 = vpop.f32.mrf.mxu1 }
 0x8d1   : > { %v4640_v36 = vadd.f32 %v8786_v30, %v8772_v1  ;;  %v9336_v1 = vpop.permute.xlu1 %9335 }
 0x8d2   : > { %v4634_v32 = vpop.f32.mrf.mxu1 }
 0x8d3   : > { %v4635_v41 = vadd.f32 %v4634_v32, %v4505_v27 }
 0x8d5   : > { %v8789_v37 = vpop.f32.mrf.mxu1 }
 0x8d6   : > { %v8800_v38 = vpop.f32.mrf.mxu0  ;;  %v4650_v60 = vadd.f32 %v8789_v37, %v8775_v31 }
 0x8d7   : > { %v4644_v42 = vpop.f32.mrf.mxu1  ;;  %v4796_v44 = vadd.f32 %v8800_v38, %v4640_v36 }
 0x8d8   : > { %v4776_v45 = vpop.f32.mrf.mxu0  ;;  %v4645_v10 = vadd.f32 %v4644_v42, %v4515_v35 }
 0x8d9   : > { %v4824_v46 = vadd.f32 %v4811_v33, %v4796_v44  ;;  %v4795_v47 = vadd.f32 %v4776_v45, %v4635_v41  ;;  %v8810_v48 = vpop.f32.mrf.mxu1  ;;  %v9327_v45 = vunpack.i.l.bf16 %v9326_v24 }
 0x8da   : > { %v4945_v53 = vadd.f32 %v8810_v48, %v4849_v50  ;;  %v8803_v59 = vpop.f32.mrf.mxu0 }
 0x8db   : > { %v4828_v51 = vmax.f32 %v4824_v46, 0.0  ;;  %v4823_v52 = vadd.f32 %v4806_v49, %v4795_v47  ;;  %v4939_v55 = vpop.f32.mrf.mxu1  ;;  %v4798_v62 = vadd.f32 %v8803_v59, %v4650_v60  ;;  %v9322_v46 = vunpack.i.l.bf16 %v9321_v43 }
 0x8dc   : > { %v4940_v61 = vadd.f32 %v4939_v55, %v4844_v58  ;;  %v4786_v9 = vpop.f32.mrf.mxu0  ;;  %v9328_v55 = vunpack.i.h.bf16 %v9326_v24  ;;  %v9332_v60 = vunpack.i.l.bf16 %v9331_v25  ;;  %v4972_v24 = vld [vmem:[%s11474_s17 + $0x10] sm:$0xff] }
 0x8dd   : > { %v4959_v54 = vadd.f32 %v4945_v53, %v4828_v51  ;;  %v4827_v56 = vmax.f32 %v4823_v52, 0.0  ;;  %v4826_v5 = vadd.f32 %v4821_v26, %v4798_v62  ;;  %v8813_v7 = vpop.f32.mrf.mxu1  ;;  %v4797_v12 = vadd.f32 %v4786_v9, %v4645_v10  ;;  %v10833_v26 = vpop.permute.xlu0 %9340 }
 0x8de   : > { %v4955_v11 = vadd.f32 %v8813_v7, %v4859_v29  ;;  %v9338_v7 = vunpack.i.h.bf16 %v9336_v1 }
 0x8df   : > { %v10736_v57 = vmul.f32 %v10139_v39, %v4959_v54  ;;  %v4958_v63 = vadd.f32 %v4940_v61, %v4827_v56  ;;  %v4830_v8 = vmax.f32 %v4826_v5, 0.0  ;;  %v4825_v15 = vadd.f32 %v4816_v28, %v4797_v12  ;;  %v4949_v2 = vpop.f32.mrf.mxu1  ;;  %v10837_v28 = vpop.permute.xlu1 %9345 }
 0x8e0   : > { %v4950_v18 = vadd.f32 %v4949_v2, %v4854_v34  ;;  %v9323_v56 = vunpack.i.h.bf16 %v9321_v43  ;;  %v9337_v61 = vunpack.i.l.bf16 %v9336_v1  ;;  %v9333_v5 = vunpack.i.h.bf16 %v9331_v25  ;;  %v8009_v2 = vld [vmem:[%s11474_s17 + $0x28] sm:$0xff] }
 0x8e1   : > { %5498 = vrot.lane.b32.xlu1 %v10736_v57, %s11570_s29  ;;  %5001 = vrot.lane.b32.xlu0 %v10736_v57, %s11569_s13  ;;  %v10747_v6 = vmul.f32 %v10139_v39, %v4958_v63  ;;  %v4961_v14 = vadd.f32 %v4955_v11, %v4830_v8  ;;  %v4829_v3 = vmax.f32 %v4825_v15, 0.0  ;;  %v10835_v27 = vpop.permute.xlu0 %9355  ;;  %v9342_v12 = vunpack.i.l.bf16 %v10833_v26 }
 0x8e2   : > { %v9348_v1 = vunpack.i.h.bf16 %v10837_v28 }
 0x8e3   : > { %v10762_v16 = vmul.f32 %v10139_v39, %v4961_v14  ;;  %v4960_v21 = vadd.f32 %v4950_v18, %v4829_v3  ;;  %v10841_v30 = vpop.permute.xlu1 %9350  ;;  %v4971_v3 = vld [vmem:[%s11474_s17 + $0x8] sm:$0xff]  ;;  %v9343_v18 = vunpack.i.h.bf16 %v10833_v26 }
 0x8e5   : > { %5628 = vrot.lane.b32.xlu1 %v10736_v57, %s11564_s27  ;;  %5122 = vrot.lane.b32.xlu0 %v10736_v57, %s11562_s23  ;;  %v10785_v22 = vmul.f32 %v10139_v39, %v4960_v21  ;;  %v10839_v29 = vpop.permute.xlu0 %9360 }
 0x8e9   : > { %5248 = vrot.lane.b32.xlu0 %v10736_v57, %s11568_s9  ;;  %5118 = vrot.lane.b32.xlu1 %v10747_v6, %s11562_s23  ;;  %v10843_v31 = vpop.permute.xlu0 %9365 }
 0x8ed   : > { %5244 = vrot.lane.b32.xlu1 %v10747_v6, %s11568_s9  ;;  %4997 = vrot.lane.b32.xlu0 %v10747_v6, %s11569_s13 }
 0x8f1   : > { %5624 = vrot.lane.b32.xlu1 %v10747_v6, %s11564_s27  ;;  %5494 = vrot.lane.b32.xlu0 %v10747_v6, %s11570_s29 }
 0x8f5   : > { %5009 = vrot.lane.b32.xlu1 %v10762_v16, %s11569_s13  ;;  %5130 = vrot.lane.b32.xlu0 %v10762_v16, %s11562_s23 }
 0x8f9   : > { %5256 = vrot.lane.b32.xlu1 %v10762_v16, %s11568_s9  ;;  %5506 = vrot.lane.b32.xlu0 %v10762_v16, %s11570_s29 }
 0x8fd   : > { %5636 = vrot.lane.b32.xlu1 %v10762_v16, %s11564_s27  ;;  %5766 = vrot.lane.b32.xlu0 %v10762_v16, %s11565_s30 }
 0x901   : > { %5126 = vrot.lane.b32.xlu1 %v10785_v22, %s11562_s23  ;;  %5005 = vrot.lane.b32.xlu0 %v10785_v22, %s11569_s13 }
 0x905   : > { %9370 = vrot.lane.b32.xlu1 %v9652_v0, %s11565_s30  ;;  %9375 = vrot.lane.b32.xlu0 %v9652_v0, %s11566_s1 }
 0x909   : > { %5896 = vrot.lane.b32.xlu1 %v10762_v16, %s11566_s1  ;;  %5252 = vrot.lane.b32.xlu0 %v10785_v22, %s11568_s9 }
 0x90d   : > { %5758 = vrot.lane.b32.xlu1 %v10736_v57, %s11565_s30  ;;  %9380 = vrot.lane.b32.xlu0 %v9652_v0, %s11565_s30 }
 0x911   : > { %5632 = vrot.lane.b32.xlu1 %v10785_v22, %s11564_s27  ;;  %5502 = vrot.lane.b32.xlu0 %v10785_v22, %s11570_s29 }
 0x915   : > { %5888 = vrot.lane.b32.xlu1 %v10736_v57, %s11566_s1  ;;  %5754 = vrot.lane.b32.xlu0 %v10747_v6, %s11565_s30 }
 0x919   : > { %5892 = vrot.lane.b32.xlu1 %v10785_v22, %s11566_s1  ;;  %5762 = vrot.lane.b32.xlu0 %v10785_v22, %s11565_s30 }
 0x91d   : > { %5884 = vrot.lane.b32.xlu1 %v10747_v6, %s11566_s1  ;;  %5890 = vrot.lane.b32.xlu0 %v9652_v0, %s11566_s1 }
 0x921   : > { %6030 = vperm.xlu1 %9217, %v6012_v13   ;;  %5886 = vrot.lane.b32.xlu0 %v9652_v0, %s11566_s1 }
 0x925   : > { %6020 = vperm.xlu1 %9217, %v6010_v23   ;;  %6025 = vperm.xlu0 %9218, %v6011_v4   ;;  %v8010_v23 = vld [vmem:[%s11474_s17 + $0x30] sm:$0xff]  ;;  %v8011_v4 = vld [vmem:[%s11474_s17 + $0x38] sm:$0xff] }
 0x929   : > { %6015 = vperm.xlu0 %9218, %v6009_v40   ;;  %v9347_v40 = vunpack.i.l.bf16 %v10837_v28  ;;  %v8021_v28 = vld [vmem:[%s11474_s17 + $0x48] sm:$0xff]  ;;  %9385 = vrot.lane.b32.xlu1 %v9652_v0, %s11568_s9 }
 0x92d   : > { %9390 = vrot.lane.b32.xlu0 %v9652_v0, %s11568_s9  ;;  %9395 = vrot.lane.b32.xlu1 %v9652_v0, %s11569_s13 }
 0x931   : > { %9400 = vrot.lane.b32.xlu0 %v9652_v0, %s11569_s13  ;;  %9410 = vrot.lane.b32.xlu1 %v9652_v0, %s11564_s27 }
 0x935   : > { %9405 = vrot.lane.b32.xlu0 %v9652_v0, %s11570_s29 }
 0x953   : > { %v10845_v32 = vpop.permute.xlu1 %5498  ;;  %v5002_v33 = vpop.permute.xlu0 %5001 }
 0x954   : > { %v5012_v8 = vsel %vm944_vm1, %v9332_v60, %v5002_v33  ;;  %v8020_v33 = vld [vmem:[%s11474_s17 + $0x40] sm:$0xff]  ;;  %v9363_v60 = vunpack.i.h.bf16 %v10839_v29 }
 0x957   : > { %v10847_v34 = vpop.permute.xlu1 %5628  ;;  %v5123_v35 = vpop.permute.xlu0 %5122 }
 0x958   : > { %v5133_v9 = vsel %vm1051_vm2, %v9337_v61, %v5123_v35  ;;  %v9368_v61 = vunpack.i.h.bf16 %v10843_v31 }
 0x95b   : > { %v10849_v36 = vpop.permute.xlu0 %5248  ;;  %v5119_v37 = vpop.permute.xlu1 %5118 }
 0x95c   : > { %v5132_v15 = vsel %vm1051_vm2, %v9338_v7, %v5119_v37  ;;  %v5259_v26 = vsel %vm1160_vm3, %v9347_v40, %v10849_v36  ;;  %v9352_v36 = vunpack.i.l.bf16 %v10841_v30  ;;  %v8044_v7 = vld [vmem:[%s11474_s17 + $0xa0] sm:$0xff] }
 0x95f   : > { %v10851_v38 = vpop.permute.xlu1 %5244  ;;  %v4998_v41 = vpop.permute.xlu0 %4997 }
 0x960   : > { %v5011_v14 = vsel %vm944_vm1, %v9333_v5, %v4998_v41  ;;  %v8028_v41 = vld [vmem:[%s11474_s17 + $0x60] sm:$0xff] }
 0x963   : > { %v10853_v42 = vpop.permute.xlu1 %5624  ;;  %v10855_v44 = vpop.permute.xlu0 %5494 }
 0x967   : > { %v5010_v47 = vpop.permute.xlu1 %5009  ;;  %v5131_v48 = vpop.permute.xlu0 %5130 }
 0x968   : > { %v5014_v49 = vsel %vm944_vm1, %v9322_v46, %v5010_v47  ;;  %v5135_v50 = vsel %vm1051_vm2, %v9327_v45, %v5131_v48  ;;  %v9357_v45 = vunpack.i.l.bf16 %v10835_v27  ;;  %v8029_v46 = vld [vmem:[%s11474_s17 + $0x68] sm:$0xff] }
 0x969   : > { %8814 = vmatprep.subr.mxu0 %v5014_v49  ;;  %8828 = vmatprep.subr.mxu1 %v5135_v50 }
 0x96a   : > { %8815 = vmatpush3.msra.mxu0 %v5014_v49  ;;  %8829 = vmatpush3.msra.mxu1 %v5135_v50  ;;  %v8023_v50 = vld [vmem:[%s11474_s17 + $0x58] sm:$0xff] }
 0x96b   : > { %v5257_v51 = vpop.permute.xlu1 %5256  ;;  %v10859_v52 = vpop.permute.xlu0 %5506 }
 0x96c   : > { %v5261_v19 = vsel %vm1160_vm3, %v9342_v12, %v5257_v51  ;;  %v5513_v47 = vsel %vm1373_vm4, %v10859_v52, %v9352_v36  ;;  %v9362_v51 = vunpack.i.l.bf16 %v10839_v29  ;;  %v5510_v29 = vsel %vm1373_vm4, %v10855_v44, %v9363_v60 }
 0x96f   : > { %v10861_v53 = vpop.permute.xlu1 %5636  ;;  %v10863_v54 = vpop.permute.xlu0 %5766 }
 0x973   : > { %v5127_v58 = vpop.permute.xlu1 %5126  ;;  %v5006_v59 = vpop.permute.xlu0 %5005 }
 0x974   : > { %v5013_v62 = vsel %vm944_vm1, %v9323_v56, %v5006_v59  ;;  %v5134_v63 = vsel %vm1051_vm2, %v9328_v55, %v5127_v58  ;;  %v9367_v55 = vunpack.i.l.bf16 %v10843_v31  ;;  %v8031_v56 = vld [vmem:[%s11474_s17 + $0x78] sm:$0xff]  ;;  %v5511_v58 = vsel %vm1373_vm4, %v10845_v32, %v9362_v51  ;;  %v8036_v32 = vld [vmem:[%s11474_s17 + $0x80] sm:$0xff] }
 0x975   : > { %8816 = vmatprep.subr.mxu0 %v5013_v62  ;;  %8830 = vmatprep.subr.mxu1 %v5134_v63  ;;  %v5640_v31 = vsel %vm1484_vm5, %v10853_v42, %v9368_v61  ;;  %v8045_v42 = vld [vmem:[%s11474_s17 + $0xa8] sm:$0xff]  ;;  %vm7576_vm2 = vcmask 1044484  }
 0x976   : > { %8817 = vmatpush3.msra.mxu0 %v5013_v62  ;;  %8831 = vmatpush3.msra.mxu1 %v5134_v63  ;;  %v5641_v62 = vsel %vm1484_vm5, %v10847_v34, %v9367_v55  ;;  %v8037_v34 = vld [vmem:[%s11474_s17 + $0x88] sm:$0xff] }
 0x977   : > { %v10869_v10 = vpop.permute.xlu1 %9370  ;;  %8818 = vmatprep.subr.mxu0 %v5012_v8  ;;  %8832 = vmatprep.subr.mxu1 %v5133_v9  ;;  %v10871_v11 = vpop.permute.xlu0 %9375 }
 0x978   : > { %8819 = vmatpush3.msra.mxu0 %v5012_v8  ;;  %8833 = vmatpush3.msra.mxu1 %v5133_v9  ;;  %v9372_v63 = vunpack.i.l.bf16 %v10869_v10  ;;  %v9373_v8 = vunpack.i.h.bf16 %v10869_v10  ;;  %v9378_v9 = vunpack.i.h.bf16 %v10871_v11  ;;  %v9377_v44 = vunpack.i.l.bf16 %v10871_v11 }
 0x979   : > { %8820 = vmatprep.subr.mxu0 %v5011_v14  ;;  %8834 = vmatprep.subr.mxu1 %v5132_v15 }
 0x97a   : > { %8821 = vmatpush3.msra.mxu0 %v5011_v14  ;;  %8835 = vmatpush3.msra.mxu1 %v5132_v15  ;;  %v5773_v12 = vsel %vm1595_vm6, %v10863_v54, %v9372_v63  ;;  %v8038_v54 = vld [vmem:[%s11474_s17 + $0x90] sm:$0xff] }
 0x97b   : > { %v10884_v20 = vpop.permute.xlu1 %5896  ;;  %8823 = vmatmul.mubr.msk.f32.vlgmr.msra.gmra.mxu0 %vm953_vm0, %v8009_v2  ;;  %8842 = vmatprep.subr.mxu0 %v5261_v19  ;;  %v5253_v21 = vpop.permute.xlu0 %5252 }
 0x97c   : > { %8856 = vmatprep.subr.mxu1 %v10762_v16  ;;  %8837 = vmatmul.mubr.msk.f32.vlgmr.msra.gmra.mxu1 %vm953_vm0, %v4971_v3  ;;  %v5260_v13 = vsel %vm1160_vm3, %v9343_v18, %v5253_v21  ;;  %v5903_v10 = vsel %vm1706_vm7, %v10884_v20, %v9377_v44  ;;  %v8039_v3 = vld [vmem:[%s11474_s17 + $0x98] sm:$0xff]  ;;  %v8046_v18 = vld [vmem:[%s11474_s17 + $0xb0] sm:$0xff] }
 0x97d   : > { %8843 = vmatpush3.msra.mxu0 %v5261_v19  ;;  %8857 = vmatpush3.msra.mxu1 %v10762_v16  ;;  %v4973_v16 = vld [vmem:[%s11474_s17 + $0x18] sm:$0xff] }
 0x97e   : > { %8844 = vmatprep.subr.mxu0 %v5260_v13  ;;  %8858 = vmatprep.subr.mxu1 %v10785_v22  ;;  %v8047_v19 = vld [vmem:[%s11474_s17 + $0xb8] sm:$0xff] }
 0x97f   : > { %8825 = vmatprep.mubr.msk.f32.mxu0 %vm953_vm0, %v8010_v23  ;;  %8845 = vmatpush3.msra.mxu0 %v5260_v13  ;;  %v10903_v43 = vpop.permute.xlu1 %5758  ;;  %v10905_v25 = vpop.permute.xlu0 %9380 }
 0x980   : > { %8859 = vmatpush3.msra.mxu1 %v10785_v22  ;;  %8826 = vmatmul.mubr.msk.f32.gmra.mxu0 %vm953_vm0, %v8011_v4  ;;  %v5258_v22 = vsel %vm1160_vm3, %v9348_v1, %v10851_v38  ;;  %v9353_v38 = vunpack.i.h.bf16 %v10841_v30  ;;  %v9382_v2 = vunpack.i.l.bf16 %v10905_v25  ;;  %v9383_v20 = vunpack.i.h.bf16 %v10905_v25  ;;  %v8052_v4 = vld [vmem:[%s11474_s17 + $0xc0] sm:$0xff]  ;;  %v8061_v1 = vld [vmem:[%s11474_s17 + $0xe8] sm:$0xff] }
 0x981   : > { %8839 = vmatprep.mubr.msk.f32.mxu1 %vm953_vm0, %v4972_v24  ;;  %8846 = vmatprep.subr.mxu0 %v5259_v26 }
 0x982   : > { %8860 = vmatprep.subr.mxu1 %v10736_v57  ;;  %8840 = vmatmul.mubr.msk.f32.gmra.mxu1 %vm953_vm0, %v4973_v16  ;;  %v5771_v21 = vsel %vm1595_vm6, %v10903_v43, %v9382_v2  ;;  %v8053_v43 = vld [vmem:[%s11474_s17 + $0xc8] sm:$0xff]  ;;  %v8054_v16 = vld [vmem:[%s11474_s17 + $0xd0] sm:$0xff] }
 0x983   : > { %8847 = vmatpush3.msra.mxu0 %v5259_v26  ;;  %8861 = vmatpush3.msra.mxu1 %v10736_v57  ;;  %v5503_v35 = vpop.permute.xlu0 %5502  ;;  %v5633_v37 = vpop.permute.xlu1 %5632  ;;  %v9358_v57 = vunpack.i.h.bf16 %v10835_v27  ;;  %v5643_v27 = vsel %vm1484_vm5, %v10861_v53, %v9357_v45  ;;  %v8030_v53 = vld [vmem:[%s11474_s17 + $0x70] sm:$0xff]  ;;  %v8060_v26 = vld [vmem:[%s11474_s17 + $0xe0] sm:$0xff] }
 0x984   : > { %8848 = vmatprep.subr.mxu0 %v5258_v22  ;;  %8862 = vmatprep.subr.mxu1 %v10747_v6  ;;  %v5512_v30 = vsel %vm1373_vm4, %v5503_v35, %v9353_v38 }
 0x985   : > { %8849 = vmatpush3.msra.mxu0 %v5258_v22  ;;  %8850 = vmatprep.mubr.msk.f32.mxu0 %vm953_vm0, %v8020_v33  ;;  %v5642_v48 = vsel %vm1484_vm5, %v5633_v37, %v9358_v57  ;;  %v8055_v33 = vld [vmem:[%s11474_s17 + $0xd8] sm:$0xff]  ;;  %v8062_v22 = vld [vmem:[%s11474_s17 + $0xf0] sm:$0xff] }
 0x986   : > { %8863 = vmatpush3.msra.mxu1 %v10747_v6  ;;  %8851 = vmatmul.mubr.msk.f32.vlgmr.msra.gmra.mxu0 %vm953_vm0, %v8021_v28  ;;  %v8022_v6 = vld [vmem:[%s11474_s17 + $0x50] sm:$0xff]  ;;  %v8063_v28 = vld [vmem:[%s11474_s17 + $0xf8] sm:$0xff] }
 0x987   : > { %8864 = vmatprep.mubr.msk.f32.mxu1 %vm953_vm0, %v8028_v41  ;;  %8870 = vmatprep.subr.mxu0 %v5513_v47  ;;  %v10948_v49 = vpop.permute.xlu0 %5754  ;;  %v5889_v52 = vpop.permute.xlu1 %5888 }
 0x988   : > { %8884 = vmatprep.subr.mxu1 %v5643_v27  ;;  %8865 = vmatmul.mubr.msk.f32.vlgmr.msra.gmra.mxu1 %vm953_vm0, %v8029_v46  ;;  %v5770_v24 = vsel %vm1595_vm6, %v10948_v49, %v9383_v20 }
 0x989   : > { %8871 = vmatpush3.msra.mxu0 %v5513_v47  ;;  %8885 = vmatpush3.msra.mxu1 %v5643_v27 }
 0x98a   : > { %8872 = vmatprep.subr.mxu0 %v5512_v30  ;;  %8886 = vmatprep.subr.mxu1 %v5642_v48 }
 0x98b   : > { %8853 = vmatprep.mubr.msk.f32.mxu0 %vm953_vm0, %v8022_v6  ;;  %8873 = vmatpush3.msra.mxu0 %v5512_v30  ;;  %v5763_v59 = vpop.permute.xlu0 %5762  ;;  %v5893_v5 = vpop.permute.xlu1 %5892 }
 0x98c   : > { %8887 = vmatpush3.msra.mxu1 %v5642_v48  ;;  %8854 = vmatmul.mubr.msk.f32.gmra.mxu0 %vm953_vm0, %v8023_v50  ;;  %v5772_v11 = vsel %vm1595_vm6, %v5763_v59, %v9373_v8  ;;  %v5902_v15 = vsel %vm1706_vm7, %v5893_v5, %v9378_v9  ;;  %vm7706_vm6 = vcmask 3072  }
 0x98d   : > { %8867 = vmatprep.mubr.msk.f32.mxu1 %vm953_vm0, %v8030_v53  ;;  %8874 = vmatprep.subr.mxu0 %v5511_v58 }
 0x98e   : > { %8888 = vmatprep.subr.mxu1 %v5641_v62  ;;  %8868 = vmatmul.mubr.msk.f32.gmra.mxu1 %vm953_vm0, %v8031_v56 }
 0x98f   : > { %8875 = vmatpush3.msra.mxu0 %v5511_v58  ;;  %8889 = vmatpush3.msra.mxu1 %v5641_v62  ;;  %v5891_v14 = vpop.permute.xlu0 %5890  ;;  %v5885_v40 = vpop.permute.xlu1 %5884 }
 0x990   : > { %8876 = vmatprep.subr.mxu0 %v5510_v29  ;;  %8890 = vmatprep.subr.mxu1 %v5640_v31  ;;  %v5901_v13 = vsel %vm1706_vm7, %v5889_v52, %v5891_v14 }
 0x991   : > { %8877 = vmatpush3.msra.mxu0 %v5510_v29  ;;  %8878 = vmatprep.mubr.msk.f32.mxu0 %vm953_vm0, %v8036_v32 }
 0x992   : > { %8891 = vmatpush3.msra.mxu1 %v5640_v31  ;;  %8879 = vmatmul.mubr.msk.f32.vlgmr.msra.gmra.mxu0 %vm953_vm0, %v8037_v34 }
 0x993   : > { %8892 = vmatprep.mubr.msk.f32.mxu1 %vm953_vm0, %v8044_v7  ;;  %8898 = vmatprep.subr.mxu0 %v5773_v12  ;;  %v5887_v23 = vpop.permute.xlu0 %5886 }
 0x994   : > { %8912 = vmatprep.subr.mxu1 %v5903_v10  ;;  %8893 = vmatmul.mubr.msk.f32.vlgmr.msra.gmra.mxu1 %vm953_vm0, %v8045_v42  ;;  %v5900_v25 = vsel %vm1706_vm7, %v5885_v40, %v5887_v23 }
 0x995   : > { %8899 = vmatpush3.msra.mxu0 %v5773_v12  ;;  %8913 = vmatpush3.msra.mxu1 %v5903_v10 }
 0x996   : > { %8900 = vmatprep.subr.mxu0 %v5772_v11  ;;  %8914 = vmatprep.subr.mxu1 %v5902_v15 }
 0x997   : > { %8881 = vmatprep.mubr.msk.f32.mxu0 %vm953_vm0, %v8038_v54  ;;  %8901 = vmatpush3.msra.mxu0 %v5772_v11 }
 0x998   : > { %8915 = vmatpush3.msra.mxu1 %v5902_v15  ;;  %8882 = vmatmul.mubr.msk.f32.gmra.mxu0 %vm953_vm0, %v8039_v3 }
 0x999   : > { %8902 = vmatprep.subr.mxu0 %v5771_v21  ;;  %8895 = vmatprep.mubr.msk.f32.mxu1 %vm953_vm0, %v8046_v18 }
 0x99a   : > { %8903 = vmatpush3.msra.mxu0 %v5771_v21  ;;  %8896 = vmatmul.mubr.msk.f32.gmra.mxu1 %vm953_vm0, %v8047_v19 }
 0x99b   : > { %8904 = vmatprep.subr.mxu0 %v5770_v24  ;;  %8916 = vmatprep.subr.mxu1 %v5901_v13 }
 0x99c   : > { %8905 = vmatpush3.msra.mxu0 %v5770_v24  ;;  %8906 = vmatprep.mubr.msk.f32.mxu0 %vm953_vm0, %v8052_v4  ;;  %v6031_v42 = vpop.permute.xlu1 %6030 }
 0x99d   : > { %8917 = vmatpush3.msra.mxu1 %v5901_v13  ;;  %8907 = vmatmul.mubr.msk.f32.vlgmr.msra.gmra.mxu0 %vm953_vm0, %v8053_v43 }
 0x99e   : > { %8918 = vmatprep.subr.mxu1 %v5900_v25  ;;  %8909 = vmatprep.mubr.msk.f32.mxu0 %vm953_vm0, %v8054_v16 }
 0x99f   : > { %8919 = vmatpush3.msra.mxu1 %v5900_v25  ;;  %8920 = vmatprep.mubr.msk.f32.mxu1 %vm953_vm0, %v8060_v26 }
 0x9a0   : > { %8921 = vmatmul.mubr.msk.f32.vlgmr.msra.gmra.mxu1 %vm953_vm0, %v8061_v1  ;;  %v6026_v15 = vpop.permute.xlu0 %6025  ;;  %v6021_v40 = vpop.permute.xlu1 %6020 }
 0x9a1   : > { %8910 = vmatmul.mubr.msk.f32.gmra.mxu0 %vm953_vm0, %v8055_v33  ;;  %8923 = vmatprep.mubr.msk.f32.mxu1 %vm953_vm0, %v8062_v22 }
 0x9a4   : > { %8924 = vmatmul.mubr.msk.f32.gmra.mxu1 %vm953_vm0, %v8063_v28  ;;  %v6016_v1 = vpop.permute.xlu0 %6015 }
 0xa3b   : > { %v8824_v35 = vpop.f32.mrf.mxu0 }
 0xa3c   : > { %v8838_v36 = vpop.f32.mrf.mxu1 }
 0xa3d   : > { %v5097_v37 = vpop.f32.mrf.mxu0  ;;  %v5224_v52 = vadd.f32 %v8838_v36, %v8824_v35 }
 0xa3e   : > { %v5218_v41 = vpop.f32.mrf.mxu1 }
 0xa3f   : > { %v5219_v55 = vadd.f32 %v5218_v41, %v5097_v37 }
 0xa40   : > { %v8827_v57 = vpop.f32.mrf.mxu0 }
 0xa42   : > { %v5107_v45 = vpop.f32.mrf.mxu0  ;;  %v8841_v38 = vpop.f32.mrf.mxu1 }
 0xa43   : > { %v5234_v60 = vadd.f32 %v8841_v38, %v8827_v57 }
 0xa44   : > { %v5228_v46 = vpop.f32.mrf.mxu1 }
 0xa45   : > { %v5229_v8 = vadd.f32 %v5228_v46, %v5107_v45 }
 0xa46   : > { %v8852_v47 = vpop.f32.mrf.mxu0 }
 0xa47   : > { %v5364_v56 = vadd.f32 %v8852_v47, %v5224_v52  ;;  %v6049_v52 = vld [vmem:[%s11476_s19] sm:$0xff] }
 0xa48   : > { %v5344_v27 = vpop.f32.mrf.mxu0  ;;  %v8866_v30 = vpop.f32.mrf.mxu1  ;;  %8948 = vmatprep.mubr.msk.f32.mxu1 %vm953_vm0, %v6049_v52 }
 0xa49   : > { %v5363_v61 = vadd.f32 %v5344_v27, %v5219_v55  ;;  %v5470_v63 = vadd.f32 %v8866_v30, %v5364_v56  ;;  %v6700_v55 = vld [vmem:[%s11477_s20 + $0x10] sm:$0xff]  ;;  %v6699_v56 = vld [vmem:[%s11477_s20 + $0x8] sm:$0xff] }
 0xa4a   : > { %v5450_v48 = vpop.f32.mrf.mxu1 }
 0xa4b   : > { %v5469_v31 = vadd.f32 %v5450_v48, %v5363_v61 }
 0xa4c   : > { %v8855_v49 = vpop.f32.mrf.mxu0 }
 0xa4d   : > { %v5366_v32 = vadd.f32 %v8855_v49, %v5234_v60  ;;  %v9391_v60 = vpop.permute.xlu0 %9390 }
 0xa4e   : > { %v5354_v6 = vpop.f32.mrf.mxu0  ;;  %v8869_v50 = vpop.f32.mrf.mxu1 }
 0xa4f   : > { %v5472_v9 = vadd.f32 %v8869_v50, %v5366_v32  ;;  %v5365_v12 = vadd.f32 %v5354_v6, %v5229_v8  ;;  %v8068_v6 = vld [vmem:[%s11476_s19 + $0x20] sm:$0xff] }
 0xa50   : > { %v5460_v51 = vpop.f32.mrf.mxu1  ;;  %8934 = vmatprep.mubr.msk.f32.mxu0 %vm953_vm0, %v8068_v6 }
 0xa51   : > { %v5471_v20 = vadd.f32 %v5460_v51, %v5365_v12 }
 0xa52   : > { %v8880_v53 = vpop.f32.mrf.mxu0 }
 0xa53   : > { %v5616_v34 = vadd.f32 %v8880_v53, %v5470_v63  ;;  %v6701_v53 = vld [vmem:[%s11477_s20 + $0x18] sm:$0xff] }
 0xa54   : > { %v5596_v58 = vpop.f32.mrf.mxu0  ;;  %v8894_v59 = vpop.f32.mrf.mxu1 }
 0xa55   : > { %v5615_v44 = vadd.f32 %v5596_v58, %v5469_v31  ;;  %v5746_v14 = vadd.f32 %v8894_v59, %v5616_v34  ;;  %v6698_v58 = vld [vmem:[%s11477_s20] sm:$0xff]  ;;  %v9386_v59 = vpop.permute.xlu1 %9385 }
 0xa56   : > { %v5726_v62 = vpop.f32.mrf.mxu1  ;;  %v9387_v8 = vunpack.i.l.bf16 %v9386_v59 }
 0xa57   : > { %v5745_v54 = vadd.f32 %v5726_v62, %v5615_v44  ;;  %v9401_v62 = vpop.permute.xlu0 %9400 }
 0xa58   : > { %v8883_v29 = vpop.f32.mrf.mxu0 }
 0xa59   : > { %v5618_v10 = vadd.f32 %v8883_v29, %v5472_v9  ;;  %v9396_v61 = vpop.permute.xlu1 %9395 }
 0xa5a   : > { %v5606_v5 = vpop.f32.mrf.mxu0  ;;  %v8897_v7 = vpop.f32.mrf.mxu1 }
 0xa5b   : > { %v5748_v21 = vadd.f32 %v8897_v7, %v5618_v10  ;;  %v5617_v43 = vadd.f32 %v5606_v5, %v5471_v20  ;;  %v11145_v32 = vpop.permute.xlu0 %9405 }
 0xa5c   : > { %v5736_v2 = vpop.f32.mrf.mxu1 }
 0xa5d   : > { %v8908_v11 = vpop.f32.mrf.mxu0  ;;  %v5747_v37 = vadd.f32 %v5736_v2, %v5617_v43  ;;  %v11143_v63 = vpop.permute.xlu1 %9410  ;;  %v9403_v43 = vunpack.i.h.bf16 %v9401_v62 }
 0xa5e   : > { %v5876_v3 = vadd.f32 %v8908_v11, %v5746_v14  ;;  %v9388_v14 = vunpack.i.h.bf16 %v9386_v59  ;;  %v9392_v11 = vunpack.i.l.bf16 %v9391_v60  ;;  %v8083_v59 = vld [vmem:[%s11476_s19 + $0x58] sm:$0xff] }
 0xa5f   : > { %v5856_v18 = vpop.f32.mrf.mxu0 }
 0xa60   : > { %v8922_v19 = vpop.f32.mrf.mxu1  ;;  %v5875_v13 = vadd.f32 %v5856_v18, %v5745_v54  ;;  %v9398_v18 = vunpack.i.h.bf16 %v9396_v61 }
 0xa61   : > { %v8911_v23 = vpop.f32.mrf.mxu0  ;;  %v6006_v4 = vadd.f32 %v8922_v19, %v5876_v3  ;;  %v9393_v3 = vunpack.i.h.bf16 %v9391_v60  ;;  %v8089_v60 = vld [vmem:[%s11476_s19 + $0x68] sm:$0xff] }
 0xa62   : > { %v5986_v24 = vpop.f32.mrf.mxu1  ;;  %v5878_v25 = vadd.f32 %v8911_v23, %v5748_v21 }
 0xa63   : > { %v6034_v16 = vadd.f32 %v6021_v40, %v6006_v4  ;;  %v6005_v26 = vadd.f32 %v5986_v24, %v5875_v13  ;;  %v5866_v36 = vpop.f32.mrf.mxu0  ;;  %v9402_v13 = vunpack.i.l.bf16 %v9401_v62  ;;  %v8069_v40 = vld [vmem:[%s11476_s19 + $0x28] sm:$0xff]  ;;  %v8090_v62 = vld [vmem:[%s11476_s19 + $0x70] sm:$0xff] }
 0xa64   : > { %v8925_v33 = vpop.f32.mrf.mxu1  ;;  %v5877_v38 = vadd.f32 %v5866_v36, %v5747_v37 }
 0xa65   : > { %v6038_v22 = vmax.f32 %v6034_v16, 0.0  ;;  %v6033_v28 = vadd.f32 %v6016_v1, %v6005_v26  ;;  %v6008_v35 = vadd.f32 %v8925_v33, %v5878_v25  ;;  %v8070_v26 = vld [vmem:[%s11476_s19 + $0x30] sm:$0xff]  ;;  %v8071_v33 = vld [vmem:[%s11476_s19 + $0x38] sm:$0xff] }
 0xa66   : > { %v5996_v45 = vpop.f32.mrf.mxu1 }
 0xa67   : > { %v11074_v41 = vmul.f32 %v10139_v39, %v6038_v22  ;;  %v6037_v57 = vmax.f32 %v6033_v28, 0.0  ;;  %v6036_v47 = vadd.f32 %v6031_v42, %v6008_v35  ;;  %v6007_v27 = vadd.f32 %v5996_v45, %v5877_v38  ;;  %v6050_v22 = vld [vmem:[%s11476_s19 + $0x8] sm:$0xff]  ;;  %v6051_v38 = vld [vmem:[%s11476_s19 + $0x10] sm:$0xff] }
 0xa68   : > { %v9408_v28 = vunpack.i.h.bf16 %v11145_v32  ;;  %v9407_v35 = vunpack.i.l.bf16 %v11145_v32  ;;  %v8096_v32 = vld [vmem:[%s11476_s19 + $0x80] sm:$0xff] }
 0xa69   : > { %v11077_v46 = vmul.f32 %v10139_v39, %v6037_v57  ;;  %6080 = vrot.lane.b32.xlu1 %v11074_v41, %s11568_s9  ;;  %v6040_v30 = vmax.f32 %v6036_v47, 0.0  ;;  %v6035_v48 = vadd.f32 %v6026_v15, %v6007_v27  ;;  %v9397_v15 = vunpack.i.l.bf16 %v9396_v61  ;;  %v8080_v47 = vld [vmem:[%s11476_s19 + $0x40] sm:$0xff]  ;;  %v6052_v27 = vld [vmem:[%s11476_s19 + $0x18] sm:$0xff] }
 0xa6b   : > { %6076 = vrot.lane.b32.xlu0 %v11077_v46, %s11568_s9  ;;  %v11088_v49 = vmul.f32 %v10139_v39, %v6040_v30  ;;  %v6039_v50 = vmax.f32 %v6035_v48, 0.0  ;;  %v8081_v30 = vld [vmem:[%s11476_s19 + $0x48] sm:$0xff] }
 0xa6d   : > { %6201 = vrot.lane.b32.xlu1 %v11074_v41, %s11569_s13  ;;  %v11101_v51 = vmul.f32 %v10139_v39, %v6039_v50  ;;  %v9413_v50 = vunpack.i.h.bf16 %v11143_v63 }
 0xa6f   : > { %6197 = vrot.lane.b32.xlu0 %v11077_v46, %s11569_s13 }
 0xa71   : > { %9415 = vrot.lane.b32.xlu1 %v9652_v0, %s11570_s29 }
 0xa73   : > { %6088 = vrot.lane.b32.xlu0 %v11088_v49, %s11568_s9 }
 0xa75   : > { %6455 = vrot.lane.b32.xlu1 %v11088_v49, %s11570_s29 }
 0xa77   : > { %6447 = vrot.lane.b32.xlu0 %v11074_v41, %s11570_s29 }
 0xa79   : > { %6084 = vrot.lane.b32.xlu1 %v11101_v51, %s11568_s9 }
 0xa7b   : > { %6209 = vrot.lane.b32.xlu0 %v11088_v49, %s11569_s13 }
 0xa7d   : > { %6205 = vrot.lane.b32.xlu1 %v11101_v51, %s11569_s13  ;;  %s11573_s13 = sld [smem:[#allocation34_spill]] }
 0xa7f   : > { %6585 = vrot.lane.b32.xlu0 %v11088_v49, %s11564_s27 }
 0xa81   : > { %6443 = vrot.lane.b32.xlu1 %v11077_v46, %s11570_s29 }
 0xa83   : > { %6577 = vrot.lane.b32.xlu0 %v11074_v41, %s11564_s27 }
 0xa85   : > { %6451 = vrot.lane.b32.xlu1 %v11101_v51, %s11570_s29 }
 0xa87   : > { %6581 = vrot.lane.b32.xlu0 %v11101_v51, %s11564_s27 }
 0xa89   : > { %6579 = vrot.lane.b32.xlu1 %v9652_v0, %s11564_s27 }
 0xa8b   : > { %6573 = vrot.lane.b32.xlu0 %v11077_v46, %s11564_s27 }
 0xa8d   : > { %6575 = vrot.lane.b32.xlu1 %v9652_v0, %s11564_s27  ;;  %s11574_s27 = sld [smem:[#allocation35_spill]] }
 0xa8f   : > { %6719 = vperm.xlu0 %9218, %v6701_v53  }
 0xa91   : > { %6714 = vperm.xlu1 %9217, %v6700_v55  }
 0xa93   : > { %6709 = vperm.xlu0 %9218, %v6699_v56  }
 0xa95   : > { %6704 = vperm.xlu1 %9217, %v6698_v58   ;;  %v8088_v58 = vld [vmem:[%s11476_s19 + $0x60] sm:$0xff] }
 0xa97   : > { %9420 = vrot.lane.b32.xlu0 %v9652_v0, %s11568_s9 }
 0xa99   : > { %9430 = vrot.lane.b32.xlu1 %v9652_v0, %s11568_s9 }
 0xa9b   : > { %9425 = vrot.lane.b32.xlu0 %v9652_v0, %s11570_s29 }
 0xadb   : > { %v6081_v29 = vpop.permute.xlu1 %6080 }
 0xadc   : > { %v6091_v19 = vsel %vm1160_vm3, %v9392_v11, %v6081_v29 }
 0xadd   : > { %v6077_v31 = vpop.permute.xlu0 %6076 }
 0xade   : > { %v6090_v23 = vsel %vm1160_vm3, %v9393_v3, %v6077_v31 }
 0xadf   : > { %v6202_v34 = vpop.permute.xlu1 %6201 }
 0xae0   : > { %v6212_v25 = vsel %vm944_vm1, %v9402_v13, %v6202_v34  ;;  %v8091_v34 = vld [vmem:[%s11476_s19 + $0x78] sm:$0xff] }
 0xae1   : > { %v6198_v5 = vpop.permute.xlu0 %6197 }
 0xae2   : > { %v6211_v1 = vsel %vm944_vm1, %v9403_v43, %v6198_v5  ;;  %v8097_v5 = vld [vmem:[%s11476_s19 + $0x88] sm:$0xff] }
 0xae3   : > { %v11147_v7 = vpop.permute.xlu1 %9415 }
 0xae5   : > { %v6089_v9 = vpop.permute.xlu0 %6088 }
 0xae6   : > { %v6093_v44 = vsel %vm1160_vm3, %v9387_v8, %v6089_v9  ;;  %v8099_v8 = vld [vmem:[%s11476_s19 + $0x98] sm:$0xff] }
 0xae7   : > { %v6456_v42 = vpop.permute.xlu1 %6455  ;;  %8926 = vmatprep.subr.mxu0 %v6093_v44 }
 0xae8   : > { %8927 = vmatpush3.msra.mxu0 %v6093_v44  ;;  %v6462_v57 = vsel %vm1373_vm4, %v6456_v42, %v9407_v35 }
 0xae9   : > { %v11150_v12 = vpop.permute.xlu0 %6447 }
 0xaeb   : > { %v6085_v10 = vpop.permute.xlu1 %6084 }
 0xaec   : > { %v6092_v2 = vsel %vm1160_vm3, %v9388_v14, %v6085_v10 }
 0xaed   : > { %v6210_v54 = vpop.permute.xlu0 %6209  ;;  %8928 = vmatprep.subr.mxu0 %v6092_v2 }
 0xaee   : > { %8929 = vmatpush3.msra.mxu0 %v6092_v2  ;;  %v6214_v20 = vsel %vm944_vm1, %v9397_v15, %v6210_v54 }
 0xaef   : > { %8930 = vmatprep.subr.mxu0 %v6091_v19  ;;  %8940 = vmatprep.subr.mxu1 %v6214_v20  ;;  %v6206_v21 = vpop.permute.xlu1 %6205 }
 0xaf0   : > { %8931 = vmatpush3.msra.mxu0 %v6091_v19  ;;  %8941 = vmatpush3.msra.mxu1 %v6214_v20  ;;  %v6213_v4 = vsel %vm944_vm1, %v9398_v18, %v6206_v21  ;;  %vm7573_vm1 = vcmask 1043459  }
 0xaf1   : > { %v6586_v24 = vpop.permute.xlu0 %6585  ;;  %8932 = vmatprep.subr.mxu0 %v6090_v23  ;;  %8942 = vmatprep.subr.mxu1 %v6213_v4 }
 0xaf2   : > { %8933 = vmatpush3.msra.mxu0 %v6090_v23  ;;  %8943 = vmatpush3.msra.mxu1 %v6213_v4 }
 0xaf3   : > { %8935 = vmatmul.mubr.msk.f32.vlgmr.msra.gmra.mxu0 %vm953_vm0, %v8069_v40  ;;  %8944 = vmatprep.subr.mxu1 %v6212_v25  ;;  %v6444_v16 = vpop.permute.xlu1 %6443 }
 0xaf4   : > { %8954 = vmatprep.subr.mxu0 %v11088_v49  ;;  %8945 = vmatpush3.msra.mxu1 %v6212_v25 }
 0xaf5   : > { %8955 = vmatpush3.msra.mxu0 %v11088_v49  ;;  %8946 = vmatprep.subr.mxu1 %v6211_v1  ;;  %v6578_v36 = vpop.permute.xlu0 %6577  ;;  %v9412_v49 = vunpack.i.l.bf16 %v11143_v63 }
 0xaf6   : > { %8956 = vmatprep.subr.mxu0 %v11101_v51  ;;  %8937 = vmatprep.mubr.msk.f32.mxu0 %vm953_vm0, %v8070_v26 }
 0xaf7   : > { %8947 = vmatpush3.msra.mxu1 %v6211_v1  ;;  %8957 = vmatpush3.msra.mxu0 %v11101_v51  ;;  %v6452_v37 = vpop.permute.xlu1 %6451  ;;  %v9418_v51 = vunpack.i.h.bf16 %v11147_v7  ;;  %v6592_v53 = vsel %vm1484_vm5, %v6586_v24, %v9412_v49 }
 0xaf8   : > { %8938 = vmatmul.mubr.msk.f32.gmra.mxu0 %vm953_vm0, %v8071_v33  ;;  %8949 = vmatmul.mubr.msk.f32.vlgmr.msra.gmra.mxu1 %vm953_vm0, %v6050_v22  ;;  %v6461_v45 = vsel %vm1373_vm4, %v6452_v37, %v9408_v28 }
 0xaf9   : > { %8958 = vmatprep.subr.mxu0 %v11074_v41  ;;  %8968 = vmatprep.subr.mxu1 %v6462_v57  ;;  %v6582_v6 = vpop.permute.xlu0 %6581  ;;  %v6459_v55 = vsel %vm1373_vm4, %v6444_v16, %v9418_v51 }
 0xafa   : > { %8959 = vmatpush3.msra.mxu0 %v11074_v41  ;;  %8969 = vmatpush3.msra.mxu1 %v6462_v57  ;;  %v9417_v41 = vunpack.i.l.bf16 %v11147_v7  ;;  %v6591_v56 = vsel %vm1484_vm5, %v6582_v6, %v9413_v50  ;;  %v8098_v7 = vld [vmem:[%s11476_s19 + $0x90] sm:$0xff] }
 0xafb   : > { %8960 = vmatprep.subr.mxu0 %v11077_v46  ;;  %8970 = vmatprep.subr.mxu1 %v6461_v45  ;;  %v6580_v48 = vpop.permute.xlu1 %6579 }
 0xafc   : > { %8951 = vmatprep.mubr.msk.f32.mxu1 %vm953_vm0, %v6051_v38  ;;  %8961 = vmatpush3.msra.mxu0 %v11077_v46  ;;  %v6460_v52 = vsel %vm1373_vm4, %v11150_v12, %v9417_v41  ;;  %v8082_v46 = vld [vmem:[%s11476_s19 + $0x50] sm:$0xff]  ;;  %v6590_v29 = vsel %vm1484_vm5, %v6578_v36, %v6580_v48  ;;  %v6751_v48 = vld [vmem:[#allocation13 + $0x20] sm:$0xff] }
 0xafd   : > { %8962 = vmatprep.mubr.msk.f32.mxu0 %vm953_vm0, %v8080_v47  ;;  %8971 = vmatpush3.msra.mxu1 %v6461_v45  ;;  %v6574_v63 = vpop.permute.xlu0 %6573 }
 0xafe   : > { %8952 = vmatmul.mubr.msk.f32.gmra.mxu1 %vm953_vm0, %v6052_v27  ;;  %8963 = vmatmul.mubr.msk.f32.vlgmr.msra.gmra.mxu0 %vm953_vm0, %v8081_v30 }
 0xaff   : > { %8972 = vmatprep.subr.mxu1 %v6460_v52  ;;  %8982 = vmatprep.subr.mxu0 %v6592_v53  ;;  %v6576_v61 = vpop.permute.xlu1 %6575 }
 0xb00   : > { %8973 = vmatpush3.msra.mxu1 %v6460_v52  ;;  %8983 = vmatpush3.msra.mxu0 %v6592_v53  ;;  %v6589_v31 = vsel %vm1484_vm5, %v6574_v63, %v6576_v61  ;;  %vm7585_vm5 = vcmask 1047559  }
 0xb01   : > { %8974 = vmatprep.subr.mxu1 %v6459_v55  ;;  %8984 = vmatprep.subr.mxu0 %v6591_v56 }
 0xb02   : > { %8965 = vmatprep.mubr.msk.f32.mxu0 %vm953_vm0, %v8082_v46  ;;  %8975 = vmatpush3.msra.mxu1 %v6459_v55 }
 0xb03   : > { %8976 = vmatprep.mubr.msk.f32.mxu1 %vm953_vm0, %v8088_v58  ;;  %8985 = vmatpush3.msra.mxu0 %v6591_v56 }
 0xb04   : > { %8966 = vmatmul.mubr.msk.f32.gmra.mxu0 %vm953_vm0, %v8083_v59  ;;  %8977 = vmatmul.mubr.msk.f32.vlgmr.msra.gmra.mxu1 %vm953_vm0, %v8089_v60  ;;  %v6738_v59 = vld [vmem:[#allocation13] sm:$0xff] }
 0xb05   : > { %8986 = vmatprep.subr.mxu0 %v6590_v29  ;;  %8979 = vmatprep.mubr.msk.f32.mxu1 %vm953_vm0, %v8090_v62 }
 0xb06   : > { %8987 = vmatpush3.msra.mxu0 %v6590_v29  ;;  %8990 = vmatprep.mubr.msk.f32.mxu0 %vm953_vm0, %v8096_v32  ;;  %v6752_v32 = vld [vmem:[#allocation13 + $0x28] sm:$0xff]  ;;  %v6753_v29 = vld [vmem:[#allocation13 + $0x30] sm:$0xff] }
 0xb07   : > { %8988 = vmatprep.subr.mxu0 %v6589_v31 }
 0xb08   : > { %8989 = vmatpush3.msra.mxu0 %v6589_v31  ;;  %8980 = vmatmul.mubr.msk.f32.gmra.mxu1 %vm953_vm0, %v8091_v34  ;;  %v6754_v31 = vld [vmem:[#allocation13 + $0x38] sm:$0xff]  ;;  %v6982_v34 = vld [vmem:[#allocation13 + $0x40] sm:$0xff] }
 0xb09   : > { %8991 = vmatmul.mubr.msk.f32.vlgmr.msra.gmra.mxu0 %vm953_vm0, %v8097_v5  ;;  %9004 = vmatprep.mubr.msk.f32.mxu1 %vm953_vm0, %v6751_v48  ;;  %v7130_v5 = vld [vmem:[%s11573_s13 + $0x18] sm:$0xff] }
 0xb0a   : > { %8993 = vmatprep.mubr.msk.f32.mxu0 %vm953_vm0, %v8098_v7  ;;  %v6720_v3 = vpop.permute.xlu0 %6719  ;;  %v7129_v7 = vld [vmem:[%s11573_s13 + $0x10] sm:$0xff] }
 0xb0c   : > { %v6715_v40 = vpop.permute.xlu1 %6714 }
 0xb0d   : > { %8994 = vmatmul.mubr.msk.f32.gmra.mxu0 %vm953_vm0, %v8099_v8  ;;  %v7128_v8 = vld [vmem:[%s11573_s13 + $0x8] sm:$0xff] }
 0xb0e   : > { %v6710_v1 = vpop.permute.xlu0 %6709  ;;  %9018 = vmatprep.mubr.msk.f32.mxu0 %vm953_vm0, %v6738_v59 }
 0xb10   : > { %v6705_v27 = vpop.permute.xlu1 %6704 }
 0xbb3   : > { %v8936_v9 = vpop.f32.mrf.mxu0 }
 0xbb5   : > { %v6176_v44 = vpop.f32.mrf.mxu0 }
 0xbb8   : > { %v8939_v42 = vpop.f32.mrf.mxu0  ;;  %v8950_v12 = vpop.f32.mrf.mxu1 }
 0xbb9   : > { %v6303_v18 = vadd.f32 %v8950_v12, %v8936_v9  ;;  %v7127_v9 = vld [vmem:[%s11573_s13] sm:$0xff]  ;;  %v9431_v12 = vpop.permute.xlu1 %9430 }
 0xbba   : > { %v6186_v14 = vpop.f32.mrf.mxu0  ;;  %v6297_v10 = vpop.f32.mrf.mxu1 }
 0xbbb   : > { %v6298_v21 = vadd.f32 %v6297_v10, %v6176_v44  ;;  %v9421_v44 = vpop.permute.xlu0 %9420 }
 0xbbe   : > { %v8953_v11 = vpop.f32.mrf.mxu1  ;;  %v8964_v15 = vpop.f32.mrf.mxu0 }
 0xbbf   : > { %v6419_v13 = vadd.f32 %v8964_v15, %v6303_v18  ;;  %v6313_v24 = vadd.f32 %v8953_v11, %v8939_v42  ;;  %v9426_v42 = vpop.permute.xlu0 %9425  ;;  %v9422_v11 = vunpack.i.l.bf16 %v9421_v44  ;;  %v9423_v18 = vunpack.i.h.bf16 %v9421_v44 }
 0xbc0   : > { %v6307_v2 = vpop.f32.mrf.mxu1  ;;  %v6399_v54 = vpop.f32.mrf.mxu0 }
 0xbc1   : > { %v6418_v43 = vadd.f32 %v6399_v54, %v6298_v21  ;;  %v6308_v33 = vadd.f32 %v6307_v2, %v6186_v14 }
 0xbc4   : > { %v8967_v19 = vpop.f32.mrf.mxu0  ;;  %v8978_v20 = vpop.f32.mrf.mxu1 }
 0xbc5   : > { %v6565_v25 = vadd.f32 %v8978_v20, %v6419_v13  ;;  %v6421_v22 = vadd.f32 %v8967_v19, %v6313_v24  ;;  %v9432_v13 = vunpack.i.l.bf16 %v9431_v12 }
 0xbc6   : > { %v6409_v23 = vpop.f32.mrf.mxu0  ;;  %v6545_v4 = vpop.f32.mrf.mxu1 }
 0xbc7   : > { %v6564_v28 = vadd.f32 %v6545_v4, %v6418_v43  ;;  %v6420_v57 = vadd.f32 %v6409_v23, %v6308_v33  ;;  %v9428_v4 = vunpack.i.h.bf16 %v9426_v42 }
 0xbc8   : > { %v8981_v16 = vpop.f32.mrf.mxu1 }
 0xbc9   : > { %v8992_v26 = vpop.f32.mrf.mxu0  ;;  %v6567_v45 = vadd.f32 %v8981_v16, %v6421_v22  ;;  %v6740_v22 = vld [vmem:[#allocation13 + $0x10] sm:$0xff] }
 0xbca   : > { %v6695_v35 = vadd.f32 %v8992_v26, %v6565_v25  ;;  %v6555_v36 = vpop.f32.mrf.mxu1 }
 0xbcb   : > { %v6675_v37 = vpop.f32.mrf.mxu0  ;;  %v6566_v41 = vadd.f32 %v6555_v36, %v6420_v57  ;;  %v6983_v57 = vld [vmem:[#allocation13 + $0x48] sm:$0xff] }
 0xbcc   : > { %v6723_v38 = vadd.f32 %v6710_v1, %v6695_v35  ;;  %v6694_v47 = vadd.f32 %v6675_v37, %v6564_v28  ;;  %v6739_v1 = vld [vmem:[#allocation13 + $0x8] sm:$0xff]  ;;  %v6741_v37 = vld [vmem:[#allocation13 + $0x18] sm:$0xff] }
 0xbcd   : > { %v8995_v30 = vpop.f32.mrf.mxu0 }
 0xbce   : > { %v6727_v49 = vmax.f32 %v6723_v38, 0.0  ;;  %v6722_v6 = vadd.f32 %v6705_v27, %v6694_v47  ;;  %v6697_v50 = vadd.f32 %v8995_v30, %v6567_v45  ;;  %v6984_v45 = vld [vmem:[#allocation13 + $0x50] sm:$0xff]  ;;  %v6985_v38 = vld [vmem:[#allocation13 + $0x58] sm:$0xff] }
 0xbcf   : > { %v6685_v51 = vpop.f32.mrf.mxu0 }
 0xbd0   : > { %v6731_v52 = vmul.f32 %v10139_v39, %v6727_v49  ;;  %v6725_v53 = vadd.f32 %v6720_v3, %v6697_v50  ;;  %v6696_v46 = vadd.f32 %v6685_v51, %v6566_v41  ;;  %v6726_v55 = vmax.f32 %v6722_v6, 0.0 }
 0xbd1   : > { %v9427_v3 = vunpack.i.l.bf16 %v9426_v42  ;;  %v9661_v6 = vmov 1966171168  }
 0xbd2   : > { %v6729_v56 = vmax.f32 %v6725_v53, 0.0  ;;  %v6724_v58 = vadd.f32 %v6715_v40, %v6696_v46  ;;  %7006 = vrot.lane.b32.xlu1 %v6731_v52, %s11570_s29  ;;  %6866 = vrot.lane.b32.xlu0 %v6731_v52, %s11568_s9  ;;  %v6730_v62 = vmul.f32 %v10139_v39, %v6726_v55  ;;  %v9433_v40 = vunpack.i.h.bf16 %v9431_v12 }
 0xbd3   : > { %v7177_v50 = vunpack.c.l.s4 %v9661_v6 }
 0xbd4   : > { %v6733_v60 = vmul.f32 %v10139_v39, %v6729_v56  ;;  %v6728_v61 = vmax.f32 %v6724_v58, 0.0 }
 0xbd5   : > { %v7178_v59 = vunpack.c.0.s8 %v7177_v50 }
 0xbd6   : > { %v6732_v63 = vmul.f32 %v10139_v39, %v6728_v61  ;;  %6874 = vrot.lane.b32.xlu1 %v6733_v60, %s11568_s9  ;;  %8996 = vmatprep.subr.mxu1 %v6733_v60 }
 0xbd7   : > { %6862 = vrot.lane.b32.xlu0 %v6730_v62, %s11568_s9  ;;  %8997 = vmatpush3.msra.mxu1 %v6733_v60 }
 0xbd8   : > { %8998 = vmatprep.subr.mxu1 %v6732_v63 }
 0xbd9   : > { %8999 = vmatpush3.msra.mxu1 %v6732_v63 }
 0xbda   : > { %7014 = vrot.lane.b32.xlu1 %v6733_v60, %s11570_s29  ;;  %9000 = vmatprep.subr.mxu1 %v6731_v52  ;;  %v7180_v60 = vshrl.u32 %v888_v17, 7 }
 0xbdb   : > { %6870 = vrot.lane.b32.xlu0 %v6732_v63, %s11568_s9  ;;  %9001 = vmatpush3.msra.mxu1 %v6731_v52 }
 0xbdc   : > { %9002 = vmatprep.subr.mxu1 %v6730_v62 }
 0xbdd   : > { %9003 = vmatpush3.msra.mxu1 %v6730_v62 }
 0xbde   : > { %7010 = vrot.lane.b32.xlu1 %v6732_v63, %s11570_s29  ;;  %9005 = vmatmul.mubr.msk.f32.vlgmr.msra.gmra.mxu1 %vm953_vm0, %v6752_v32 }
 0xbdf   : > { %7008 = vrot.lane.b32.xlu0 %v9652_v0, %s11570_s29  ;;  %9007 = vmatprep.mubr.msk.f32.mxu1 %vm953_vm0, %v6753_v29 }
 0xbe2   : > { %7002 = vrot.lane.b32.xlu1 %v6730_v62, %s11570_s29  ;;  %9008 = vmatmul.mubr.msk.f32.gmra.mxu1 %vm953_vm0, %v6754_v31 }
 0xbe3   : > { %7004 = vrot.lane.b32.xlu0 %v9652_v0, %s11570_s29  ;;  %9032 = vmatprep.mubr.msk.f32.mxu1 %vm953_vm0, %v6982_v34 }
 0xbe6   : > { %7148 = vperm.xlu1 %9217, %v7130_v5  }
 0xbe7   : > { %7143 = vperm.xlu0 %9218, %v7129_v7  }
 0xbea   : > { %7138 = vperm.xlu1 %9217, %v7128_v8  }
 0xbeb   : > { %7133 = vperm.xlu0 %9218, %v7127_v9   ;;  %v11310_v9 = vsub.s32 %v7178_v59, %v7180_v60 }
 0xc44   : > { %v6867_v14 = vpop.permute.xlu0 %6866  ;;  %v7007_v10 = vpop.permute.xlu1 %7006 }
 0xc45   : > { %v6877_v43 = vsel %vm1160_vm3, %v9432_v13, %v6867_v14 }
 0xc48   : > { %v6875_v15 = vpop.permute.xlu1 %6874 }
 0xc49   : > { %v6863_v2 = vpop.permute.xlu0 %6862  ;;  %v6879_v54 = vsel %vm1160_vm3, %v9422_v11, %v6875_v15 }
 0xc4a   : > { %9010 = vmatprep.subr.mxu0 %v6879_v54  ;;  %v6876_v26 = vsel %vm1160_vm3, %v9433_v40, %v6863_v2 }
 0xc4b   : > { %9011 = vmatpush3.msra.mxu0 %v6879_v54 }
 0xc4c   : > { %v7015_v19 = vpop.permute.xlu1 %7014 }
 0xc4d   : > { %v6871_v20 = vpop.permute.xlu0 %6870  ;;  %v7021_v21 = vsel %vm1373_vm4, %v7015_v19, %v9427_v3 }
 0xc4e   : > { %v6878_v23 = vsel %vm1160_vm3, %v9423_v18, %v6871_v20  ;;  %9024 = vmatprep.subr.mxu1 %v7021_v21  ;;  %vm7579_vm3 = vcmask 1045509  }
 0xc4f   : > { %9012 = vmatprep.subr.mxu0 %v6878_v23  ;;  %9025 = vmatpush3.msra.mxu1 %v7021_v21 }
 0xc50   : > { %9013 = vmatpush3.msra.mxu0 %v6878_v23  ;;  %v7011_v24 = vpop.permute.xlu1 %7010 }
 0xc51   : > { %v7009_v25 = vpop.permute.xlu0 %7008  ;;  %9014 = vmatprep.subr.mxu0 %v6877_v43  ;;  %v7020_v16 = vsel %vm1373_vm4, %v7011_v24, %v9428_v4 }
 0xc52   : > { %9015 = vmatpush3.msra.mxu0 %v6877_v43  ;;  %9026 = vmatprep.subr.mxu1 %v7020_v16  ;;  %v7019_v33 = vsel %vm1373_vm4, %v7007_v10, %v7009_v25 }
 0xc53   : > { %9016 = vmatprep.subr.mxu0 %v6876_v26  ;;  %9027 = vmatpush3.msra.mxu1 %v7020_v16 }
 0xc54   : > { %9017 = vmatpush3.msra.mxu0 %v6876_v26  ;;  %9028 = vmatprep.subr.mxu1 %v7019_v33  ;;  %v7003_v28 = vpop.permute.xlu1 %7002 }
 0xc55   : > { %v7005_v35 = vpop.permute.xlu0 %7004  ;;  %9019 = vmatmul.mubr.msk.f32.vlgmr.msra.gmra.mxu0 %vm953_vm0, %v6739_v1  ;;  %9029 = vmatpush3.msra.mxu1 %v7019_v33 }
 0xc56   : > { %v7018_v36 = vsel %vm1373_vm4, %v7003_v28, %v7005_v35  ;;  %9021 = vmatprep.mubr.msk.f32.mxu0 %vm953_vm0, %v6740_v22  ;;  %9038 = vmatprep.subr.mxu0 %v9652_v0  ;;  %vm7582_vm4 = vcmask 1046534  }
 0xc57   : > { %9030 = vmatprep.subr.mxu1 %v7018_v36 }
 0xc58   : > { %9031 = vmatpush3.msra.mxu1 %v7018_v36 }
 0xc59   : > { %9022 = vmatmul.mubr.msk.f32.gmra.mxu0 %vm953_vm0, %v6741_v37  ;;  %9033 = vmatmul.mubr.msk.f32.vlgmr.msra.gmra.mxu1 %vm953_vm0, %v6983_v57 }
 0xc5a   : > { %9035 = vmatprep.mubr.msk.f32.mxu1 %vm953_vm0, %v6984_v45  ;;  %9046 = vmatprep.mubr.msk.f32.mxu0 %vm9662_vm13, %v9652_v0 }
 0xc5d   : > { %9036 = vmatmul.mubr.msk.f32.gmra.mxu1 %vm953_vm0, %v6985_v38 }
 0xc61   : > { %v7149_v48 = vpop.permute.xlu1 %7148 }
 0xc62   : > { %v7144_v41 = vpop.permute.xlu0 %7143 }
 0xc65   : > { %v7139_v61 = vpop.permute.xlu1 %7138 }
 0xc66   : > { %v7134_v31 = vpop.permute.xlu0 %7133 }
 0xc9e   : > { %v9006_v47 = vpop.f32.mrf.mxu1 }
 0xca0   : > { %v6833_v27 = vpop.f32.mrf.mxu1 }
 0xca2   : > { %v9009_v30 = vpop.f32.mrf.mxu1 }
 0xca4   : > { %v6843_v51 = vpop.f32.mrf.mxu1 }
 0xd15   : > { %v9020_v49 = vpop.f32.mrf.mxu0 }
 0xd16   : > { %v6968_v53 = vadd.f32 %v9020_v49, %v9006_v47 }
 0xd17   : > { %v6962_v52 = vpop.f32.mrf.mxu0 }
 0xd18   : > { %v6963_v56 = vadd.f32 %v6962_v52, %v6833_v27 }
 0xd19   : > { %v9023_v46 = vpop.f32.mrf.mxu0  ;;  %v9034_v55 = vpop.f32.mrf.mxu1 }
 0xd1a   : > { %v7124_v58 = vadd.f32 %v9034_v55, %v6968_v53  ;;  %v6978_v63 = vadd.f32 %v9023_v46, %v9009_v30 }
 0xd1b   : > { %v7104_v62 = vpop.f32.mrf.mxu1  ;;  %v6972_v18 = vpop.f32.mrf.mxu0 }
 0xd1c   : > { %v7152_v32 = vadd.f32 %v7139_v61, %v7124_v58  ;;  %v7123_v29 = vadd.f32 %v7104_v62, %v6963_v56  ;;  %v6973_v43 = vadd.f32 %v6972_v18, %v6843_v51 }
 0xd1d   : > { %v9037_v34 = vpop.f32.mrf.mxu1 }
 0xd1e   : > { %v7156_v5 = vmax.f32 %v7152_v32, 0.0  ;;  %v7151_v7 = vadd.f32 %v7134_v31, %v7123_v29  ;;  %v7126_v8 = vadd.f32 %v9037_v34, %v6978_v63 }
 0xd1f   : > { %v7114_v23 = vpop.f32.mrf.mxu1 }
 0xd20   : > { %v7160_v44 = vmul.f32 %v10139_v39, %v7156_v5  ;;  %v7155_v42 = vmax.f32 %v7151_v7, 0.0  ;;  %v7154_v12 = vadd.f32 %v7149_v48, %v7126_v8  ;;  %v7125_v25 = vadd.f32 %v7114_v23, %v6973_v43 }
 0xd22   : > { %v7224_v14 = vcombine.high %v7160_v44, %v7160_v44  ;;  %v7159_v10 = vmul.f32 %v10139_v39, %v7155_v42  ;;  %v7158_v17 = vmax.f32 %v7154_v12, 0.0  ;;  %v7231_v11 = vrot.slane %v7160_v44, %v11310_v9 }
 0xd23   : > { %v7153_v28 = vadd.f32 %v7144_v41, %v7125_v25 }
 0xd24   : > { %v7238_v15 = vrot.slane %v7224_v14, %v11310_v9  ;;  %v7247_v2 = vrot.slane %v7231_v11, %v11310_v9  ;;  %v7239_v54 = vcombine.high %v7231_v11, %v7231_v11  ;;  %v7182_v3 = vrot.slane %v7159_v10, %v11310_v9 }
 0xd25   : > { %v7162_v20 = vmul.f32 %v10139_v39, %v7158_v17  ;;  %v7175_v37 = vcombine.high %v7159_v10, %v7159_v10  ;;  %v7157_v47 = vmax.f32 %v7153_v28, 0.0 }
 0xd26   : > { %v7254_v19 = vrot.slane %v7238_v15, %v11310_v9  ;;  %v7428_v21 = vsel %vm7403_vm12, %v7247_v2, 0.0  ;;  %v7261_v13 = vrot.slane %v7239_v54, %v11310_v9  ;;  %v7198_v40 = vrot.slane %v7182_v3, %v11310_v9 }
 0xd27   : > { %7429 = vadd.xlane.f32.xlu1 %v7428_v21  ;;  %v7190_v24 = vcombine.high %v7182_v3, %v7182_v3  ;;  %v7269_v26 = vcombine.high %v7247_v2, %v7247_v2  ;;  %v7329_v1 = vrot.slane %v7162_v20, %v11310_v9  ;;  %v7240_v38 = vcombine.high %v7238_v15, %v7238_v15 }
 0xd28   : > { %v7440_v4 = vsel %vm7403_vm12, %v7254_v19, 0.0  ;;  %v7431_v16 = vsel %vm7403_vm12, %v7261_v13, 0.0  ;;  %v7404_v33 = vsel %vm7403_vm12, %v7198_v40, 0.0  ;;  %v7271_v45 = vcombine.high %v7261_v13, %v7261_v13 }
 0xd29   : > { %7441 = vadd.xlane.f32.xlu0 %v7440_v4  ;;  %v7212_v22 = vrot.slane %v7190_v24, %v11310_v9  ;;  %v7434_v35 = vsel %vm7403_vm12, %v7269_v26, 0.0  ;;  %v7345_v36 = vrot.slane %v7329_v1, %v11310_v9  ;;  %v7220_v30 = vcombine.high %v7198_v40, %v7198_v40 }
 0xd2a   : > { %v7437_v48 = vsel %vm7403_vm12, %v7271_v45, 0.0  ;;  %v7268_v49 = vrot.slane %v7240_v38, %v11310_v9  ;;  %v11335_v41 = vrot.slane %v7175_v37, %v11310_v9  ;;  %v7161_v6 = vmul.f32 %v10139_v39, %v7157_v47 }
 0xd2b   : > { %7432 = vadd.xlane.f32.xlu1 %v7431_v16  ;;  %v7407_v57 = vsel %vm7403_vm12, %v7212_v22, 0.0  ;;  %v7476_v27 = vsel %vm7403_vm12, %v7345_v36, 0.0  ;;  %v7410_v50 = vsel %vm7403_vm12, %v7220_v30, 0.0  ;;  %v7270_v51 = vcombine.high %v7254_v19, %v7254_v19 }
 0xd2c   : > { %v7337_v52 = vcombine.high %v7329_v1, %v7329_v1  ;;  %v7322_v53 = vcombine.high %v7162_v20, %v7162_v20  ;;  %v7443_v46 = vsel %vm7403_vm12, %v7268_v49, 0.0  ;;  %v11342_v55 = vrot.slane %v11335_v41, %v11310_v9 }
 0xd2d   : > { %7405 = vadd.xlane.f32.xlu0 %v7404_v33  ;;  %v7280_v56 = vrot.slane %v7161_v6, %v11310_v9  ;;  %v7446_v58 = vsel %vm7403_vm12, %v7270_v51, 0.0  ;;  %v7367_v60 = vcombine.high %v7345_v36, %v7345_v36  ;;  %v7222_v63 = vcombine.high %v7212_v22, %v7212_v22 }
 0xd2e   : > { %v7359_v59 = vrot.slane %v7337_v52, %v11310_v9  ;;  %v7416_v39 = vsel %vm7403_vm12, %v11342_v55, 0.0  ;;  %v7336_v61 = vrot.slane %v7322_v53, %v11310_v9  ;;  %v7273_v34 = vcombine.high %v7161_v6, %v7161_v6 }
 0xd2f   : > { %7435 = vadd.xlane.f32.xlu1 %v7434_v35  ;;  %v7296_v32 = vrot.slane %v7280_v56, %v11310_v9  ;;  %v7482_v29 = vsel %vm7403_vm12, %v7367_v60, 0.0  ;;  %v7413_v5 = vsel %vm7403_vm12, %v7222_v63, 0.0  ;;  %v7288_v8 = vcombine.high %v7280_v56, %v7280_v56 }
 0xd30   : > { %v7479_v62 = vsel %vm7403_vm12, %v7359_v59, 0.0  ;;  %v7352_v31 = vrot.slane %v7336_v61, %v11310_v9  ;;  %v7287_v10 = vrot.slane %v7273_v34, %v11310_v9  ;;  %v7369_v3 = vcombine.high %v7359_v59, %v7359_v59 }
 0xd31   : > { %7408 = vadd.xlane.f32.xlu0 %v7407_v57  ;;  %v7318_v7 = vcombine.high %v7296_v32, %v7296_v32  ;;  %v7310_v14 = vrot.slane %v7288_v8, %v11310_v9  ;;  %v7452_v17 = vsel %vm7403_vm12, %v7296_v32, 0.0  ;;  %v7338_v18 = vcombine.high %v7336_v61, %v7336_v61 }
 0xd32   : > { %v7488_v44 = vsel %vm7403_vm12, %v7352_v31, 0.0  ;;  %v7368_v12 = vcombine.high %v7352_v31, %v7352_v31  ;;  %v7289_v2 = vcombine.high %v7287_v10, %v7287_v10  ;;  %v7485_v21 = vsel %vm7403_vm12, %v7369_v3, 0.0 }
 0xd33   : > { %7477 = vadd.xlane.f32.xlu1 %v7476_v27  ;;  %v7458_v42 = vsel %vm7403_vm12, %v7318_v7, 0.0  ;;  %v7320_v15 = vcombine.high %v7310_v14, %v7310_v14  ;;  %v7455_v54 = vsel %vm7403_vm12, %v7310_v14, 0.0  ;;  %v7366_v13 = vrot.slane %v7338_v18, %v11310_v9 }
 0xd34   : > { %v7494_v11 = vsel %vm7403_vm12, %v7368_v12, 0.0  ;;  %v7317_v20 = vrot.slane %v7289_v2, %v11310_v9  ;;  %v7272_v4 = vcombine.high %v7268_v49, %v7268_v49  ;;  %v7303_v40 = vrot.slane %v7287_v10, %v11310_v9 }
 0xd35   : > { %7438 = vadd.xlane.f32.xlu0 %v7437_v48  ;;  %v7461_v19 = vsel %vm7403_vm12, %v7320_v15, 0.0  ;;  %v7491_v24 = vsel %vm7403_vm12, %v7366_v13, 0.0  ;;  %v7191_v16 = vcombine.high %v11335_v41, %v11335_v41  ;;  %v7370_v1 = vcombine.high %v7366_v13, %v7366_v13 }
 0xd36   : > { %v7467_v23 = vsel %vm7403_vm12, %v7317_v20, 0.0  ;;  %v7449_v43 = vsel %vm7403_vm12, %v7272_v4, 0.0  ;;  %v7319_v25 = vcombine.high %v7303_v40, %v7303_v40  ;;  %v7464_v26 = vsel %vm7403_vm12, %v7303_v40, 0.0 }
 0xd37   : > { %7411 = vadd.xlane.f32.xlu1 %v7410_v50  ;;  %v7321_v22 = vcombine.high %v7317_v20, %v7317_v20  ;;  %v7219_v28 = vrot.slane %v7191_v16, %v11310_v9  ;;  %v7497_v35 = vsel %vm7403_vm12, %v7370_v1, 0.0  ;;  %v7221_v45 = vcombine.high %v11342_v55, %v11342_v55 }
 0xd38   : > { %v7470_v33 = vsel %vm7403_vm12, %v7319_v25, 0.0 }
 0xd39   : > { %7444 = vadd.xlane.f32.xlu0 %v7443_v46  ;;  %v7473_v36 = vsel %vm7403_vm12, %v7321_v22, 0.0  ;;  %v7223_v37 = vcombine.high %v7219_v28, %v7219_v28  ;;  %v7419_v57 = vsel %vm7403_vm12, %v7219_v28, 0.0  ;;  %v7422_v47 = vsel %vm7403_vm12, %v7221_v45, 0.0 }
 0xd3b   : > { %7447 = vadd.xlane.f32.xlu1 %v7446_v58  ;;  %v7425_v38 = vsel %vm7403_vm12, %v7223_v37, 0.0 }
 0xd3d   : > { %7417 = vadd.xlane.f32.xlu0 %v7416_v39 }
 0xd3f   : > { %7480 = vadd.xlane.f32.xlu1 %v7479_v62 }
 0xd41   : > { %7483 = vadd.xlane.f32.xlu0 %v7482_v29 }
 0xd43   : > { %7414 = vadd.xlane.f32.xlu1 %v7413_v5 }
 0xd45   : > { %7489 = vadd.xlane.f32.xlu0 %v7488_v44 }
 0xd47   : > { %7459 = vadd.xlane.f32.xlu1 %v7458_v42 }
 0xd49   : > { %7453 = vadd.xlane.f32.xlu0 %v7452_v17 }
 0xd4b   : > { %7495 = vadd.xlane.f32.xlu1 %v7494_v11 }
 0xd4d   : > { %7456 = vadd.xlane.f32.xlu0 %v7455_v54 }
 0xd4f   : > { %7462 = vadd.xlane.f32.xlu1 %v7461_v19 }
 0xd51   : > { %7486 = vadd.xlane.f32.xlu0 %v7485_v21 }
 0xd53   : > { %7468 = vadd.xlane.f32.xlu1 %v7467_v23 }
 0xd55   : > { %7492 = vadd.xlane.f32.xlu0 %v7491_v24 }
 0xd57   : > { %7450 = vadd.xlane.f32.xlu1 %v7449_v43 }
 0xd59   : > { %7465 = vadd.xlane.f32.xlu0 %v7464_v26 }
 0xd5b   : > { %7471 = vadd.xlane.f32.xlu1 %v7470_v33 }
 0xd5d   : > { %7498 = vadd.xlane.f32.xlu0 %v7497_v35 }
 0xd5f   : > { %7474 = vadd.xlane.f32.xlu1 %v7473_v36 }
 0xd61   : > { %7420 = vadd.xlane.f32.xlu0 %v7419_v57 }
 0xd63   : > { %7426 = vadd.xlane.f32.xlu1 %v7425_v38 }
 0xd65   : > { %7423 = vadd.xlane.f32.xlu0 %v7422_v47 }
 0xdb0   : > { %v7430_v9 = vpop.xlane.xlu1 %7429 }
 0xdb1   : > { %v7508_v20 = vmul.f32 0.0625, %v7430_v9 }
 0xdb2   : > { %v7442_v27 = vpop.xlane.xlu0 %7441 }
 0xdb3   : > { %v11391_v42 = vmul.f32 0.0625, %v7442_v27 }
 0xdb4   : > { %v7433_v30 = vpop.xlane.xlu1 %7432 }
 0xdb5   : > { %v7509_v29 = vmul.f32 0.0625, %v7433_v30  ;;  %v7593_v4 = vrot.slane %v11391_v42, 4 }
 0xdb6   : > { %v7406_v48 = vpop.xlane.xlu0 %7405 }
 0xdb7   : > { %v7587_v14 = vrot.slane %v7509_v29, 7  ;;  %v7500_v33 = vmul.f32 0.0625, %v7406_v48 }
 0xdb8   : > { %v7436_v49 = vpop.xlane.xlu1 %7435 }
 0xdb9   : > { %v7510_v34 = vmul.f32 0.0625, %v7436_v49  ;;  %v7588_v43 = vsel %vm7567_vm14, %v7587_v14, %v7508_v20 }
 0xdba   : > { %v7409_v41 = vpop.xlane.xlu0 %7408 }
 0xdbb   : > { %v7589_v2 = vrot.slane %v7510_v34, 6  ;;  %v7501_v25 = vmul.f32 0.0625, %v7409_v41 }
 0xdbc   : > { %v7478_v6 = vpop.xlane.xlu1 %7477 }
 0xdbd   : > { %v7524_v10 = vmul.f32 0.0625, %v7478_v6  ;;  %v7590_v22 = vsel %vm7570_vm15, %v7589_v2, %v7588_v43  ;;  %v7566_v49 = vrot.slane %v7501_v25, 7 }
 0xdbe   : > { %v7439_v50 = vpop.xlane.xlu0 %7438 }
 0xdbf   : > { %v7511_v17 = vmul.f32 0.0625, %v7439_v50  ;;  %v7568_v2 = vsel %vm7567_vm14, %v7566_v49, %v7500_v33 }
 0xdc0   : > { %v11383_v51 = vpop.xlane.xlu1 %7411 }
 0xdc1   : > { %v7591_v16 = vrot.slane %v7511_v17, 5  ;;  %v7502_v41 = vmul.f32 0.0625, %v11383_v51 }
 0xdc2   : > { %v7445_v52 = vpop.xlane.xlu0 %7444 }
 0xdc3   : > { %v7513_v47 = vmul.f32 0.0625, %v7445_v52  ;;  %v7592_v48 = vsel %vm7573_vm1, %v7591_v16, %v7590_v22  ;;  %v7569_v34 = vrot.slane %v7502_v41, 6 }
 0xdc4   : > { %v11385_v53 = vpop.xlane.xlu1 %7447 }
 0xdc5   : > { %v7514_v52 = vmul.f32 0.0625, %v11385_v53 }
 0xdc6   : > { %v11387_v46 = vpop.xlane.xlu0 %7417 }
 0xdc7   : > { %v7504_v17 = vmul.f32 0.0625, %v11387_v46 }
 0xdc8   : > { %v7481_v55 = vpop.xlane.xlu1 %7480 }
 0xdc9   : > { %v7525_v63 = vmul.f32 0.0625, %v7481_v55  ;;  %v7575_v43 = vrot.slane %v7504_v17, 4 }
 0xdca   : > { %v7484_v56 = vpop.xlane.xlu0 %7483 }
 0xdcb   : > { %v7526_v5 = vmul.f32 0.0625, %v7484_v56  ;;  %v7615_v8 = vrot.slane %v7525_v63, 7 }
 0xdcc   : > { %v11389_v58 = vpop.xlane.xlu1 %7414 }
 0xdcd   : > { %v7617_v54 = vrot.slane %v7526_v5, 6  ;;  %v7616_v21 = vsel %vm7567_vm14, %v7615_v8, %v7524_v10  ;;  %v7503_v55 = vmul.f32 0.0625, %v11389_v58  ;;  %v7594_v58 = vsel %vm7576_vm2, %v7593_v4, %v7592_v48 }
 0xdce   : > { %v7490_v59 = vpop.xlane.xlu0 %7489  ;;  %v7597_v10 = vrot.slane %v7514_v52, 2 }
 0xdcf   : > { %v7528_v40 = vmul.f32 0.0625, %v7490_v59  ;;  %v7618_v28 = vsel %vm7570_vm15, %v7617_v54, %v7616_v21 }
 0xdd0   : > { %v7460_v39 = vpop.xlane.xlu1 %7459 }
 0xdd1   : > { %v7518_v11 = vmul.f32 0.0625, %v7460_v39  ;;  %v7621_v9 = vrot.slane %v7528_v40, 4 }
 0xdd2   : > { %v7454_v60 = vpop.xlane.xlu0 %7453 }
 0xdd3   : > { %v7516_v3 = vmul.f32 0.0625, %v7454_v60  ;;  %v7603_v26 = vrot.slane %v7518_v11, 6 }
 0xdd4   : > { %v7496_v61 = vpop.xlane.xlu1 %7495 }
 0xdd5   : > { %v7530_v27 = vmul.f32 0.0625, %v7496_v61 }
 0xdd6   : > { %v7457_v62 = vpop.xlane.xlu0 %7456 }
 0xdd7   : > { %v7517_v32 = vmul.f32 0.0625, %v7457_v62  ;;  %v7625_v29 = vrot.slane %v7530_v27, 2 }
 0xdd8   : > { %v7463_v31 = vpop.xlane.xlu1 %7462 }
 0xdd9   : > { %v7601_v12 = vrot.slane %v7517_v32, 7  ;;  %v7519_v18 = vmul.f32 0.0625, %v7463_v31  ;;  %v7595_v32 = vrot.slane %v7513_v47, 3 }
 0xdda   : > { %v7487_v7 = vpop.xlane.xlu0 %7486 }
 0xddb   : > { %v7527_v44 = vmul.f32 0.0625, %v7487_v7  ;;  %v7602_v24 = vsel %vm7567_vm14, %v7601_v12, %v7516_v3  ;;  %v7605_v35 = vrot.slane %v7519_v18, 5  ;;  %v7596_v54 = vsel %vm7579_vm3, %v7595_v32, %v7594_v58 }
 0xddc   : > { %v7469_v15 = vpop.xlane.xlu1 %7468  ;;  %v7604_v37 = vsel %vm7570_vm15, %v7603_v26, %v7602_v24  ;;  %v7598_v24 = vsel %vm7582_vm4, %v7597_v10, %v7596_v54 }
 0xddd   : > { %v7619_v13 = vrot.slane %v7527_v44, 5  ;;  %v7521_v30 = vmul.f32 0.0625, %v7469_v15  ;;  %v7606_v56 = vsel %vm7573_vm1, %v7605_v35, %v7604_v37  ;;  %v7572_v44 = vrot.slane %v7503_v55, 5  ;;  %v7532_v35 = vld [vmem:[%s11574_s27] sm:$0xf] }
 0xdde   : > { %v7493_v19 = vpop.xlane.xlu0 %7492  ;;  %v7533_v37 = vld [vmem:[%s11575_s21] sm:$0xf] }
 0xddf   : > { %v7529_v23 = vmul.f32 0.0625, %v7493_v19  ;;  %v7620_v57 = vsel %vm7573_vm1, %v7619_v13, %v7618_v28  ;;  %v7609_v51 = vrot.slane %v7521_v30, 3  ;;  %v7571_v19 = vsel %vm7570_vm15, %v7569_v34, %v7568_v2 }
 0xde0   : > { %v7451_v1 = vpop.xlane.xlu1 %7450  ;;  %v7622_v59 = vsel %vm7576_vm2, %v7621_v9, %v7620_v57  ;;  %v7574_v13 = vsel %vm7573_vm1, %v7572_v44, %v7571_v19 }
 0xde1   : > { %v7623_v45 = vrot.slane %v7529_v23, 3  ;;  %v7515_v31 = vmul.f32 0.0625, %v7451_v1  ;;  %v7577_v26 = vsel %vm7576_vm2, %v7575_v43, %v7574_v13 }
 0xde2   : > { %v7466_v36 = vpop.xlane.xlu0 %7465 }
 0xde3   : > { %v7520_v38 = vmul.f32 0.0625, %v7466_v36  ;;  %v7624_v61 = vsel %vm7579_vm3, %v7623_v45, %v7622_v59  ;;  %v7599_v3 = vrot.slane %v7515_v31, 1 }
 0xde4   : > { %v7472_v50 = vpop.xlane.xlu1 %7471  ;;  %v7626_v14 = vsel %vm7582_vm4, %v7625_v29, %v7624_v61 }
 0xde5   : > { %v7607_v6 = vrot.slane %v7520_v38, 4  ;;  %v7522_v39 = vmul.f32 0.0625, %v7472_v50  ;;  %v7600_v16 = vsel %vm7585_vm5, %v7599_v3, %v7598_v24 }
 0xde6   : > { %v7499_v60 = vpop.xlane.xlu0 %7498 }
 0xde7   : > { %v7608_v62 = vsel %vm7576_vm2, %v7607_v6, %v7606_v56  ;;  %v7531_v63 = vmul.f32 0.0625, %v7499_v60  ;;  %v7611_v5 = vrot.slane %v7522_v39, 2 }
 0xde8   : > { %v7475_v8 = vpop.xlane.xlu1 %7474  ;;  %v7610_v42 = vsel %vm7579_vm3, %v7609_v51, %v7608_v62 }
 0xde9   : > { %v7627_v7 = vrot.slane %v7531_v63, 1  ;;  %v7523_v12 = vmul.f32 0.0625, %v7475_v8  ;;  %v7612_v20 = vsel %vm7582_vm4, %v7611_v5, %v7610_v42 }
 0xdea   : > { %v7421_v53 = vpop.xlane.xlu0 %7420 }
 0xdeb   : > { %v7505_v11 = vmul.f32 0.0625, %v7421_v53  ;;  %v7628_v15 = vsel %vm7585_vm5, %v7627_v7, %v7626_v14  ;;  %v7613_v18 = vrot.slane %v7523_v12, 1 }
 0xdec   : > { %9039 = vmatpush3.msra.mxu0 %v7628_v15  ;;  %v7427_v21 = vpop.xlane.xlu1 %7426 }
 0xded   : > { %9040 = vmatprep.subr.mxu0 %v9652_v0  ;;  %v7578_v46 = vrot.slane %v7505_v11, 3  ;;  %v7507_v23 = vmul.f32 0.0625, %v7427_v21  ;;  %v7614_v4 = vsel %vm7585_vm5, %v7613_v18, %v7612_v20 }
 0xdee   : > { %v7424_v40 = vpop.xlane.xlu0 %7423  ;;  %9041 = vmatpush3.msra.mxu0 %v7614_v4 }
 0xdef   : > { %v7506_v25 = vmul.f32 0.0625, %v7424_v40  ;;  %9042 = vmatprep.subr.mxu0 %v9652_v0  ;;  %v7580_v33 = vsel %vm7579_vm3, %v7578_v46, %v7577_v26  ;;  %v7584_v22 = vrot.slane %v7507_v23, 1 }
 0xdf0   : > { %9043 = vmatpush3.msra.mxu0 %v7600_v16 }
 0xdf1   : > { %v7581_v1 = vrot.slane %v7506_v25, 2  ;;  %9044 = vmatprep.subr.mxu0 %v9652_v0 }
 0xdf3   : > { %v7583_v28 = vsel %vm7582_vm4, %v7581_v1, %v7580_v33 }
 0xdf4   : > { %v7586_v36 = vsel %vm7585_vm5, %v7584_v22, %v7583_v28 }
 0xdf5   : > { %9045 = vmatpush3.msra.mxu0 %v7586_v36 }
 0xdf6   : > { %9047 = vmatmul.mubr.msk.f32.vlgmr.msra.gmra.mxu0 %vm953_vm0, %v7532_v35 }
 0xeb6   : > { %v7702_v57 = vpop.f32.mrf.mxu0 }
 0xeb7   : > { %v7703_v45 = vadd.f32 %v7702_v57, %v7533_v37 }
 0xeb8   : > { %v9048_v38 = vpop.f32.mrf.mxu0 }
 0xeb9   : > { %v7707_v0 = vsel %vm7706_vm6, %v7703_v45, -inf }
 0xeba   : > { %v7708_v47 = vrot.slane %v7707_v0, 4 }
 0xebc   : > { %v7709_v9 = vmax.f32 %v7707_v0, %v7708_v47 }
 0xebe   : > { %v7710_v27 = vrot.slane %v7709_v9, 2 }
 0xec0   : > { %v7711_v30 = vmax.f32 %v7709_v9, %v7710_v27 }
 0xec2   : > { %v7712_v49 = vrot.slane %v7711_v30, 1 }
 0xec4   : > { %v7713_v48 = vmax.f32 %v7711_v30, %v7712_v49 }
 0xec6   : > { %v7714_v41 = vsub.f32 %v7703_v45, %v7713_v48 }
 0xec8   : > { %v7715_v6 = vmul.f32 1.442695, %v7714_v41 }
 0xeca   : > { %9434 = vpow2.f32 %v7715_v6 }
 0xed7   : > { %v9435_v50 = vpop.eup %9434 }
 0xed8   : > { %v7717_v55 = vsel %vm7706_vm6, %v9435_v50, 0.0 }
 0xed9   : > { %v7718_v56 = vrot.slane %v7717_v55, 4 }
 0xedb   : > { %v7719_v59 = vadd.f32 %v7718_v56, %v7717_v55 }
 0xedd   : > { %v7720_v39 = vrot.slane %v7719_v59, 2 }
 0xedf   : > { %v7721_v60 = vadd.f32 %v7720_v39, %v7719_v59 }
 0xee1   : > { %v7722_v52 = vrot.slane %v7721_v60, 1 }
 0xee3   : > { %v7723_v61 = vadd.f32 %v7722_v52, %v7721_v60 }
 0xee5   : > { %9436 = vlog2.f32 %v7723_v61 }
 0xef2   : > { %v9437_v62 = vpop.eup %9436 }
 0xef3   : > { %v7725_v63 = vmul.f32 0.6931472, %v9437_v62 }
 0xef5   : > { %v7726_v32 = vadd.f32 %v7725_v63, %v7713_v48 }
 0xef7   : > { %v7727_v29 = vsub.f32 %v7703_v45, %v7726_v32 }
 0xef9   : > { %7728 = vst.msk [vmem:[%s855_s8] sm:$0xf] %vm7706_vm6, %v7727_v29 }
 0xefa PF: > { %p38_p0 = scmp.ge.s32.totalorder %s9902_s4, 4   ;;  %s11577_s29 = smov %s9634_s2 }
 0xefb   : > { %s11578_s2 = smov %s9638_s6  ;;  %s11579_s6 = smov %s9913_s24 }
 0xefc   : > { %s11580_s30 = smov %s9902_s4  ;;  %40 = sbr.rel (!%p38_p0) target bundleno = 26 (0x1a), region = 219 }
 0xf01   :  { %7748 = vsyncpa [#allocation6], 1 }
 0xf02   :  { %7750 = vsyncpa [#allocation6 + $0x1], 1 }
 0xf03   :  { %7751 = vsyncpa [#allocation8], 1 }
 0xf04   :  { %7752 = vsyncpa [#allocation11], 1 }
 0xf05   :  { %7753 = vsyncpa [#allocation14], 1 }

</bundles_post_ra>
